<compile_context>
chip_gen: v7x
topology: tpu7x:2x2x1
jax: 0.10.0
libtpu: 0.0.40
codegen_flags: <defaults>
</compile_context>

<pallas_src>
import math

import jax
import jax.numpy as jnp
from jax.experimental import pallas as pl
from jax.experimental.pallas import tpu as pltpu


# ----------------------------- config (small test sizes) -----------------------------
VOCAB_SIZE = 10
VOCAB_PAD = 16                    # padded for the one-hot embedding matmul
D_MODEL = 32
N_HEADS = 4
HEAD_DIM = D_MODEL // N_HEADS
N_LAYERS = 2
SEQ = 16
BATCH = 2
N_OUT = 10
N_OUT_PAD = 128                   # lane-dense output head
LN_EPS = 1e-5
NEG_INF = -1e30


# ----------------------------- in-kernel helpers -----------------------------
def _layernorm(x, w, b):
    # x: (N, D) f32, w/b: (1, D) f32  -- statistics in f32
    mean = jnp.mean(x, axis=-1, keepdims=True)
    var = jnp.mean(jnp.square(x - mean), axis=-1, keepdims=True)
    return (x - mean) * jax.lax.rsqrt(var + LN_EPS) * w + b


def _erf(x):
    # Abramowitz & Stegun 7.1.26, |abs err| < 1.5e-7. Built only from exp/mul/add/select
    # so it lowers on every TPU generation (no reliance on an erf primitive lowering).
    p = jnp.float32(0.3275911)
    a1 = jnp.float32(0.254829592)
    a2 = jnp.float32(-0.284496736)
    a3 = jnp.float32(1.421413741)
    a4 = jnp.float32(-1.453152027)
    a5 = jnp.float32(1.061405429)
    s = jnp.where(x >= 0, jnp.float32(1.0), jnp.float32(-1.0))
    ax = jnp.abs(x)
    t = 1.0 / (1.0 + p * ax)
    poly = ((((a5 * t + a4) * t + a3) * t + a2) * t + a1) * t
    return s * (1.0 - poly * jnp.exp(-ax * ax))


def _gelu_exact(x):
    # matches nn.GELU() default (erf-based) to ~1e-7
    return 0.5 * x * (1.0 + _erf(x * jnp.float32(1.0 / math.sqrt(2.0))))


# ----------------------------- fused transformer kernel -----------------------------
def fused_transformer_kernel(tok_ref, emb_ref, pos_ref, hmask_ref, bias_ref,
                             ln1w_ref, ln1b_ref, wqkv_ref, bqkv_ref, wo_ref, bo_ref,
                             ln2w_ref, ln2b_ref, w1_ref, b1_ref, w2_ref, b2_ref,
                             lnfw_ref, lnfb_ref, hw_ref, hb_ref,
                             out_ref):
    bf16 = jnp.bfloat16
    BS = tok_ref.shape[0]          # B * SEQ
    H = N_HEADS

    # ---- fused embedding lookup (exact one-hot matmul) + positional add ----
    tok = tok_ref[...]                                                   # (BS, 1) int32
    vocab_ids = jax.lax.broadcasted_iota(jnp.int32, (BS, VOCAB_PAD), 1)
    onehot = (tok == vocab_ids).astype(jnp.float32)                      # (BS, Vp)
    x = jnp.dot(onehot, emb_ref[...],
                preferred_element_type=jnp.float32) + pos_ref[...]       # (BS, D) f32

    hmask = hmask_ref[...]         # (H, 1, D) bf16 head-column selector (0/1)
    bias = bias_ref[...]           # (H*BS, H*BS) f32 block-diag causal additive bias

    for l in range(N_LAYERS):      # unrolled at trace time
        # ---- LN1 + single fused QKV matmul (1/sqrt(head_dim) folded into Q) ----
        a = _layernorm(x, ln1w_ref[l], ln1b_ref[l])
        qkv = jnp.dot(a.astype(bf16), wqkv_ref[l],
                      preferred_element_type=jnp.float32) + bqkv_ref[l]  # (BS, 3D) f32
        qkv_bf = qkv.astype(bf16)                                        # one cast, 75%-dense
        q = qkv_bf[:, :D_MODEL]
        k = qkv_bf[:, D_MODEL:2 * D_MODEL]
        v = qkv_bf[:, 2 * D_MODEL:]

        # ---- head-packed block-diagonal layout: rows ordered (head, batch*seq) ----
        q_bd = (jnp.broadcast_to(q[None], (H, BS, D_MODEL)) * hmask).reshape(H * BS, D_MODEL)
        k_bd = (jnp.broadcast_to(k[None], (H, BS, D_MODEL)) * hmask).reshape(H * BS, D_MODEL)
        v_bd = (jnp.broadcast_to(v[None], (H, BS, D_MODEL)) * hmask).reshape(H * BS, D_MODEL)

        # One dense (H*BS, D) x (D, H*BS) matmul for all heads/batches.
        scores = jax.lax.dot_general(q_bd, k_bd, (((1,), (1,)), ((), ())),
                                     preferred_element_type=jnp.float32)  # (128, 128) f32
        # Cross-head / cross-batch / non-causal entries -> -1e30; every row keeps its own
        # diagonal, so the softmax denominator is never zero.
        scores = scores + bias
        # Max-subtraction dropped: scale folded into Q, layer-normed inputs keep scores far
        # from exp overflow; masked entries exp() to exactly 0. Re-enable for large weights.
        p = jnp.exp(scores)
        p = p * pl.reciprocal(jnp.sum(p, axis=-1, keepdims=True), approx=True)

        ctx_bd = jnp.dot(p.astype(bf16), v_bd,
                         preferred_element_type=jnp.float32)              # (H*BS, D) f32
        # Head "concat": each output column is owned by exactly one head block, so summing
        # the H row-blocks reconstructs the concatenated per-head context exactly.
        ctx = ctx_bd[0:BS]
        for hh in range(1, H):
            ctx = ctx + ctx_bd[hh * BS:(hh + 1) * BS]                     # (BS, D) dense

        attn = jnp.dot(ctx.astype(bf16), wo_ref[l],
                       preferred_element_type=jnp.float32) + bo_ref[l]
        x = x + attn                                  # dropout1: identity (eval mode)

        # ---- LN2 + MLP (exact GELU) + residual ----
        m = _layernorm(x, ln2w_ref[l], ln2b_ref[l])
        h1 = jnp.dot(m.astype(bf16), w1_ref[l],
                     preferred_element_type=jnp.float32) + b1_ref[l]      # (BS, 4D)
        h1 = _gelu_exact(h1)
        x = x + jnp.dot(h1.astype(bf16), w2_ref[l],
                        preferred_element_type=jnp.float32) + b2_ref[l]   # dropout2: identity

    # ---- final LayerNorm + lane-dense output head (padded to 128, sliced outside) ----
    xn = _layernorm(x, lnfw_ref[...], lnfb_ref[...])
    out_ref[...] = jnp.dot(xn.astype(bf16), hw_ref[...],
                           preferred_element_type=jnp.float32) + hb_ref[...]


# ----------------------------- host-side weight preparation -----------------------------
def prepare_params(embedding, pos_embedding, blocks, lnf_w, lnf_b, head_w, head_b,
                   batch, seq):
    """Fuse QKV weights per layer, fold 1/sqrt(head_dim) into Q, stack per-layer weights
    with a leading N_LAYERS axis, cast matmul weights to bf16, pad embedding table and
    output head to hardware-friendly shapes, and precompute the head mask + attention bias."""
    bf = jnp.bfloat16
    inv = 1.0 / math.sqrt(HEAD_DIM)
    qkv_scale = jnp.concatenate([jnp.full((D_MODEL,), inv, jnp.float32),
                                 jnp.ones((2 * D_MODEL,), jnp.float32)])

    emb_pad = jnp.zeros((VOCAB_PAD, D_MODEL), jnp.float32).at[:VOCAB_SIZE].set(embedding)
    pos_flat = jnp.broadcast_to(pos_embedding[:, :seq, :],
                                (batch, seq, D_MODEL)).reshape(batch * seq, D_MODEL)

    # (H, 1, D) 0/1 selector of each head's columns.
    head_ids = jnp.arange(N_HEADS)[:, None, None]
    col_ids = jnp.arange(D_MODEL)[None, None, :]
    head_mask = (col_ids // HEAD_DIM == head_ids).astype(bf)

    # Block-diagonal causal additive bias over rows/cols flattened as (head, batch, seq).
    bs = batch * seq
    n = N_HEADS * bs
    idx = jnp.arange(n)
    h = idx // bs
    r = idx % bs
    b = r // seq
    s = r % seq
    allowed = ((h[:, None] == h[None, :]) & (b[:, None] == b[None, :])
               & (s[None, :] <= s[:, None]))
    attn_bias = jnp.where(allowed, 0.0, NEG_INF).astype(jnp.float32)

    keys = ('ln1w', 'ln1b', 'wqkv', 'bqkv', 'wo', 'bo', 'ln2w', 'ln2b',
            'w1', 'b1', 'w2', 'b2')
    acc = {k: [] for k in keys}
    for (l1w, l1b, qkvw, qkvb, o_w, o_b, l2w, l2b, m1w, m1b, m2w, m2b) in blocks:
        acc['ln1w'].append(l1w)
        acc['ln1b'].append(l1b)
        acc['wqkv'].append((qkvw * qkv_scale[None, :]).astype(bf))
        acc['bqkv'].append(qkvb * qkv_scale[None, :])
        acc['wo'].append(o_w.astype(bf))
        acc['bo'].append(o_b)
        acc['ln2w'].append(l2w)
        acc['ln2b'].append(l2b)
        acc['w1'].append(m1w.astype(bf))
        acc['b1'].append(m1b)
        acc['w2'].append(m2w.astype(bf))
        acc['b2'].append(m2b)

    hw_pad = jnp.zeros((D_MODEL, N_OUT_PAD), jnp.float32).at[:, :N_OUT].set(head_w).astype(bf)
    hb_pad = jnp.zeros((1, N_OUT_PAD), jnp.float32).at[:, :N_OUT].set(head_b)

    stacks = tuple(jnp.stack(acc[k]) for k in keys) + (lnf_w, lnf_b, hw_pad, hb_pad)
    return emb_pad, pos_flat, head_mask, attn_bias, stacks


# ----------------------------- forward (single fused Pallas call) -----------------------------
@jax.jit
def pixel_transformer_forward(tokens, emb_pad, pos_flat, head_mask, attn_bias, stacks):
    B, S = tokens.shape
    BS = B * S
    tok2d = tokens.reshape(BS, 1).astype(jnp.int32)
    n_inputs = 5 + len(stacks)
    out = pl.pallas_call(
        fused_transformer_kernel,
        out_shape=jax.ShapeDtypeStruct((BS, N_OUT_PAD), jnp.float32),
        # No grid: the whole model (<~200 KiB) + activations stay VMEM-resident.
        in_specs=[pl.BlockSpec(memory_space=pltpu.MemorySpace.VMEM)
                  for _ in range(n_inputs)],
        out_specs=pl.BlockSpec(memory_space=pltpu.MemorySpace.VMEM),
    )(tok2d, emb_pad, pos_flat, head_mask, attn_bias, *stacks)
    return out[:, :N_OUT].reshape(B, S, N_OUT)


# ----------------------------- parameter init (deterministic, synthetic) -----------------------------
def init_params(key):
    keys = jax.random.split(key, 4 + N_LAYERS)

    embedding = jax.random.normal(keys[0], (VOCAB_SIZE, D_MODEL), jnp.float32) * 0.02
    pos_embedding = jax.random.normal(keys[1], (1, SEQ, D_MODEL), jnp.float32) * 0.02

    blocks = []
    for l in range(N_LAYERS):
        bk = jax.random.split(keys[2 + l], 8)
        scale = 0.02
        blocks.append((
            jnp.ones((1, D_MODEL), jnp.float32),                                    # ln1 w
            jnp.zeros((1, D_MODEL), jnp.float32),                                   # ln1 b
            jax.random.normal(bk[0], (D_MODEL, 3 * D_MODEL), jnp.float32) * scale,  # qkv W
            jax.random.normal(bk[1], (1, 3 * D_MODEL), jnp.float32) * scale,        # qkv b
            jax.random.normal(bk[2], (D_MODEL, D_MODEL), jnp.float32) * scale,      # o W
            jax.random.normal(bk[3], (1, D_MODEL), jnp.float32) * scale,            # o b
            jnp.ones((1, D_MODEL), jnp.float32),                                    # ln2 w
            jnp.zeros((1, D_MODEL), jnp.float32),                                   # ln2 b
            jax.random.normal(bk[4], (D_MODEL, 4 * D_MODEL), jnp.float32) * scale,  # mlp W1
            jax.random.normal(bk[5], (1, 4 * D_MODEL), jnp.float32) * scale,        # mlp b1
            jax.random.normal(bk[6], (4 * D_MODEL, D_MODEL), jnp.float32) * scale,  # mlp W2
            jax.random.normal(bk[7], (1, D_MODEL), jnp.float32) * scale,            # mlp b2
        ))

    lnf_w = jnp.ones((1, D_MODEL), jnp.float32)
    lnf_b = jnp.zeros((1, D_MODEL), jnp.float32)
    head_w = jax.random.normal(keys[2 + N_LAYERS], (D_MODEL, N_OUT), jnp.float32) * 0.02
    head_b = jax.random.normal(keys[3 + N_LAYERS], (1, N_OUT), jnp.float32) * 0.02

    return embedding, pos_embedding, blocks, lnf_w, lnf_b, head_w, head_b


# ----------------------------- pure-JAX f32 reference (for correctness check) -----------------------------
def _ref_ln(x, w, b):
    mean = jnp.mean(x, axis=-1, keepdims=True)
    var = jnp.mean(jnp.square(x - mean), axis=-1, keepdims=True)
    return (x - mean) / jnp.sqrt(var + LN_EPS) * w + b


def reference_forward(tokens, embedding, pos_embedding, blocks, lnf_w, lnf_b, head_w, head_b):
    B, S = tokens.shape
    h = jnp.take(embedding, tokens, axis=0) + pos_embedding[:, :S, :]
    mask = jnp.tril(jnp.ones((S, S), bool))
    for (ln1w, ln1b, qkvw, qkvb, ow, ob, ln2w, ln2b, w1, b1, w2, b2) in blocks:
        a = _ref_ln(h, ln1w[0], ln1b[0])
        qkv = a @ qkvw + qkvb[0]
        q, k, v = jnp.split(qkv, 3, axis=-1)
        q = q.reshape(B, S, N_HEADS, HEAD_DIM).transpose(0, 2, 1, 3)
        k = k.reshape(B, S, N_HEADS, HEAD_DIM).transpose(0, 2, 1, 3)
        v = v.reshape(B, S, N_HEADS, HEAD_DIM).transpose(0, 2, 1, 3)
        scores = jnp.einsum('bhqd,bhkd->bhqk', q, k) / math.sqrt(HEAD_DIM)
        scores = jnp.where(mask, scores, -jnp.inf)
        p = jax.nn.softmax(scores, axis=-1)
        out = jnp.einsum('bhqk,bhkd->bhqd', p, v).transpose(0, 2, 1, 3).reshape(B, S, D_MODEL)
        h = h + (out @ ow + ob[0])
        m = _ref_ln(h, ln2w[0], ln2b[0])
        h = h + (jax.nn.gelu(m @ w1 + b1[0], approximate=False) @ w2 + b2[0])
    h = _ref_ln(h, lnf_w[0], lnf_b[0])
    return h @ head_w + head_b[0]


# ----------------------------- main -----------------------------
if __name__ == "__main__":
    key = jax.random.PRNGKey(0)
    pkey, tkey = jax.random.split(key)

    embedding, pos_embedding, blocks, lnf_w, lnf_b, head_w, head_b = init_params(pkey)
    tokens = jax.random.randint(tkey, (BATCH, SEQ), 0, VOCAB_SIZE, dtype=jnp.int32)

    emb_pad, pos_flat, head_mask, attn_bias, stacks = prepare_params(
        embedding, pos_embedding, blocks, lnf_w, lnf_b, head_w, head_b, BATCH, SEQ)

    logits = pixel_transformer_forward(tokens, emb_pad, pos_flat, head_mask, attn_bias, stacks)
    logits = jax.block_until_ready(logits)

    ref = reference_forward(tokens, embedding, pos_embedding, blocks,
                            lnf_w, lnf_b, head_w, head_b)
    assert logits.shape == (BATCH, SEQ, N_OUT)
    # Tolerance relaxed vs pure-f32: MXU matmuls take bf16 inputs (f32 accumulation),
    # softmax uses an approximate reciprocal; LayerNorm/softmax statistics stay f32.
    assert jnp.allclose(logits, ref, rtol=2e-2, atol=2e-2), "mismatch vs reference"

    print("KERNEL_OK")
</pallas_src>

<mosaic_0001>
module attributes {stable_mosaic.version = 11 : i64} {
  func.func @fused_transformer_kernel(%arg0: memref<32x1xi32, #tpu.memory_space<vmem>>, %arg1: memref<16x32xf32, #tpu.memory_space<vmem>>, %arg2: memref<32x32xf32, #tpu.memory_space<vmem>>, %arg3: memref<4x1x32xbf16, #tpu.memory_space<vmem>>, %arg4: memref<128x128xf32, #tpu.memory_space<vmem>>, %arg5: memref<2x1x32xf32, #tpu.memory_space<vmem>>, %arg6: memref<2x1x32xf32, #tpu.memory_space<vmem>>, %arg7: memref<2x32x96xbf16, #tpu.memory_space<vmem>>, %arg8: memref<2x1x96xf32, #tpu.memory_space<vmem>>, %arg9: memref<2x32x32xbf16, #tpu.memory_space<vmem>>, %arg10: memref<2x1x32xf32, #tpu.memory_space<vmem>>, %arg11: memref<2x1x32xf32, #tpu.memory_space<vmem>>, %arg12: memref<2x1x32xf32, #tpu.memory_space<vmem>>, %arg13: memref<2x32x128xbf16, #tpu.memory_space<vmem>>, %arg14: memref<2x1x128xf32, #tpu.memory_space<vmem>>, %arg15: memref<2x128x32xbf16, #tpu.memory_space<vmem>>, %arg16: memref<2x1x32xf32, #tpu.memory_space<vmem>>, %arg17: memref<1x32xf32, #tpu.memory_space<vmem>>, %arg18: memref<1x32xf32, #tpu.memory_space<vmem>>, %arg19: memref<32x128xbf16, #tpu.memory_space<vmem>>, %arg20: memref<1x128xf32, #tpu.memory_space<vmem>>, %arg21: memref<32x128xf32, #tpu.memory_space<vmem>>) attributes {dimension_semantics = [], scalar_prefetch = 0 : i64, scratch_operands = 0 : i64, tpu.core_type = #tpu.core_type<tc>} {
    %c0 = arith.constant 0 : index
    %c0_0 = arith.constant 0 : index
    %0 = vector.load %arg0[%c0, %c0_0] : memref<32x1xi32, #tpu.memory_space<vmem>>, vector<32x1xi32>
    %1 = tpu.iota {dimensions = array<i32: 1>} : vector<32x16xi32>
    %2 = vector.broadcast %0 : vector<32x1xi32> to vector<32x16xi32>
    %3 = arith.cmpi eq, %2, %1 : vector<32x16xi32>
    %4 = arith.extui %3 : vector<32x16xi1> to vector<32x16xi32>
    %5 = arith.sitofp %4 : vector<32x16xi32> to vector<32x16xf32>
    %c0_1 = arith.constant 0 : index
    %c0_2 = arith.constant 0 : index
    %6 = vector.load %arg1[%c0_1, %c0_2] : memref<16x32xf32, #tpu.memory_space<vmem>>, vector<16x32xf32>
    %cst = arith.constant dense<0.000000e+00> : vector<32x32xf32>
    %7 = tpu.matmul %5, %6, %cst {dimension_numbers = #tpu.dot_dimension_numbers<[1], [0], [0], [1], [0, 0, 1, 1], [], []>} : vector<32x16xf32>, vector<16x32xf32>, vector<32x32xf32> -> vector<32x32xf32>
    %c0_3 = arith.constant 0 : index
    %c0_4 = arith.constant 0 : index
    %8 = vector.load %arg2[%c0_3, %c0_4] : memref<32x32xf32, #tpu.memory_space<vmem>>, vector<32x32xf32>
    %9 = arith.addf %7, %8 : vector<32x32xf32>
    %c0_5 = arith.constant 0 : index
    %c0_6 = arith.constant 0 : index
    %c0_7 = arith.constant 0 : index
    %10 = vector.load %arg3[%c0_5, %c0_6, %c0_7] : memref<4x1x32xbf16, #tpu.memory_space<vmem>>, vector<4x1x32xbf16>
    %c0_8 = arith.constant 0 : index
    %c0_9 = arith.constant 0 : index
    %11 = vector.load %arg4[%c0_8, %c0_9] : memref<128x128xf32, #tpu.memory_space<vmem>>, vector<128x128xf32>
    %c0_10 = arith.constant 0 : index
    %c0_11 = arith.constant 0 : index
    %c0_12 = arith.constant 0 : index
    %12 = vector.load %arg5[%c0_10, %c0_11, %c0_12] : memref<2x1x32xf32, #tpu.memory_space<vmem>>, vector<1x1x32xf32>
    %13 = vector.shape_cast %12 : vector<1x1x32xf32> to vector<1x32xf32>
    %c0_13 = arith.constant 0 : index
    %c0_14 = arith.constant 0 : index
    %c0_15 = arith.constant 0 : index
    %14 = vector.load %arg6[%c0_13, %c0_14, %c0_15] : memref<2x1x32xf32, #tpu.memory_space<vmem>>, vector<1x1x32xf32>
    %15 = vector.shape_cast %14 : vector<1x1x32xf32> to vector<1x32xf32>
    %cst_16 = arith.constant dense<0.000000e+00> : vector<32xf32>
    %16 = vector.multi_reduction <add>, %9, %cst_16 [1] : vector<32x32xf32> to vector<32xf32>
    %17 = vector.shape_cast %16 : vector<32xf32> to vector<32x1xf32>
    %cst_17 = arith.constant 3.200000e+01 : f32
    %18 = vector.broadcast %cst_17 : f32 to vector<32x1xf32>
    %19 = arith.divf %17, %18 : vector<32x1xf32>
    %20 = vector.broadcast %19 : vector<32x1xf32> to vector<32x32xf32>
    %21 = arith.subf %9, %20 : vector<32x32xf32>
    %22 = arith.mulf %21, %21 : vector<32x32xf32>
    %cst_18 = arith.constant dense<0.000000e+00> : vector<32xf32>
    %23 = vector.multi_reduction <add>, %22, %cst_18 [1] : vector<32x32xf32> to vector<32xf32>
    %24 = vector.shape_cast %23 : vector<32xf32> to vector<32x1xf32>
    %cst_19 = arith.constant 3.200000e+01 : f32
    %25 = vector.broadcast %cst_19 : f32 to vector<32x1xf32>
    %26 = arith.divf %24, %25 : vector<32x1xf32>
    %27 = vector.broadcast %19 : vector<32x1xf32> to vector<32x32xf32>
    %28 = arith.subf %9, %27 : vector<32x32xf32>
    %cst_20 = arith.constant 9.99999974E-6 : f32
    %29 = vector.broadcast %cst_20 : f32 to vector<32x1xf32>
    %30 = arith.addf %26, %29 : vector<32x1xf32>
    %31 = math.rsqrt %30 : vector<32x1xf32>
    %32 = vector.broadcast %31 : vector<32x1xf32> to vector<32x32xf32>
    %33 = arith.mulf %28, %32 : vector<32x32xf32>
    %34 = vector.broadcast %13 : vector<1x32xf32> to vector<32x32xf32>
    %35 = arith.mulf %33, %34 : vector<32x32xf32>
    %36 = vector.broadcast %15 : vector<1x32xf32> to vector<32x32xf32>
    %37 = arith.addf %35, %36 : vector<32x32xf32>
    %38 = arith.truncf %37 : vector<32x32xf32> to vector<32x32xbf16>
    %c0_21 = arith.constant 0 : index
    %c0_22 = arith.constant 0 : index
    %c0_23 = arith.constant 0 : index
    %39 = vector.load %arg7[%c0_21, %c0_22, %c0_23] : memref<2x32x96xbf16, #tpu.memory_space<vmem>>, vector<1x32x96xbf16>
    %40 = vector.shape_cast %39 : vector<1x32x96xbf16> to vector<32x96xbf16>
    %cst_24 = arith.constant dense<0.000000e+00> : vector<32x96xf32>
    %41 = tpu.matmul %38, %40, %cst_24 {dimension_numbers = #tpu.dot_dimension_numbers<[1], [0], [0], [1], [0, 0, 1, 1], [], []>} : vector<32x32xbf16>, vector<32x96xbf16>, vector<32x96xf32> -> vector<32x96xf32>
    %c0_25 = arith.constant 0 : index
    %c0_26 = arith.constant 0 : index
    %c0_27 = arith.constant 0 : index
    %42 = vector.load %arg8[%c0_25, %c0_26, %c0_27] : memref<2x1x96xf32, #tpu.memory_space<vmem>>, vector<1x1x96xf32>
    %43 = vector.shape_cast %42 : vector<1x1x96xf32> to vector<1x96xf32>
    %44 = vector.broadcast %43 : vector<1x96xf32> to vector<32x96xf32>
    %45 = arith.addf %41, %44 : vector<32x96xf32>
    %46 = arith.truncf %45 : vector<32x96xf32> to vector<32x96xbf16>
    %47 = vector.extract_strided_slice %46 {offsets = [0, 0], sizes = [32, 32], strides = [1, 1]} : vector<32x96xbf16> to vector<32x32xbf16>
    %48 = vector.extract_strided_slice %46 {offsets = [0, 32], sizes = [32, 32], strides = [1, 1]} : vector<32x96xbf16> to vector<32x32xbf16>
    %49 = vector.extract_strided_slice %46 {offsets = [0, 64], sizes = [32, 32], strides = [1, 1]} : vector<32x96xbf16> to vector<32x32xbf16>
    %50 = vector.shape_cast %47 : vector<32x32xbf16> to vector<1x32x32xbf16>
    %51 = vector.shape_cast %50 : vector<1x32x32xbf16> to vector<1x32x32xbf16>
    %52 = vector.broadcast %51 : vector<1x32x32xbf16> to vector<4x32x32xbf16>
    %53 = vector.broadcast %10 : vector<4x1x32xbf16> to vector<4x32x32xbf16>
    %54 = arith.mulf %52, %53 : vector<4x32x32xbf16>
    %55 = vector.shape_cast %54 : vector<4x32x32xbf16> to vector<128x32xbf16>
    %56 = vector.shape_cast %48 : vector<32x32xbf16> to vector<1x32x32xbf16>
    %57 = vector.shape_cast %56 : vector<1x32x32xbf16> to vector<1x32x32xbf16>
    %58 = vector.broadcast %57 : vector<1x32x32xbf16> to vector<4x32x32xbf16>
    %59 = vector.broadcast %10 : vector<4x1x32xbf16> to vector<4x32x32xbf16>
    %60 = arith.mulf %58, %59 : vector<4x32x32xbf16>
    %61 = vector.shape_cast %60 : vector<4x32x32xbf16> to vector<128x32xbf16>
    %62 = vector.shape_cast %49 : vector<32x32xbf16> to vector<1x32x32xbf16>
    %63 = vector.shape_cast %62 : vector<1x32x32xbf16> to vector<1x32x32xbf16>
    %64 = vector.broadcast %63 : vector<1x32x32xbf16> to vector<4x32x32xbf16>
    %65 = vector.broadcast %10 : vector<4x1x32xbf16> to vector<4x32x32xbf16>
    %66 = arith.mulf %64, %65 : vector<4x32x32xbf16>
    %67 = vector.shape_cast %66 : vector<4x32x32xbf16> to vector<128x32xbf16>
    %cst_28 = arith.constant dense<0.000000e+00> : vector<128x128xf32>
    %68 = tpu.matmul %55, %61, %cst_28 {dimension_numbers = #tpu.dot_dimension_numbers<[1], [1], [0], [0], [0, 0, 1, 0], [], []>} : vector<128x32xbf16>, vector<128x32xbf16>, vector<128x128xf32> -> vector<128x128xf32>
    %69 = arith.addf %68, %11 : vector<128x128xf32>
    %70 = math.exp %69 : vector<128x128xf32>
    %cst_29 = arith.constant dense<0.000000e+00> : vector<128xf32>
    %71 = vector.multi_reduction <add>, %70, %cst_29 [1] : vector<128x128xf32> to vector<128xf32>
    %72 = vector.shape_cast %71 : vector<128xf32> to vector<128x1xf32>
    %73 = tpu.reciprocal %72 {approx = true} : vector<128x1xf32> -> vector<128x1xf32>
    %74 = vector.broadcast %73 : vector<128x1xf32> to vector<128x128xf32>
    %75 = arith.mulf %70, %74 : vector<128x128xf32>
    %76 = arith.truncf %75 : vector<128x128xf32> to vector<128x128xbf16>
    %cst_30 = arith.constant dense<0.000000e+00> : vector<128x32xf32>
    %77 = tpu.matmul %76, %67, %cst_30 {dimension_numbers = #tpu.dot_dimension_numbers<[1], [0], [0], [1], [0, 0, 1, 1], [], []>} : vector<128x128xbf16>, vector<128x32xbf16>, vector<128x32xf32> -> vector<128x32xf32>
    %78 = vector.extract_strided_slice %77 {offsets = [0, 0], sizes = [32, 32], strides = [1, 1]} : vector<128x32xf32> to vector<32x32xf32>
    %79 = vector.extract_strided_slice %77 {offsets = [32, 0], sizes = [32, 32], strides = [1, 1]} : vector<128x32xf32> to vector<32x32xf32>
    %80 = arith.addf %78, %79 : vector<32x32xf32>
    %81 = vector.extract_strided_slice %77 {offsets = [64, 0], sizes = [32, 32], strides = [1, 1]} : vector<128x32xf32> to vector<32x32xf32>
    %82 = arith.addf %80, %81 : vector<32x32xf32>
    %83 = vector.extract_strided_slice %77 {offsets = [96, 0], sizes = [32, 32], strides = [1, 1]} : vector<128x32xf32> to vector<32x32xf32>
    %84 = arith.addf %82, %83 : vector<32x32xf32>
    %85 = arith.truncf %84 : vector<32x32xf32> to vector<32x32xbf16>
    %c0_31 = arith.constant 0 : index
    %c0_32 = arith.constant 0 : index
    %c0_33 = arith.constant 0 : index
    %86 = vector.load %arg9[%c0_31, %c0_32, %c0_33] : memref<2x32x32xbf16, #tpu.memory_space<vmem>>, vector<1x32x32xbf16>
    %87 = vector.shape_cast %86 : vector<1x32x32xbf16> to vector<32x32xbf16>
    %cst_34 = arith.constant dense<0.000000e+00> : vector<32x32xf32>
    %88 = tpu.matmul %85, %87, %cst_34 {dimension_numbers = #tpu.dot_dimension_numbers<[1], [0], [0], [1], [0, 0, 1, 1], [], []>} : vector<32x32xbf16>, vector<32x32xbf16>, vector<32x32xf32> -> vector<32x32xf32>
    %c0_35 = arith.constant 0 : index
    %c0_36 = arith.constant 0 : index
    %c0_37 = arith.constant 0 : index
    %89 = vector.load %arg10[%c0_35, %c0_36, %c0_37] : memref<2x1x32xf32, #tpu.memory_space<vmem>>, vector<1x1x32xf32>
    %90 = vector.shape_cast %89 : vector<1x1x32xf32> to vector<1x32xf32>
    %91 = vector.broadcast %90 : vector<1x32xf32> to vector<32x32xf32>
    %92 = arith.addf %88, %91 : vector<32x32xf32>
    %93 = arith.addf %9, %92 : vector<32x32xf32>
    %c0_38 = arith.constant 0 : index
    %c0_39 = arith.constant 0 : index
    %c0_40 = arith.constant 0 : index
    %94 = vector.load %arg11[%c0_38, %c0_39, %c0_40] : memref<2x1x32xf32, #tpu.memory_space<vmem>>, vector<1x1x32xf32>
    %95 = vector.shape_cast %94 : vector<1x1x32xf32> to vector<1x32xf32>
    %c0_41 = arith.constant 0 : index
    %c0_42 = arith.constant 0 : index
    %c0_43 = arith.constant 0 : index
    %96 = vector.load %arg12[%c0_41, %c0_42, %c0_43] : memref<2x1x32xf32, #tpu.memory_space<vmem>>, vector<1x1x32xf32>
    %97 = vector.shape_cast %96 : vector<1x1x32xf32> to vector<1x32xf32>
    %cst_44 = arith.constant dense<0.000000e+00> : vector<32xf32>
    %98 = vector.multi_reduction <add>, %93, %cst_44 [1] : vector<32x32xf32> to vector<32xf32>
    %99 = vector.shape_cast %98 : vector<32xf32> to vector<32x1xf32>
    %cst_45 = arith.constant 3.200000e+01 : f32
    %100 = vector.broadcast %cst_45 : f32 to vector<32x1xf32>
    %101 = arith.divf %99, %100 : vector<32x1xf32>
    %102 = vector.broadcast %101 : vector<32x1xf32> to vector<32x32xf32>
    %103 = arith.subf %93, %102 : vector<32x32xf32>
    %104 = arith.mulf %103, %103 : vector<32x32xf32>
    %cst_46 = arith.constant dense<0.000000e+00> : vector<32xf32>
    %105 = vector.multi_reduction <add>, %104, %cst_46 [1] : vector<32x32xf32> to vector<32xf32>
    %106 = vector.shape_cast %105 : vector<32xf32> to vector<32x1xf32>
    %cst_47 = arith.constant 3.200000e+01 : f32
    %107 = vector.broadcast %cst_47 : f32 to vector<32x1xf32>
    %108 = arith.divf %106, %107 : vector<32x1xf32>
    %109 = vector.broadcast %101 : vector<32x1xf32> to vector<32x32xf32>
    %110 = arith.subf %93, %109 : vector<32x32xf32>
    %cst_48 = arith.constant 9.99999974E-6 : f32
    %111 = vector.broadcast %cst_48 : f32 to vector<32x1xf32>
    %112 = arith.addf %108, %111 : vector<32x1xf32>
    %113 = math.rsqrt %112 : vector<32x1xf32>
    %114 = vector.broadcast %113 : vector<32x1xf32> to vector<32x32xf32>
    %115 = arith.mulf %110, %114 : vector<32x32xf32>
    %116 = vector.broadcast %95 : vector<1x32xf32> to vector<32x32xf32>
    %117 = arith.mulf %115, %116 : vector<32x32xf32>
    %118 = vector.broadcast %97 : vector<1x32xf32> to vector<32x32xf32>
    %119 = arith.addf %117, %118 : vector<32x32xf32>
    %120 = arith.truncf %119 : vector<32x32xf32> to vector<32x32xbf16>
    %c0_49 = arith.constant 0 : index
    %c0_50 = arith.constant 0 : index
    %c0_51 = arith.constant 0 : index
    %121 = vector.load %arg13[%c0_49, %c0_50, %c0_51] : memref<2x32x128xbf16, #tpu.memory_space<vmem>>, vector<1x32x128xbf16>
    %122 = vector.shape_cast %121 : vector<1x32x128xbf16> to vector<32x128xbf16>
    %cst_52 = arith.constant dense<0.000000e+00> : vector<32x128xf32>
    %123 = tpu.matmul %120, %122, %cst_52 {dimension_numbers = #tpu.dot_dimension_numbers<[1], [0], [0], [1], [0, 0, 1, 1], [], []>} : vector<32x32xbf16>, vector<32x128xbf16>, vector<32x128xf32> -> vector<32x128xf32>
    %c0_53 = arith.constant 0 : index
    %c0_54 = arith.constant 0 : index
    %c0_55 = arith.constant 0 : index
    %124 = vector.load %arg14[%c0_53, %c0_54, %c0_55] : memref<2x1x128xf32, #tpu.memory_space<vmem>>, vector<1x1x128xf32>
    %125 = vector.shape_cast %124 : vector<1x1x128xf32> to vector<1x128xf32>
    %126 = vector.broadcast %125 : vector<1x128xf32> to vector<32x128xf32>
    %127 = arith.addf %123, %126 : vector<32x128xf32>
    %cst_56 = arith.constant 5.000000e-01 : f32
    %128 = vector.broadcast %cst_56 : f32 to vector<32x128xf32>
    %129 = arith.mulf %128, %127 : vector<32x128xf32>
    %cst_57 = arith.constant 0.707106769 : f32
    %130 = vector.broadcast %cst_57 : f32 to vector<32x128xf32>
    %131 = arith.mulf %127, %130 : vector<32x128xf32>
    %cst_58 = arith.constant 0.000000e+00 : f32
    %132 = vector.broadcast %cst_58 : f32 to vector<32x128xf32>
    %133 = arith.cmpf oge, %131, %132 : vector<32x128xf32>
    %cst_59 = arith.constant 1.000000e+00 : f32
    %cst_60 = arith.constant -1.000000e+00 : f32
    %134 = vector.broadcast %cst_59 : f32 to vector<32x128xf32>
    %135 = vector.broadcast %cst_60 : f32 to vector<32x128xf32>
    %136 = arith.select %133, %134, %135 : vector<32x128xi1>, vector<32x128xf32>
    %137 = math.absf %131 : vector<32x128xf32>
    %cst_61 = arith.constant 0.327591091 : f32
    %138 = vector.broadcast %cst_61 : f32 to vector<32x128xf32>
    %139 = arith.mulf %138, %137 : vector<32x128xf32>
    %cst_62 = arith.constant 1.000000e+00 : f32
    %140 = vector.broadcast %cst_62 : f32 to vector<32x128xf32>
    %141 = arith.addf %140, %139 : vector<32x128xf32>
    %cst_63 = arith.constant 1.000000e+00 : f32
    %142 = vector.broadcast %cst_63 : f32 to vector<32x128xf32>
    %143 = arith.divf %142, %141 : vector<32x128xf32>
    %cst_64 = arith.constant 1.06140542 : f32
    %144 = vector.broadcast %cst_64 : f32 to vector<32x128xf32>
    %145 = arith.mulf %144, %143 : vector<32x128xf32>
    %cst_65 = arith.constant -1.45315206 : f32
    %146 = vector.broadcast %cst_65 : f32 to vector<32x128xf32>
    %147 = arith.addf %145, %146 : vector<32x128xf32>
    %148 = arith.mulf %147, %143 : vector<32x128xf32>
    %cst_66 = arith.constant 1.42141378 : f32
    %149 = vector.broadcast %cst_66 : f32 to vector<32x128xf32>
    %150 = arith.addf %148, %149 : vector<32x128xf32>
    %151 = arith.mulf %150, %143 : vector<32x128xf32>
    %cst_67 = arith.constant -0.284496725 : f32
    %152 = vector.broadcast %cst_67 : f32 to vector<32x128xf32>
    %153 = arith.addf %151, %152 : vector<32x128xf32>
    %154 = arith.mulf %153, %143 : vector<32x128xf32>
    %cst_68 = arith.constant 0.254829586 : f32
    %155 = vector.broadcast %cst_68 : f32 to vector<32x128xf32>
    %156 = arith.addf %154, %155 : vector<32x128xf32>
    %157 = arith.mulf %156, %143 : vector<32x128xf32>
    %cst_69 = arith.constant 0.000000e+00 : f32
    %158 = vector.broadcast %cst_69 : f32 to vector<32x128xf32>
    %159 = arith.subf %158, %137 : vector<32x128xf32>
    %160 = arith.mulf %159, %137 : vector<32x128xf32>
    %161 = math.exp %160 : vector<32x128xf32>
    %162 = arith.mulf %157, %161 : vector<32x128xf32>
    %cst_70 = arith.constant 1.000000e+00 : f32
    %163 = vector.broadcast %cst_70 : f32 to vector<32x128xf32>
    %164 = arith.subf %163, %162 : vector<32x128xf32>
    %165 = arith.mulf %136, %164 : vector<32x128xf32>
    %cst_71 = arith.constant 1.000000e+00 : f32
    %166 = vector.broadcast %cst_71 : f32 to vector<32x128xf32>
    %167 = arith.addf %166, %165 : vector<32x128xf32>
    %168 = arith.mulf %129, %167 : vector<32x128xf32>
    %169 = arith.truncf %168 : vector<32x128xf32> to vector<32x128xbf16>
    %c0_72 = arith.constant 0 : index
    %c0_73 = arith.constant 0 : index
    %c0_74 = arith.constant 0 : index
    %170 = vector.load %arg15[%c0_72, %c0_73, %c0_74] : memref<2x128x32xbf16, #tpu.memory_space<vmem>>, vector<1x128x32xbf16>
    %171 = vector.shape_cast %170 : vector<1x128x32xbf16> to vector<128x32xbf16>
    %cst_75 = arith.constant dense<0.000000e+00> : vector<32x32xf32>
    %172 = tpu.matmul %169, %171, %cst_75 {dimension_numbers = #tpu.dot_dimension_numbers<[1], [0], [0], [1], [0, 0, 1, 1], [], []>} : vector<32x128xbf16>, vector<128x32xbf16>, vector<32x32xf32> -> vector<32x32xf32>
    %173 = arith.addf %93, %172 : vector<32x32xf32>
    %c0_76 = arith.constant 0 : index
    %c0_77 = arith.constant 0 : index
    %c0_78 = arith.constant 0 : index
    %174 = vector.load %arg16[%c0_76, %c0_77, %c0_78] : memref<2x1x32xf32, #tpu.memory_space<vmem>>, vector<1x1x32xf32>
    %175 = vector.shape_cast %174 : vector<1x1x32xf32> to vector<1x32xf32>
    %176 = vector.broadcast %175 : vector<1x32xf32> to vector<32x32xf32>
    %177 = arith.addf %173, %176 : vector<32x32xf32>
    %c1 = arith.constant 1 : index
    %c0_79 = arith.constant 0 : index
    %c0_80 = arith.constant 0 : index
    %178 = vector.load %arg5[%c1, %c0_79, %c0_80] : memref<2x1x32xf32, #tpu.memory_space<vmem>>, vector<1x1x32xf32>
    %179 = vector.shape_cast %178 : vector<1x1x32xf32> to vector<1x32xf32>
    %c1_81 = arith.constant 1 : index
    %c0_82 = arith.constant 0 : index
    %c0_83 = arith.constant 0 : index
    %180 = vector.load %arg6[%c1_81, %c0_82, %c0_83] : memref<2x1x32xf32, #tpu.memory_space<vmem>>, vector<1x1x32xf32>
    %181 = vector.shape_cast %180 : vector<1x1x32xf32> to vector<1x32xf32>
    %cst_84 = arith.constant dense<0.000000e+00> : vector<32xf32>
    %182 = vector.multi_reduction <add>, %177, %cst_84 [1] : vector<32x32xf32> to vector<32xf32>
    %183 = vector.shape_cast %182 : vector<32xf32> to vector<32x1xf32>
    %cst_85 = arith.constant 3.200000e+01 : f32
    %184 = vector.broadcast %cst_85 : f32 to vector<32x1xf32>
    %185 = arith.divf %183, %184 : vector<32x1xf32>
    %186 = vector.broadcast %185 : vector<32x1xf32> to vector<32x32xf32>
    %187 = arith.subf %177, %186 : vector<32x32xf32>
    %188 = arith.mulf %187, %187 : vector<32x32xf32>
    %cst_86 = arith.constant dense<0.000000e+00> : vector<32xf32>
    %189 = vector.multi_reduction <add>, %188, %cst_86 [1] : vector<32x32xf32> to vector<32xf32>
    %190 = vector.shape_cast %189 : vector<32xf32> to vector<32x1xf32>
    %cst_87 = arith.constant 3.200000e+01 : f32
    %191 = vector.broadcast %cst_87 : f32 to vector<32x1xf32>
    %192 = arith.divf %190, %191 : vector<32x1xf32>
    %193 = vector.broadcast %185 : vector<32x1xf32> to vector<32x32xf32>
    %194 = arith.subf %177, %193 : vector<32x32xf32>
    %cst_88 = arith.constant 9.99999974E-6 : f32
    %195 = vector.broadcast %cst_88 : f32 to vector<32x1xf32>
    %196 = arith.addf %192, %195 : vector<32x1xf32>
    %197 = math.rsqrt %196 : vector<32x1xf32>
    %198 = vector.broadcast %197 : vector<32x1xf32> to vector<32x32xf32>
    %199 = arith.mulf %194, %198 : vector<32x32xf32>
    %200 = vector.broadcast %179 : vector<1x32xf32> to vector<32x32xf32>
    %201 = arith.mulf %199, %200 : vector<32x32xf32>
    %202 = vector.broadcast %181 : vector<1x32xf32> to vector<32x32xf32>
    %203 = arith.addf %201, %202 : vector<32x32xf32>
    %204 = arith.truncf %203 : vector<32x32xf32> to vector<32x32xbf16>
    %c1_89 = arith.constant 1 : index
    %c0_90 = arith.constant 0 : index
    %c0_91 = arith.constant 0 : index
    %205 = vector.load %arg7[%c1_89, %c0_90, %c0_91] : memref<2x32x96xbf16, #tpu.memory_space<vmem>>, vector<1x32x96xbf16>
    %206 = vector.shape_cast %205 : vector<1x32x96xbf16> to vector<32x96xbf16>
    %cst_92 = arith.constant dense<0.000000e+00> : vector<32x96xf32>
    %207 = tpu.matmul %204, %206, %cst_92 {dimension_numbers = #tpu.dot_dimension_numbers<[1], [0], [0], [1], [0, 0, 1, 1], [], []>} : vector<32x32xbf16>, vector<32x96xbf16>, vector<32x96xf32> -> vector<32x96xf32>
    %c1_93 = arith.constant 1 : index
    %c0_94 = arith.constant 0 : index
    %c0_95 = arith.constant 0 : index
    %208 = vector.load %arg8[%c1_93, %c0_94, %c0_95] : memref<2x1x96xf32, #tpu.memory_space<vmem>>, vector<1x1x96xf32>
    %209 = vector.shape_cast %208 : vector<1x1x96xf32> to vector<1x96xf32>
    %210 = vector.broadcast %209 : vector<1x96xf32> to vector<32x96xf32>
    %211 = arith.addf %207, %210 : vector<32x96xf32>
    %212 = arith.truncf %211 : vector<32x96xf32> to vector<32x96xbf16>
    %213 = vector.extract_strided_slice %212 {offsets = [0, 0], sizes = [32, 32], strides = [1, 1]} : vector<32x96xbf16> to vector<32x32xbf16>
    %214 = vector.extract_strided_slice %212 {offsets = [0, 32], sizes = [32, 32], strides = [1, 1]} : vector<32x96xbf16> to vector<32x32xbf16>
    %215 = vector.extract_strided_slice %212 {offsets = [0, 64], sizes = [32, 32], strides = [1, 1]} : vector<32x96xbf16> to vector<32x32xbf16>
    %216 = vector.shape_cast %213 : vector<32x32xbf16> to vector<1x32x32xbf16>
    %217 = vector.shape_cast %216 : vector<1x32x32xbf16> to vector<1x32x32xbf16>
    %218 = vector.broadcast %217 : vector<1x32x32xbf16> to vector<4x32x32xbf16>
    %219 = vector.broadcast %10 : vector<4x1x32xbf16> to vector<4x32x32xbf16>
    %220 = arith.mulf %218, %219 : vector<4x32x32xbf16>
    %221 = vector.shape_cast %220 : vector<4x32x32xbf16> to vector<128x32xbf16>
    %222 = vector.shape_cast %214 : vector<32x32xbf16> to vector<1x32x32xbf16>
    %223 = vector.shape_cast %222 : vector<1x32x32xbf16> to vector<1x32x32xbf16>
    %224 = vector.broadcast %223 : vector<1x32x32xbf16> to vector<4x32x32xbf16>
    %225 = vector.broadcast %10 : vector<4x1x32xbf16> to vector<4x32x32xbf16>
    %226 = arith.mulf %224, %225 : vector<4x32x32xbf16>
    %227 = vector.shape_cast %226 : vector<4x32x32xbf16> to vector<128x32xbf16>
    %228 = vector.shape_cast %215 : vector<32x32xbf16> to vector<1x32x32xbf16>
    %229 = vector.shape_cast %228 : vector<1x32x32xbf16> to vector<1x32x32xbf16>
    %230 = vector.broadcast %229 : vector<1x32x32xbf16> to vector<4x32x32xbf16>
    %231 = vector.broadcast %10 : vector<4x1x32xbf16> to vector<4x32x32xbf16>
    %232 = arith.mulf %230, %231 : vector<4x32x32xbf16>
    %233 = vector.shape_cast %232 : vector<4x32x32xbf16> to vector<128x32xbf16>
    %cst_96 = arith.constant dense<0.000000e+00> : vector<128x128xf32>
    %234 = tpu.matmul %221, %227, %cst_96 {dimension_numbers = #tpu.dot_dimension_numbers<[1], [1], [0], [0], [0, 0, 1, 0], [], []>} : vector<128x32xbf16>, vector<128x32xbf16>, vector<128x128xf32> -> vector<128x128xf32>
    %235 = arith.addf %234, %11 : vector<128x128xf32>
    %236 = math.exp %235 : vector<128x128xf32>
    %cst_97 = arith.constant dense<0.000000e+00> : vector<128xf32>
    %237 = vector.multi_reduction <add>, %236, %cst_97 [1] : vector<128x128xf32> to vector<128xf32>
    %238 = vector.shape_cast %237 : vector<128xf32> to vector<128x1xf32>
    %239 = tpu.reciprocal %238 {approx = true} : vector<128x1xf32> -> vector<128x1xf32>
    %240 = vector.broadcast %239 : vector<128x1xf32> to vector<128x128xf32>
    %241 = arith.mulf %236, %240 : vector<128x128xf32>
    %242 = arith.truncf %241 : vector<128x128xf32> to vector<128x128xbf16>
    %cst_98 = arith.constant dense<0.000000e+00> : vector<128x32xf32>
    %243 = tpu.matmul %242, %233, %cst_98 {dimension_numbers = #tpu.dot_dimension_numbers<[1], [0], [0], [1], [0, 0, 1, 1], [], []>} : vector<128x128xbf16>, vector<128x32xbf16>, vector<128x32xf32> -> vector<128x32xf32>
    %244 = vector.extract_strided_slice %243 {offsets = [0, 0], sizes = [32, 32], strides = [1, 1]} : vector<128x32xf32> to vector<32x32xf32>
    %245 = vector.extract_strided_slice %243 {offsets = [32, 0], sizes = [32, 32], strides = [1, 1]} : vector<128x32xf32> to vector<32x32xf32>
    %246 = arith.addf %244, %245 : vector<32x32xf32>
    %247 = vector.extract_strided_slice %243 {offsets = [64, 0], sizes = [32, 32], strides = [1, 1]} : vector<128x32xf32> to vector<32x32xf32>
    %248 = arith.addf %246, %247 : vector<32x32xf32>
    %249 = vector.extract_strided_slice %243 {offsets = [96, 0], sizes = [32, 32], strides = [1, 1]} : vector<128x32xf32> to vector<32x32xf32>
    %250 = arith.addf %248, %249 : vector<32x32xf32>
    %251 = arith.truncf %250 : vector<32x32xf32> to vector<32x32xbf16>
    %c1_99 = arith.constant 1 : index
    %c0_100 = arith.constant 0 : index
    %c0_101 = arith.constant 0 : index
    %252 = vector.load %arg9[%c1_99, %c0_100, %c0_101] : memref<2x32x32xbf16, #tpu.memory_space<vmem>>, vector<1x32x32xbf16>
    %253 = vector.shape_cast %252 : vector<1x32x32xbf16> to vector<32x32xbf16>
    %cst_102 = arith.constant dense<0.000000e+00> : vector<32x32xf32>
    %254 = tpu.matmul %251, %253, %cst_102 {dimension_numbers = #tpu.dot_dimension_numbers<[1], [0], [0], [1], [0, 0, 1, 1], [], []>} : vector<32x32xbf16>, vector<32x32xbf16>, vector<32x32xf32> -> vector<32x32xf32>
    %c1_103 = arith.constant 1 : index
    %c0_104 = arith.constant 0 : index
    %c0_105 = arith.constant 0 : index
    %255 = vector.load %arg10[%c1_103, %c0_104, %c0_105] : memref<2x1x32xf32, #tpu.memory_space<vmem>>, vector<1x1x32xf32>
    %256 = vector.shape_cast %255 : vector<1x1x32xf32> to vector<1x32xf32>
    %257 = vector.broadcast %256 : vector<1x32xf32> to vector<32x32xf32>
    %258 = arith.addf %254, %257 : vector<32x32xf32>
    %259 = arith.addf %177, %258 : vector<32x32xf32>
    %c1_106 = arith.constant 1 : index
    %c0_107 = arith.constant 0 : index
    %c0_108 = arith.constant 0 : index
    %260 = vector.load %arg11[%c1_106, %c0_107, %c0_108] : memref<2x1x32xf32, #tpu.memory_space<vmem>>, vector<1x1x32xf32>
    %261 = vector.shape_cast %260 : vector<1x1x32xf32> to vector<1x32xf32>
    %c1_109 = arith.constant 1 : index
    %c0_110 = arith.constant 0 : index
    %c0_111 = arith.constant 0 : index
    %262 = vector.load %arg12[%c1_109, %c0_110, %c0_111] : memref<2x1x32xf32, #tpu.memory_space<vmem>>, vector<1x1x32xf32>
    %263 = vector.shape_cast %262 : vector<1x1x32xf32> to vector<1x32xf32>
    %cst_112 = arith.constant dense<0.000000e+00> : vector<32xf32>
    %264 = vector.multi_reduction <add>, %259, %cst_112 [1] : vector<32x32xf32> to vector<32xf32>
    %265 = vector.shape_cast %264 : vector<32xf32> to vector<32x1xf32>
    %cst_113 = arith.constant 3.200000e+01 : f32
    %266 = vector.broadcast %cst_113 : f32 to vector<32x1xf32>
    %267 = arith.divf %265, %266 : vector<32x1xf32>
    %268 = vector.broadcast %267 : vector<32x1xf32> to vector<32x32xf32>
    %269 = arith.subf %259, %268 : vector<32x32xf32>
    %270 = arith.mulf %269, %269 : vector<32x32xf32>
    %cst_114 = arith.constant dense<0.000000e+00> : vector<32xf32>
    %271 = vector.multi_reduction <add>, %270, %cst_114 [1] : vector<32x32xf32> to vector<32xf32>
    %272 = vector.shape_cast %271 : vector<32xf32> to vector<32x1xf32>
    %cst_115 = arith.constant 3.200000e+01 : f32
    %273 = vector.broadcast %cst_115 : f32 to vector<32x1xf32>
    %274 = arith.divf %272, %273 : vector<32x1xf32>
    %275 = vector.broadcast %267 : vector<32x1xf32> to vector<32x32xf32>
    %276 = arith.subf %259, %275 : vector<32x32xf32>
    %cst_116 = arith.constant 9.99999974E-6 : f32
    %277 = vector.broadcast %cst_116 : f32 to vector<32x1xf32>
    %278 = arith.addf %274, %277 : vector<32x1xf32>
    %279 = math.rsqrt %278 : vector<32x1xf32>
    %280 = vector.broadcast %279 : vector<32x1xf32> to vector<32x32xf32>
    %281 = arith.mulf %276, %280 : vector<32x32xf32>
    %282 = vector.broadcast %261 : vector<1x32xf32> to vector<32x32xf32>
    %283 = arith.mulf %281, %282 : vector<32x32xf32>
    %284 = vector.broadcast %263 : vector<1x32xf32> to vector<32x32xf32>
    %285 = arith.addf %283, %284 : vector<32x32xf32>
    %286 = arith.truncf %285 : vector<32x32xf32> to vector<32x32xbf16>
    %c1_117 = arith.constant 1 : index
    %c0_118 = arith.constant 0 : index
    %c0_119 = arith.constant 0 : index
    %287 = vector.load %arg13[%c1_117, %c0_118, %c0_119] : memref<2x32x128xbf16, #tpu.memory_space<vmem>>, vector<1x32x128xbf16>
    %288 = vector.shape_cast %287 : vector<1x32x128xbf16> to vector<32x128xbf16>
    %cst_120 = arith.constant dense<0.000000e+00> : vector<32x128xf32>
    %289 = tpu.matmul %286, %288, %cst_120 {dimension_numbers = #tpu.dot_dimension_numbers<[1], [0], [0], [1], [0, 0, 1, 1], [], []>} : vector<32x32xbf16>, vector<32x128xbf16>, vector<32x128xf32> -> vector<32x128xf32>
    %c1_121 = arith.constant 1 : index
    %c0_122 = arith.constant 0 : index
    %c0_123 = arith.constant 0 : index
    %290 = vector.load %arg14[%c1_121, %c0_122, %c0_123] : memref<2x1x128xf32, #tpu.memory_space<vmem>>, vector<1x1x128xf32>
    %291 = vector.shape_cast %290 : vector<1x1x128xf32> to vector<1x128xf32>
    %292 = vector.broadcast %291 : vector<1x128xf32> to vector<32x128xf32>
    %293 = arith.addf %289, %292 : vector<32x128xf32>
    %cst_124 = arith.constant 5.000000e-01 : f32
    %294 = vector.broadcast %cst_124 : f32 to vector<32x128xf32>
    %295 = arith.mulf %294, %293 : vector<32x128xf32>
    %cst_125 = arith.constant 0.707106769 : f32
    %296 = vector.broadcast %cst_125 : f32 to vector<32x128xf32>
    %297 = arith.mulf %293, %296 : vector<32x128xf32>
    %cst_126 = arith.constant 0.000000e+00 : f32
    %298 = vector.broadcast %cst_126 : f32 to vector<32x128xf32>
    %299 = arith.cmpf oge, %297, %298 : vector<32x128xf32>
    %cst_127 = arith.constant 1.000000e+00 : f32
    %cst_128 = arith.constant -1.000000e+00 : f32
    %300 = vector.broadcast %cst_127 : f32 to vector<32x128xf32>
    %301 = vector.broadcast %cst_128 : f32 to vector<32x128xf32>
    %302 = arith.select %299, %300, %301 : vector<32x128xi1>, vector<32x128xf32>
    %303 = math.absf %297 : vector<32x128xf32>
    %cst_129 = arith.constant 0.327591091 : f32
    %304 = vector.broadcast %cst_129 : f32 to vector<32x128xf32>
    %305 = arith.mulf %304, %303 : vector<32x128xf32>
    %cst_130 = arith.constant 1.000000e+00 : f32
    %306 = vector.broadcast %cst_130 : f32 to vector<32x128xf32>
    %307 = arith.addf %306, %305 : vector<32x128xf32>
    %cst_131 = arith.constant 1.000000e+00 : f32
    %308 = vector.broadcast %cst_131 : f32 to vector<32x128xf32>
    %309 = arith.divf %308, %307 : vector<32x128xf32>
    %cst_132 = arith.constant 1.06140542 : f32
    %310 = vector.broadcast %cst_132 : f32 to vector<32x128xf32>
    %311 = arith.mulf %310, %309 : vector<32x128xf32>
    %cst_133 = arith.constant -1.45315206 : f32
    %312 = vector.broadcast %cst_133 : f32 to vector<32x128xf32>
    %313 = arith.addf %311, %312 : vector<32x128xf32>
    %314 = arith.mulf %313, %309 : vector<32x128xf32>
    %cst_134 = arith.constant 1.42141378 : f32
    %315 = vector.broadcast %cst_134 : f32 to vector<32x128xf32>
    %316 = arith.addf %314, %315 : vector<32x128xf32>
    %317 = arith.mulf %316, %309 : vector<32x128xf32>
    %cst_135 = arith.constant -0.284496725 : f32
    %318 = vector.broadcast %cst_135 : f32 to vector<32x128xf32>
    %319 = arith.addf %317, %318 : vector<32x128xf32>
    %320 = arith.mulf %319, %309 : vector<32x128xf32>
    %cst_136 = arith.constant 0.254829586 : f32
    %321 = vector.broadcast %cst_136 : f32 to vector<32x128xf32>
    %322 = arith.addf %320, %321 : vector<32x128xf32>
    %323 = arith.mulf %322, %309 : vector<32x128xf32>
    %cst_137 = arith.constant 0.000000e+00 : f32
    %324 = vector.broadcast %cst_137 : f32 to vector<32x128xf32>
    %325 = arith.subf %324, %303 : vector<32x128xf32>
    %326 = arith.mulf %325, %303 : vector<32x128xf32>
    %327 = math.exp %326 : vector<32x128xf32>
    %328 = arith.mulf %323, %327 : vector<32x128xf32>
    %cst_138 = arith.constant 1.000000e+00 : f32
    %329 = vector.broadcast %cst_138 : f32 to vector<32x128xf32>
    %330 = arith.subf %329, %328 : vector<32x128xf32>
    %331 = arith.mulf %302, %330 : vector<32x128xf32>
    %cst_139 = arith.constant 1.000000e+00 : f32
    %332 = vector.broadcast %cst_139 : f32 to vector<32x128xf32>
    %333 = arith.addf %332, %331 : vector<32x128xf32>
    %334 = arith.mulf %295, %333 : vector<32x128xf32>
    %335 = arith.truncf %334 : vector<32x128xf32> to vector<32x128xbf16>
    %c1_140 = arith.constant 1 : index
    %c0_141 = arith.constant 0 : index
    %c0_142 = arith.constant 0 : index
    %336 = vector.load %arg15[%c1_140, %c0_141, %c0_142] : memref<2x128x32xbf16, #tpu.memory_space<vmem>>, vector<1x128x32xbf16>
    %337 = vector.shape_cast %336 : vector<1x128x32xbf16> to vector<128x32xbf16>
    %cst_143 = arith.constant dense<0.000000e+00> : vector<32x32xf32>
    %338 = tpu.matmul %335, %337, %cst_143 {dimension_numbers = #tpu.dot_dimension_numbers<[1], [0], [0], [1], [0, 0, 1, 1], [], []>} : vector<32x128xbf16>, vector<128x32xbf16>, vector<32x32xf32> -> vector<32x32xf32>
    %339 = arith.addf %259, %338 : vector<32x32xf32>
    %c1_144 = arith.constant 1 : index
    %c0_145 = arith.constant 0 : index
    %c0_146 = arith.constant 0 : index
    %340 = vector.load %arg16[%c1_144, %c0_145, %c0_146] : memref<2x1x32xf32, #tpu.memory_space<vmem>>, vector<1x1x32xf32>
    %341 = vector.shape_cast %340 : vector<1x1x32xf32> to vector<1x32xf32>
    %342 = vector.broadcast %341 : vector<1x32xf32> to vector<32x32xf32>
    %343 = arith.addf %339, %342 : vector<32x32xf32>
    %c0_147 = arith.constant 0 : index
    %c0_148 = arith.constant 0 : index
    %344 = vector.load %arg17[%c0_147, %c0_148] : memref<1x32xf32, #tpu.memory_space<vmem>>, vector<1x32xf32>
    %c0_149 = arith.constant 0 : index
    %c0_150 = arith.constant 0 : index
    %345 = vector.load %arg18[%c0_149, %c0_150] : memref<1x32xf32, #tpu.memory_space<vmem>>, vector<1x32xf32>
    %cst_151 = arith.constant dense<0.000000e+00> : vector<32xf32>
    %346 = vector.multi_reduction <add>, %343, %cst_151 [1] : vector<32x32xf32> to vector<32xf32>
    %347 = vector.shape_cast %346 : vector<32xf32> to vector<32x1xf32>
    %cst_152 = arith.constant 3.200000e+01 : f32
    %348 = vector.broadcast %cst_152 : f32 to vector<32x1xf32>
    %349 = arith.divf %347, %348 : vector<32x1xf32>
    %350 = vector.broadcast %349 : vector<32x1xf32> to vector<32x32xf32>
    %351 = arith.subf %343, %350 : vector<32x32xf32>
    %352 = arith.mulf %351, %351 : vector<32x32xf32>
    %cst_153 = arith.constant dense<0.000000e+00> : vector<32xf32>
    %353 = vector.multi_reduction <add>, %352, %cst_153 [1] : vector<32x32xf32> to vector<32xf32>
    %354 = vector.shape_cast %353 : vector<32xf32> to vector<32x1xf32>
    %cst_154 = arith.constant 3.200000e+01 : f32
    %355 = vector.broadcast %cst_154 : f32 to vector<32x1xf32>
    %356 = arith.divf %354, %355 : vector<32x1xf32>
    %357 = vector.broadcast %349 : vector<32x1xf32> to vector<32x32xf32>
    %358 = arith.subf %343, %357 : vector<32x32xf32>
    %cst_155 = arith.constant 9.99999974E-6 : f32
    %359 = vector.broadcast %cst_155 : f32 to vector<32x1xf32>
    %360 = arith.addf %356, %359 : vector<32x1xf32>
    %361 = math.rsqrt %360 : vector<32x1xf32>
    %362 = vector.broadcast %361 : vector<32x1xf32> to vector<32x32xf32>
    %363 = arith.mulf %358, %362 : vector<32x32xf32>
    %364 = vector.broadcast %344 : vector<1x32xf32> to vector<32x32xf32>
    %365 = arith.mulf %363, %364 : vector<32x32xf32>
    %366 = vector.broadcast %345 : vector<1x32xf32> to vector<32x32xf32>
    %367 = arith.addf %365, %366 : vector<32x32xf32>
    %368 = arith.truncf %367 : vector<32x32xf32> to vector<32x32xbf16>
    %c0_156 = arith.constant 0 : index
    %c0_157 = arith.constant 0 : index
    %369 = vector.load %arg19[%c0_156, %c0_157] : memref<32x128xbf16, #tpu.memory_space<vmem>>, vector<32x128xbf16>
    %cst_158 = arith.constant dense<0.000000e+00> : vector<32x128xf32>
    %370 = tpu.matmul %368, %369, %cst_158 {dimension_numbers = #tpu.dot_dimension_numbers<[1], [0], [0], [1], [0, 0, 1, 1], [], []>} : vector<32x32xbf16>, vector<32x128xbf16>, vector<32x128xf32> -> vector<32x128xf32>
    %c0_159 = arith.constant 0 : index
    %c0_160 = arith.constant 0 : index
    %371 = vector.load %arg20[%c0_159, %c0_160] : memref<1x128xf32, #tpu.memory_space<vmem>>, vector<1x128xf32>
    %372 = vector.broadcast %371 : vector<1x128xf32> to vector<32x128xf32>
    %373 = arith.addf %370, %372 : vector<32x128xf32>
    %c0_161 = arith.constant 0 : index
    %c0_162 = arith.constant 0 : index
    %374 = vector.load %arg21[%c0_161, %c0_162] : memref<32x128xf32, #tpu.memory_space<vmem>>, vector<32x128xf32>
    tpu.vector_store %arg21[%c0_161, %c0_162], %373 {strides = array<i32>} : memref<32x128xf32, #tpu.memory_space<vmem>>, vector<32x128xf32>,
    return
  }
}

</mosaic_0001>

<bundles_post_ra>
// kernel: pixel_transformer_forward.1
= control target key start
LH: loop header
LB: loop body
LE: loop exit
PB: predicated region body
PF: predicated region fallthrough
CT: control target
= control target key end

     0   :  { %s4739_s0 = inlined_call_operand.vmem [shape: s32[32,1], index: 0, kind: input, shape index: {}]   ;;  %s4740_s1 = inlined_call_operand.hbm [shape: f32[16,32], index: 1, kind: input, shape index: {}]   ;;  %s4741_s2 = inlined_call_operand.vmem [shape: f32[32,32], index: 2, kind: input, shape index: {}]   ;;  %s4742_s3 = inlined_call_operand.vmem [shape: bf16[4,1,32], index: 3, kind: input, shape index: {}]   ;;  %s4743_s4 = inlined_call_operand.vmem [shape: f32[128,128], index: 4, kind: input, shape index: {}]   ;;  %s4744_s5 = inlined_call_operand.hbm [shape: f32[2,1,32], index: 5, kind: input, shape index: {}]   ;;  %s4745_s6 = inlined_call_operand.hbm [shape: f32[2,1,32], index: 6, kind: input, shape index: {}]   ;;  %s4746_s7 = inlined_call_operand.vmem [shape: bf16[2,32,96], index: 7, kind: input, shape index: {}]   ;;  %s4747_s8 = inlined_call_operand.hbm [shape: f32[2,1,96], index: 8, kind: input, shape index: {}]   ;;  %s4748_s9 = inlined_call_operand.hbm [shape: bf16[2,32,32], index: 9, kind: input, shape index: {}]   ;;  %s4749_s10 = inlined_call_operand.hbm [shape: f32[2,1,32], index: 10, kind: input, shape index: {}]   ;;  %s4750_s11 = inlined_call_operand.hbm [shape: f32[2,1,32], index: 11, kind: input, shape index: {}]   ;;  %s4751_s12 = inlined_call_operand.vmem [shape: f32[2,1,32], index: 12, kind: input, shape index: {}]   ;;  %s4752_s13 = inlined_call_operand.hbm [shape: bf16[2,32,128], index: 13, kind: input, shape index: {}]   ;;  %s4753_s14 = inlined_call_operand.vmem [shape: f32[2,1,128], index: 14, kind: input, shape index: {}]   ;;  %s4754_s15 = inlined_call_operand.vmem [shape: bf16[2,128,32], index: 15, kind: input, shape index: {}]   ;;  %s4755_s16 = inlined_call_operand.vmem [shape: f32[2,1,32], index: 16, kind: input, shape index: {}]   ;;  %s4756_s17 = inlined_call_operand.vmem [shape: f32[1,32], index: 17, kind: input, shape index: {}]   ;;  %s4757_s18 = inlined_call_operand.vmem [shape: f32[1,32], index: 18, kind: input, shape index: {}]   ;;  %s4758_s19 = inlined_call_operand.vmem [shape: bf16[32,128], index: 19, kind: input, shape index: {}]   ;;  %s4759_s20 = inlined_call_operand.vmem [shape: f32[1,128], index: 20, kind: input, shape index: {}]   ;;  %s4760_s21 = inlined_call_operand.vmem [shape: f32[32,128], index: 21, kind: output, shape index: {}]  }
   0x1   :  { %4768 = sst [smem:[#allocation20_spill]] %s4739_s0 }
   0x2   :  { %4769 = sst [smem:[#allocation21_spill]] %s4740_s1 }
   0x3   :  { %4770 = sst [smem:[#allocation22_spill]] %s4741_s2 }
   0x4   :  { %4771 = sst [smem:[#allocation23_spill]] %s4742_s3 }
   0x5   :  { %4772 = sst [smem:[#allocation24_spill]] %s4743_s4 }
   0x6   :  { %4773 = sst [smem:[#allocation25_spill]] %s4744_s5 }
   0x7   :  { %4774 = sst [smem:[#allocation26_spill]] %s4759_s20 }
   0x8   :  { %4775 = sst [smem:[#allocation27_spill]] %s4760_s21 }
   0x9   :  { %26 = vsyncpa [#allocation3], 0 }
   0xa   :  { %27 = vsyncpa [#allocation5], 0 }
   0xb   :  { %28 = vsyncpa [#allocation8], 0 }
   0xc   :  { %29 = vsyncpa [#allocation11], 0 }
   0xd   :  { %30 = vsyncpa [#allocation14], 0  ;;  %s3668_s2 = smov [#allocation4]   ;;  %s4776_s3 = sld [smem:[#allocation25_spill]] }
   0xe   :  { %s56_s25 = sshll.u32 %s3668_s2, 4  ;;  %s57_s25 = int_to_ptr.vmem [resolvable:$true] %s56_s25 }
  0x13   :  { %s3482_s28 = scalar_lea.hbm %s4776_s3, 32 }
  0x14   :  { %p3483_p0 = scmp.ne.s32.totalorder %s4776_s3, %s3482_s28  ;;  %p3486_p1 = scmp.lt.u32.totalorder %s3482_s28, %s4776_s3 }
  0x16   :  { %p3488_p2 = pnand %p3486_p1, %p3483_p0 }
  0x18   :  { %3491 = shalt.err (!%p3488_p2)
}
  0x19   :  { %s3492_s5 = scalar_lea.vmem %s57_s25, 32  ;;  %p3497_p4 = scmp.lt.s32.totalorder %s57_s25, %s57_s25 }
  0x1a   :  { %p3493_p3 = scmp.ne.s32.totalorder %s57_s25, %s3492_s5  ;;  %p3498_p5 = scmp.lt.s32.totalorder %s3492_s5, %s3492_s5 }
  0x1c   :  { %p3499_p6 = por %p3498_p5, %p3497_p4 }
  0x1e   :  { %p3500_p7 = pnand %p3499_p6, %p3493_p3 }
  0x20   :  { %3503 = shalt.err (!%p3500_p7)
}
  0x21   :  { %s3669_s22 = smov 16   ;;  %s3670_s23 = smov 1  }
  0x22   :  { %62 = dma.hbm_to_vmem [thread:$0]  %s4776_s3, 32, %s57_s25, [#allocation5], %s3669_s22, %s3669_s22, %s3670_s23  }
  0x23   :  { %s3671_s2 = smov [#allocation7]   ;;  %s3672_s27 = smov [#allocation10]  }
  0x24   :  { %s82_s26 = sshll.u32 %s3671_s2, 4  ;;  %s106_s28 = sshll.u32 %s3672_s27, 4  ;;  %s83_s26 = int_to_ptr.vmem [resolvable:$true] %s82_s26  ;;  %s107_s28 = int_to_ptr.vmem [resolvable:$true] %s106_s28 }
  0x25   :  { %s3504_s4 = scalar_lea.hbm %s4747_s8, 32 }
  0x26   :  { %p3505_p8 = scmp.ne.s32.totalorder %s4747_s8, %s3504_s4  ;;  %p3508_p9 = scmp.lt.u32.totalorder %s3504_s4, %s4747_s8 }
  0x28   :  { %p3510_p10 = pnand %p3508_p9, %p3505_p8 }
  0x2a   :  { %3513 = shalt.err (!%p3510_p10)
}
  0x2b   :  { %s3514_s25 = scalar_lea.vmem %s83_s26, 32  ;;  %p3519_p12 = scmp.lt.s32.totalorder %s83_s26, %s83_s26 }
  0x2c   :  { %p3515_p11 = scmp.ne.s32.totalorder %s83_s26, %s3514_s25  ;;  %p3520_p13 = scmp.lt.s32.totalorder %s3514_s25, %s3514_s25 }
  0x2e   :  { %p3521_p0 = por %p3520_p13, %p3519_p12 }
  0x30   :  { %p3522_p1 = pnand %p3521_p0, %p3515_p11 }
  0x32   :  { %3525 = shalt.err (!%p3522_p1)
}
  0x33   :  { %88 = dma.hbm_to_vmem [thread:$0]  %s4747_s8, 32, %s83_s26, [#allocation8], %s3669_s22, %s3669_s22, %s3670_s23  }
  0x34   :  { %s3526_s21 = scalar_lea.hbm %s4749_s10, 32 }
  0x35   :  { %p3527_p2 = scmp.ne.s32.totalorder %s4749_s10, %s3526_s21  ;;  %p3530_p3 = scmp.lt.u32.totalorder %s3526_s21, %s4749_s10 }
  0x37   :  { %p3532_p4 = pnand %p3530_p3, %p3527_p2 }
  0x39   :  { %3535 = shalt.err (!%p3532_p4)
}
  0x3a   :  { %s3536_s4 = scalar_lea.vmem %s107_s28, 32  ;;  %p3541_p6 = scmp.lt.s32.totalorder %s107_s28, %s107_s28 }
  0x3b   :  { %p3537_p5 = scmp.ne.s32.totalorder %s107_s28, %s3536_s4  ;;  %p3542_p7 = scmp.lt.s32.totalorder %s3536_s4, %s3536_s4 }
  0x3d   :  { %p3543_p8 = por %p3542_p7, %p3541_p6 }
  0x3f   :  { %p3544_p9 = pnand %p3543_p8, %p3537_p5 }
  0x41   :  { %3547 = shalt.err (!%p3544_p9)
}
  0x42   :  { %112 = dma.hbm_to_vmem [thread:$0]  %s4749_s10, 32, %s107_s28, [#allocation11], %s3669_s22, %s3669_s22, %s3670_s23  }
  0x43   :  { %s3673_s30 = smov [#allocation2]   ;;  %s4777_s1 = sld [smem:[#allocation21_spill]] }
  0x44   :  { %s38_s5 = sshll.u32 %s3673_s30, 4  ;;  %s39_s5 = int_to_ptr.vmem [resolvable:$true] %s38_s5 }
  0x49   :  { %s3548_s24 = scalar_lea.hbm %s4777_s1, 256 }
  0x4a   :  { %p3549_p10 = scmp.ne.s32.totalorder %s4777_s1, %s3548_s24  ;;  %p3552_p11 = scmp.lt.u32.totalorder %s3548_s24, %s4777_s1 }
  0x4c   :  { %p3554_p12 = pnand %p3552_p11, %p3549_p10 }
  0x4e   :  { %3557 = shalt.err (!%p3554_p12)
}
  0x4f   :  { %s3558_s29 = scalar_lea.vmem %s39_s5, 256  ;;  %p3563_p0 = scmp.lt.s32.totalorder %s39_s5, %s39_s5 }
  0x50   :  { %p3559_p13 = scmp.ne.s32.totalorder %s39_s5, %s3558_s29  ;;  %p3564_p1 = scmp.lt.s32.totalorder %s3558_s29, %s3558_s29 }
  0x52   :  { %p3565_p2 = por %p3564_p1, %p3563_p0 }
  0x54   :  { %p3566_p3 = pnand %p3565_p2, %p3559_p13 }
  0x56   :  { %3569 = shalt.err (!%p3566_p3)
}
  0x57   :  { %s3674_s10 = smov 128   ;;  %s3675_s28 = smov 8  }
  0x58   :  { %44 = dma.hbm_to_vmem [thread:$0]  %s4777_s1, 256, %s39_s5, [#allocation3], %s3674_s10, %s3674_s10, %s3675_s28  }
  0x59   :  { %s3676_s8 = smov [#allocation6]   ;;  %s3677_s30 = smov [#allocation9]  }
  0x5a   :  { %s68_s26 = sshll.u32 %s3676_s8, 4  ;;  %s94_s25 = sshll.u32 %s3677_s30, 4  ;;  %s69_s26 = int_to_ptr.vmem [resolvable:$true] %s68_s26  ;;  %s3854_s25 = int_to_ptr.vmem [resolvable:$true] %s94_s25 }
  0x5b   :  { %s3570_s20 = scalar_lea.hbm %s4745_s6, 32 }
  0x5c   :  { %p3571_p4 = scmp.ne.s32.totalorder %s4745_s6, %s3570_s20  ;;  %p3574_p5 = scmp.lt.u32.totalorder %s3570_s20, %s4745_s6 }
  0x5e   :  { %p3576_p6 = pnand %p3574_p5, %p3571_p4 }
  0x60   :  { %3579 = shalt.err (!%p3576_p6)
}
  0x61   :  { %s3580_s5 = scalar_lea.vmem %s69_s26, 32  ;;  %p3585_p8 = scmp.lt.s32.totalorder %s69_s26, %s69_s26 }
  0x62   :  { %p3581_p7 = scmp.ne.s32.totalorder %s69_s26, %s3580_s5  ;;  %p3586_p9 = scmp.lt.s32.totalorder %s3580_s5, %s3580_s5 }
  0x64   :  { %p3587_p10 = por %p3586_p9, %p3585_p8 }
  0x66   :  { %p3588_p11 = pnand %p3587_p10, %p3581_p7 }
  0x68   :  { %3591 = shalt.err (!%p3588_p11)
}
  0x69   :  { %74 = dma.hbm_to_vmem [thread:$0]  %s4745_s6, 32, %s69_s26, [#allocation5], %s3669_s22, %s3669_s22, %s3670_s23  }
  0x6a   :  { %s3592_s4 = scalar_lea.hbm %s4748_s9, 512 }
  0x6b   :  { %p3593_p12 = scmp.ne.s32.totalorder %s4748_s9, %s3592_s4  ;;  %p3596_p13 = scmp.lt.u32.totalorder %s3592_s4, %s4748_s9 }
  0x6d   :  { %p3598_p0 = pnand %p3596_p13, %p3593_p12 }
  0x6f   :  { %3601 = shalt.err (!%p3598_p0)
}
  0x70   :  { %s3602_s20 = scalar_lea.vmem %s3854_s25, 512  ;;  %p3607_p2 = scmp.lt.s32.totalorder %s3854_s25, %s3854_s25 }
  0x71   :  { %p3603_p1 = scmp.ne.s32.totalorder %s3854_s25, %s3602_s20  ;;  %p3608_p3 = scmp.lt.s32.totalorder %s3602_s20, %s3602_s20 }
  0x73   :  { %p3609_p4 = por %p3608_p3, %p3607_p2 }
  0x75   :  { %p3610_p5 = pnand %p3609_p4, %p3603_p1 }
  0x77   :  { %3613 = shalt.err (!%p3610_p5)
}
  0x78   :  { %s3678_s6 = smov 64   ;;  %s3679_s26 = smov 4  }
  0x79   :  { %100 = dma.hbm_to_vmem [thread:$0]  %s4748_s9, 512, %s3854_s25, [#allocation8], %s3678_s6, %s3678_s6, %s3679_s26  }
  0x7a   :  { %s3680_s27 = smov [#allocation12]   ;;  %s3681_s5 = smov [#allocation13]  }
  0x7b   :  { %s118_s29 = sshll.u32 %s3680_s27, 4  ;;  %s132_s1 = sshll.u32 %s3681_s5, 4  ;;  %s119_s29 = int_to_ptr.vmem [resolvable:$true] %s118_s29  ;;  %s3891_s1 = int_to_ptr.vmem [resolvable:$true] %s132_s1 }
  0x7c   :  { %s3614_s0 = scalar_lea.hbm %s4750_s11, 32 }
  0x7d   :  { %p3615_p6 = scmp.ne.s32.totalorder %s4750_s11, %s3614_s0  ;;  %p3618_p7 = scmp.lt.u32.totalorder %s3614_s0, %s4750_s11 }
  0x7f   :  { %p3620_p8 = pnand %p3618_p7, %p3615_p6 }
  0x81   :  { %3623 = shalt.err (!%p3620_p8)
}
  0x82   :  { %s3624_s9 = scalar_lea.vmem %s119_s29, 32  ;;  %p3629_p10 = scmp.lt.s32.totalorder %s119_s29, %s119_s29 }
  0x83   :  { %p3625_p9 = scmp.ne.s32.totalorder %s119_s29, %s3624_s9  ;;  %p3630_p11 = scmp.lt.s32.totalorder %s3624_s9, %s3624_s9 }
  0x85   :  { %p3631_p12 = por %p3630_p11, %p3629_p10 }
  0x87   :  { %p3632_p13 = pnand %p3631_p12, %p3625_p9 }
  0x89   :  { %3635 = shalt.err (!%p3632_p13)
}
  0x8a   :  { %124 = dma.hbm_to_vmem [thread:$0]  %s4750_s11, 32, %s119_s29, [#allocation11], %s3669_s22, %s3669_s22, %s3670_s23  }
  0x8b   :  { %s3636_s2 = scalar_lea.hbm %s4752_s13, 512 }
  0x8c   :  { %p3637_p0 = scmp.ne.s32.totalorder %s4752_s13, %s3636_s2  ;;  %p3640_p1 = scmp.lt.u32.totalorder %s3636_s2, %s4752_s13 }
  0x8e   :  { %p3642_p2 = pnand %p3640_p1, %p3637_p0 }
  0x90   :  { %3645 = shalt.err (!%p3642_p2)
}
  0x91   :  { %s3646_s0 = scalar_lea.vmem %s3891_s1, 512  ;;  %p3651_p4 = scmp.lt.s32.totalorder %s3891_s1, %s3891_s1 }
  0x92   :  { %p3647_p3 = scmp.ne.s32.totalorder %s3891_s1, %s3646_s0  ;;  %p3652_p5 = scmp.lt.s32.totalorder %s3646_s0, %s3646_s0 }
  0x94   :  { %p3653_p6 = por %p3652_p5, %p3651_p4 }
  0x96   :  { %p3654_p7 = pnand %p3653_p6, %p3647_p3 }
  0x98   :  { %3657 = shalt.err (!%p3654_p7)
}
  0x99   :  { %138 = dma.hbm_to_vmem [thread:$0]  %s4752_s13, 512, %s3891_s1, [#allocation14], %s3678_s6, %s3678_s6, %s3679_s26  }
  0x9a   :  { %3658 = dma.done.wait [#allocation3], 256  }
  0x9b   :  { %3659 = vsyncadd [#allocation3], 4294967040 }
  0x9c   :  { %3660 = dma.done.wait [#allocation5], 64  }
  0x9d   :  { %3661 = vsyncadd [#allocation5], 4294967232 }
  0x9e   :  { %3662 = dma.done.wait [#allocation8], 544  }
  0x9f   :  { %3663 = vsyncadd [#allocation8], 4294966752 }
  0xa0   :  { %3664 = dma.done.wait [#allocation11], 64  }
  0xa1   :  { %3665 = vsyncadd [#allocation11], 4294967232 }
  0xa2   :  { %3666 = dma.done.wait [#allocation14], 512  }
  0xa3   :  { %3667 = vsyncadd [#allocation14], 4294966784  ;;  %v3682_v0 = vmov 0   ;;  %s4778_s4 = sld [smem:[#allocation20_spill]]  ;;  %v208_v4 = vld [vmem:[#allocation2] sm:$0xff]  ;;  %v209_v5 = vld [vmem:[#allocation2 + $0x8] sm:$0xff]  ;;  %v182_v8 = vlaneseq }
  0xa4   :  { %3235 = vset.pattern.permute.xlu1 %v3682_v0  ;;  %3234 = vset.pattern.permute.xlu0 %v3682_v0  ;;  %v3171_v7 = vpack.c.bf16 %v209_v5, %v208_v4  ;;  %vm214_vm0 = vcmask 130048   ;;  %v3683_v12 = vmov 0.0   ;;  %s4779_s24 = sld [smem:[#allocation22_spill]]  ;;  %vm334_vm5 = vcmask 261120   ;;  %v3236_v55 = vld [vmem:[%s4746_s7] sm:$0xff]   ;;  %v3237_v56 = vld [vmem:[%s4746_s7 + $0x8] sm:$0xff]  }
  0xa5   :  { %v183_v9 = vand.u32 127, %v182_v8  ;;  %2947 = vmatprep.subr.bf16.mxu1 %v3236_v55  ;;  %v494_v57 = vshrl.u32 %v182_v8, 7  ;;  %s3684_s9 = smov 32   ;;  %s3685_s25 = smov 96  }
  0xa6   :  { %3172 = vmatprep.subr.bf16.mxu0 %v3171_v7  ;;  %2948 = vmatpush3.bf16.msra.mxu1 %v3236_v55  ;;  %s4781_s21 = sld [smem:[#allocation24_spill]]  ;;  %s4782_s28 = sld [smem:[#allocation26_spill]] }
  0xa7   :  { %3174 = vmatpush3.bf16.msra.mxu0 %v3171_v7  ;;  %2949 = vmatprep.subr.bf16.mxu1 %v3237_v56  ;;  %v495_v58 = vsub.s32 0, %v494_v57 }
  0xa9   :  { %v180_v1 = vld [vmem:[%s4778_s4 + $0x10] sm:$0xff]  ;;  %v178_v2 = vld [vmem:[%s4778_s4] sm:$0xff]  ;;  %v181_v3 = vld [vmem:[%s4778_s4 + $0x18] sm:$0xff] }
  0xaa   :  { %191 = vperm.xlu1 %3235, %v180_v1   ;;  %185 = vperm.xlu0 %3234, %v178_v2   ;;  %v179_v6 = vld [vmem:[%s4778_s4 + $0x8] sm:$0xff]  ;;  %v210_v20 = vld [vmem:[%s4779_s24] sm:$0xff]  ;;  %v212_v26 = vld [vmem:[%s4779_s24 + $0x10] sm:$0xff]  ;;  %s4780_s4 = sld [smem:[#allocation23_spill]] }
  0xab   :  { %v211_v19 = vld [vmem:[%s4779_s24 + $0x8] sm:$0xff]  ;;  %v213_v29 = vld [vmem:[%s4779_s24 + $0x18] sm:$0xff]  ;;  %2950 = vmatpush3.bf16.msra.mxu1 %v3237_v56 }
  0xae   :  { %194 = vperm.xlu1 %3235, %v181_v3   ;;  %188 = vperm.xlu0 %3234, %v179_v6  }
  0xb0   :  { %v312_v59 = vld [vmem:[%s4780_s4] sm:$0x1]  ;;  %v314_v60 = vld [vmem:[%s4780_s4 + $0x2] sm:$0x1]  ;;  %v313_v63 = vld [vmem:[%s4780_s4 + $0x1] sm:$0x1] }
  0xb1   :  { %v491_v61 = vpack.i.b16 %v312_v59, %v312_v59  ;;  %v505_v62 = vpack.i.b16 %v314_v60, %v314_v60  ;;  %v315_v0 = vld [vmem:[%s4780_s4 + $0x3] sm:$0x1]  ;;  %v498_v1 = vpack.i.b16 %v313_v63, %v313_v63 }
  0xb2   :  { %v512_v5 = vpack.i.b16 %v315_v0, %v315_v0 }
  0xb3   :  { %v4008_v2 = vrot.slane %v491_v61, %v495_v58  ;;  %v4010_v3 = vrot.slane %v498_v1, %v495_v58  ;;  %v4013_v4 = vrot.slane %v505_v62, %v495_v58 }
  0xb4   :  { %v4017_v6 = vrot.slane %v512_v5, %v495_v58 }
 0x129   :  { %v192_v10 = vpop.permute.xlu1 %191  ;;  %v186_v11 = vpop.permute.xlu0 %185 }
 0x12a   :  { %vm196_vm1 = vcmp.eq.s32.totalorder %v186_v11, %v183_v9  ;;  %vm198_vm2 = vcmp.eq.s32.totalorder %v192_v10, %v183_v9 }
 0x12b   :  { %v2709_v13 = vsel %vm196_vm1, 1.0, %v3683_v12  ;;  %v2711_v16 = vsel %vm198_vm2, 1.0, %v3683_v12 }
 0x12c   :  { %2941 = vmatprep.mubr.msk.f32.mxu0 %vm214_vm0, %v2709_v13 }
 0x12d   :  { %v195_v14 = vpop.permute.xlu1 %194  ;;  %v189_v15 = vpop.permute.xlu0 %188 }
 0x12e   :  { %vm197_vm3 = vcmp.eq.s32.totalorder %v189_v15, %v183_v9  ;;  %vm199_vm4 = vcmp.eq.s32.totalorder %v195_v14, %v183_v9 }
 0x12f   :  { %v2710_v17 = vsel %vm197_vm3, 1.0, %v3683_v12  ;;  %v2712_v18 = vsel %vm199_vm4, 1.0, %v3683_v12 }
 0x130   :  { %2942 = vmatmul.mubr.msk.f32.vlgmr.msra.gmra.mrb[0].mxu0 %vm214_vm0, %v2710_v17 }
 0x131   :  { %2944 = vmatprep.mubr.msk.f32.mxu0 %vm214_vm0, %v2711_v16 }
 0x134   :  { %2945 = vmatmul.mubr.msk.f32.gmra.mrb[2].mxu0 %vm214_vm0, %v2712_v18 }
 0x203   :  { %v2943_v21 = vpop.f32.mrb[0].mxu0 }
 0x204   :  { %v3947_v22 = vadd.f32 %v2943_v21, %v211_v19  ;;  %v293_v23 = vpop.f32.mrb[1].mxu0 }
 0x205   :  { %v3949_v24 = vadd.f32 %v293_v23, %v210_v20  ;;  %v2717_v20 = vld [vmem:[#allocation4] ss:$0 sm:$0xff] }
 0x206   :  { %v338_v25 = vsel %vm334_vm5, %v3947_v22, 0.0 }
 0x207   :  { %339 = vadd.xlane.f32.xlu1 %v338_v25  ;;  %v2946_v27 = vpop.f32.mrb[2].mxu0  ;;  %v335_v28 = vsel %vm334_vm5, %v3949_v24, 0.0  ;;  %v2718_v25 = vld [vmem:[#allocation6] ss:$0 sm:$0xff] }
 0x208   :  { %v303_v30 = vpop.f32.mrb[3].mxu0  ;;  %336 = vadd.xlane.f32.xlu0 %v335_v28  ;;  %v3963_v32 = vadd.f32 %v2946_v27, %v213_v29 }
 0x209   :  { %v3961_v31 = vadd.f32 %v303_v30, %v212_v26 }
 0x20a   :  { %v344_v34 = vsel %vm334_vm5, %v3963_v32, 0.0 }
 0x20b   :  { %v341_v33 = vsel %vm334_vm5, %v3961_v31, 0.0 }
 0x20c   :  { %342 = vadd.xlane.f32.xlu0 %v341_v33 }
 0x210   :  { %345 = vadd.xlane.f32.xlu0 %v344_v34 }
 0x294   :  { %v340_v35 = vpop.xlane.xlu1 %339 }
 0x295   :  { %v349_v36 = vmul.f32 0.03125, %v340_v35  ;;  %v337_v37 = vpop.xlane.xlu0 %336 }
 0x296   :  { %v348_v38 = vmul.f32 0.03125, %v337_v37 }
 0x297   :  { %v3970_v39 = vsub.f32 %v3947_v22, %v349_v36 }
 0x298   :  { %v3973_v40 = vsub.f32 %v3949_v24, %v348_v38 }
 0x299   :  { %v343_v41 = vpop.xlane.xlu0 %342  ;;  %v357_v42 = vmul.f32 %v3970_v39, %v3970_v39 }
 0x29a   :  { %v350_v43 = vmul.f32 0.03125, %v343_v41  ;;  %v356_v44 = vmul.f32 %v3973_v40, %v3973_v40 }
 0x29b   :  { %v363_v45 = vsel %vm334_vm5, %v357_v42, 0.0 }
 0x29c   :  { %v3981_v46 = vsub.f32 %v3961_v31, %v350_v43  ;;  %364 = vadd.xlane.f32.xlu0 %v363_v45  ;;  %v360_v47 = vsel %vm334_vm5, %v356_v44, 0.0  ;;  %v2719_v44 = vld [vmem:[#allocation7] ss:$0 sm:$0xff] }
 0x29d   :  { %361 = vadd.xlane.f32.xlu1 %v360_v47  ;;  %v346_v48 = vpop.xlane.xlu0 %345 }
 0x29e   :  { %v351_v49 = vmul.f32 0.03125, %v346_v48  ;;  %v358_v50 = vmul.f32 %v3981_v46, %v3981_v46 }
 0x2a0   :  { %v355_v51 = vsub.f32 %v3963_v32, %v351_v49  ;;  %v366_v52 = vsel %vm334_vm5, %v358_v50, 0.0 }
 0x2a1   :  { %367 = vadd.xlane.f32.xlu1 %v366_v52 }
 0x2a2   :  { %v359_v53 = vmul.f32 %v355_v51, %v355_v51 }
 0x2a4   :  { %v369_v54 = vsel %vm334_vm5, %v359_v53, 0.0 }
 0x2a5   :  { %370 = vadd.xlane.f32.xlu0 %v369_v54 }
 0x2b2   :  { %530 = vrot.lane.b32.xlu1 %v4008_v2, %s3684_s9 }
 0x2b6   :  { %534 = vrot.lane.b32.xlu1 %v4013_v4, %s3684_s9 }
 0x2ba   :  { %536 = vrot.lane.b32.xlu1 %v4017_v6, %s3684_s9 }
 0x2bb   :  { %532 = vrot.lane.b32.xlu0 %v4010_v3, %s3684_s9 }
 0x329   :  { %v365_v7 = vpop.xlane.xlu0 %364 }
 0x32a   :  { %v373_v8 = vmul.f32 0.03125, %v365_v7  ;;  %v362_v9 = vpop.xlane.xlu1 %361 }
 0x32b   :  { %v372_v10 = vmul.f32 0.03125, %v362_v9 }
 0x32c   :  { %v377_v11 = vadd.f32 1e-05, %v373_v8 }
 0x32d   :  { %v376_v12 = vadd.f32 1e-05, %v372_v10 }
 0x32e   :  { %3266 = vrsqrt.f32 %v377_v11  ;;  %v368_v13 = vpop.xlane.xlu1 %367 }
 0x32f   :  { %3268 = vrsqrt.f32 %v376_v12  ;;  %v374_v14 = vmul.f32 0.03125, %v368_v13 }
 0x331   :  { %v378_v15 = vadd.f32 1e-05, %v374_v14 }
 0x332   :  { %v371_v16 = vpop.xlane.xlu0 %370 }
 0x333   :  { %3270 = vrsqrt.f32 %v378_v15  ;;  %v375_v17 = vmul.f32 0.03125, %v371_v16 }
 0x335   :  { %v379_v18 = vadd.f32 1e-05, %v375_v17 }
 0x336   :  { %v4033_v56 = vpop.permute.xlu0 %532 }
 0x337   :  { %3272 = vrsqrt.f32 %v379_v18 }
 0x338   :  { %v3267_v19 = vpop.eup %3266 }
 0x339   :  { %v3269_v21 = vpop.eup %3268  ;;  %v385_v23 = vmul.f32 %v3267_v19, %v3970_v39 }
 0x33a   :  { %v384_v26 = vmul.f32 %v3269_v21, %v3973_v40 }
 0x33b   :  { %v395_v27 = vmul.f32 %v2717_v20, %v385_v23 }
 0x33c   :  { %v394_v28 = vmul.f32 %v2717_v20, %v384_v26 }
 0x33d   :  { %v3271_v29 = vpop.eup %3270  ;;  %v405_v30 = vadd.f32 %v2718_v25, %v395_v27 }
 0x33e   :  { %v404_v33 = vadd.f32 %v2718_v25, %v394_v28  ;;  %v386_v34 = vmul.f32 %v3271_v29, %v3981_v46  ;;  %v4025_v46 = vpop.permute.xlu1 %530 }
 0x340   :  { %v408_v35 = vpack.c.bf16 %v405_v30, %v404_v33  ;;  %v396_v38 = vmul.f32 %v2717_v20, %v386_v34 }
 0x341   :  { %v3273_v36 = vpop.eup %3272 }
 0x342   :  { %2951 = vmatprep.mubr.msk.bf16.mxu1 %vm334_vm5, %v408_v35  ;;  %v387_v37 = vmul.f32 %v3273_v36, %v355_v51  ;;  %v406_v42 = vadd.f32 %v2718_v25, %v396_v38  ;;  %v4040_v59 = vpop.permute.xlu1 %534 }
 0x344   :  { %v397_v41 = vmul.f32 %v2717_v20, %v387_v37 }
 0x346   :  { %v407_v43 = vadd.f32 %v2718_v25, %v397_v41  ;;  %v4052_v63 = vpop.permute.xlu1 %536 }
 0x348   :  { %v409_v39 = vpack.c.bf16 %v407_v43, %v406_v42 }
 0x34a   :  { %2952 = vmatmul.mubr.msk.bf16.vlgmr.msra.gmra.mrb[0].mxu1 %vm334_vm5, %v409_v39 }
 0x41d   :  { %v2953_v40 = vpop.f32.mrb[0].mxu1 }
 0x41e   :  { %v473_v45 = vpop.f32.mrb[1].mxu1  ;;  %v482_v48 = vadd.f32 %v2953_v40, %v2719_v44 }
 0x41f   :  { %v2954_v47 = vpop.f32.mrb[2].mxu1  ;;  %v474_v52 = vadd.f32 %v2719_v44, %v473_v45 }
 0x420   :  { %v485_v49 = vadd.f32 %v2954_v47, %v2719_v44  ;;  %v476_v50 = vpop.f32.mrb[3].mxu1 }
 0x421   :  { %v477_v53 = vadd.f32 %v2719_v44, %v476_v50 }
 0x422   :  { %v4027_v54 = vpack.c.bf16 %v485_v49, %v482_v48 }
 0x423   :  { %v4029_v51 = vpack.c.bf16 %v477_v53, %v474_v52  ;;  %v318_v52 = vld [vmem:[%s4781_s21 + $0x10] sm:$0xff]  ;;  %v316_v53 = vld [vmem:[%s4781_s21] sm:$0xff] }
 0x424   :  { %v543_v55 = vmul.bf16 %v4025_v46, %v4027_v54  ;;  %v545_v60 = vmul.bf16 %v4033_v56, %v4027_v54  ;;  %v547_v62 = vmul.bf16 %v4040_v59, %v4027_v54  ;;  %v549_v1 = vmul.bf16 %v4052_v63, %v4027_v54 }
 0x425   :  { %v542_v57 = vmul.bf16 %v4025_v46, %v4029_v51  ;;  %v518_v58 = vmul.bf16 %v4008_v2, %v4029_v51  ;;  %v544_v61 = vmul.bf16 %v4033_v56, %v4029_v51  ;;  %v546_v0 = vmul.bf16 %v4040_v59, %v4029_v51 }
 0x426   :  { %580 = vrot.lane.b32.xlu1 %v543_v55, %s3685_s25  ;;  %v548_v5 = vmul.bf16 %v4052_v63, %v4029_v51  ;;  %v519_v36 = vmul.bf16 %v4008_v2, %v4027_v54  ;;  %v520_v37 = vmul.bf16 %v4010_v3, %v4029_v51  ;;  %v521_v38 = vmul.bf16 %v4010_v3, %v4027_v54 }
 0x427   :  { %578 = vrot.lane.b32.xlu0 %v542_v57, %s3685_s25  ;;  %2971 = vmatprep.mubr.msk.bf16.mxu0 %vm334_vm5, %v518_v58  ;;  %v522_v41 = vmul.bf16 %v4013_v4, %v4029_v51  ;;  %v523_v42 = vmul.bf16 %v4013_v4, %v4027_v54  ;;  %v524_v43 = vmul.bf16 %v4017_v6, %v4029_v51  ;;  %v319_v57 = vld [vmem:[%s4781_s21 + $0x18] sm:$0xff] }
 0x428   :  { %v525_v39 = vmul.bf16 %v4017_v6, %v4027_v54 }
 0x42a   :  { %584 = vrot.lane.b32.xlu1 %v545_v60, %s3685_s25 }
 0x42b   :  { %582 = vrot.lane.b32.xlu0 %v544_v61, %s3685_s25  ;;  %v317_v61 = vld [vmem:[%s4781_s21 + $0x8] sm:$0xff] }
 0x42e   :  { %588 = vrot.lane.b32.xlu1 %v547_v62, %s3685_s25 }
 0x42f   :  { %586 = vrot.lane.b32.xlu0 %v546_v0, %s3685_s25 }
 0x432   :  { %592 = vrot.lane.b32.xlu1 %v549_v1, %s3685_s25 }
 0x433   :  { %590 = vrot.lane.b32.xlu0 %v548_v5, %s3685_s25 }
 0x436   :  { %552 = vrot.lane.b32.xlu1 %v4010_v3, %s3678_s6 }
 0x437   :  { %550 = vrot.lane.b32.xlu0 %v4008_v2, %s3678_s6 }
 0x43a   :  { %556 = vrot.lane.b32.xlu1 %v4017_v6, %s3678_s6 }
 0x43b   :  { %554 = vrot.lane.b32.xlu0 %v4013_v4, %s3678_s6 }
 0x498   :  { %v581_v7 = vpop.permute.xlu1 %580 }
 0x499   :  { %v579_v8 = vpop.permute.xlu0 %578  ;;  %v622_v14 = vsel %vm334_vm5, %v581_v7, 0 }
 0x49a   :  { %3199 = vmatprep.subr.msk.bf16.mxu0 %vm334_vm5, %v579_v8  ;;  %v619_v9 = vsel %vm334_vm5, %v579_v8, 0 }
 0x49b   :  { %2956 = vmatpush3.bf16.xpose.msra.mxu0 %v619_v9 }
 0x49c   :  { %v585_v10 = vpop.permute.xlu1 %584  ;;  %3200 = vmatprep.subr.msk.bf16.mxu0 %vm334_vm5, %v581_v7 }
 0x49d   :  { %v583_v11 = vpop.permute.xlu0 %582  ;;  %v628_v28 = vsel %vm334_vm5, %v585_v10, 0 }
 0x49e   :  { %v625_v20 = vsel %vm334_vm5, %v583_v11, 0 }
 0x4a0   :  { %v589_v12 = vpop.permute.xlu1 %588 }
 0x4a1   :  { %v587_v13 = vpop.permute.xlu0 %586  ;;  %v634_v33 = vsel %vm334_vm5, %v589_v12, 0 }
 0x4a2   :  { %v631_v30 = vsel %vm334_vm5, %v587_v13, 0 }
 0x4a3   :  { %2958 = vmatpush3.bf16.xpose.msra.mxu0 %v622_v14 }
 0x4a4   :  { %v593_v15 = vpop.permute.xlu1 %592  ;;  %3201 = vmatprep.subr.msk.bf16.mxu0 %vm334_vm5, %v583_v11 }
 0x4a5   :  { %v591_v16 = vpop.permute.xlu0 %590  ;;  %v640_v35 = vsel %vm334_vm5, %v593_v15, 0 }
 0x4a6   :  { %v637_v34 = vsel %vm334_vm5, %v591_v16, 0 }
 0x4a8   :  { %v4077_v17 = vpop.permute.xlu1 %552 }
 0x4a9   :  { %v4079_v18 = vpop.permute.xlu0 %550  ;;  %v565_v19 = vmul.bf16 %v4077_v17, %v4027_v54  ;;  %v564_v25 = vmul.bf16 %v4077_v17, %v4029_v51 }
 0x4aa   :  { %v563_v21 = vmul.bf16 %v4079_v18, %v4027_v54  ;;  %v562_v29 = vmul.bf16 %v4079_v18, %v4029_v51 }
 0x4ab   :  { %857 = vrot.lane.b32.xlu1 %v565_v19, %s3678_s6  ;;  %2960 = vmatpush3.bf16.xpose.msra.mxu0 %v625_v20  ;;  %v321_v19 = vld [vmem:[%s4781_s21 + $0x28] sm:$0xff] }
 0x4ac   :  { %3202 = vmatprep.subr.msk.bf16.mxu0 %vm334_vm5, %v585_v10  ;;  %853 = vrot.lane.b32.xlu0 %v563_v21, %s3678_s6  ;;  %v4133_v44 = vpop.permute.xlu1 %556  ;;  %v323_v21 = vld [vmem:[%s4781_s21 + $0x38] sm:$0xff] }
 0x4ad   :  { %v4089_v23 = vpop.permute.xlu0 %554 }
 0x4ae   :  { %v567_v26 = vmul.bf16 %v4089_v23, %v4027_v54  ;;  %v566_v27 = vmul.bf16 %v4089_v23, %v4029_v51 }
 0x4af   :  { %855 = vrot.lane.b32.xlu1 %v564_v25, %s3678_s6 }
 0x4b0   :  { %861 = vrot.lane.b32.xlu0 %v567_v26, %s3678_s6 }
 0x4b3   :  { %2962 = vmatpush3.bf16.xpose.msra.mxu0 %v628_v28  ;;  %859 = vrot.lane.b32.xlu1 %v566_v27, %s3678_s6 }
 0x4b4   :  { %3203 = vmatprep.subr.msk.bf16.mxu0 %vm334_vm5, %v587_v13  ;;  %851 = vrot.lane.b32.xlu0 %v562_v29, %s3678_s6  ;;  %v320_v13 = vld [vmem:[%s4781_s21 + $0x20] sm:$0xff] }
 0x4bb   :  { %2964 = vmatpush3.bf16.xpose.msra.mxu0 %v631_v30 }
 0x4bc   :  { %3204 = vmatprep.subr.msk.bf16.mxu0 %vm334_vm5, %v589_v12  ;;  %v322_v12 = vld [vmem:[%s4781_s21 + $0x30] sm:$0xff] }
 0x4c3   :  { %2966 = vmatpush3.bf16.xpose.msra.mxu0 %v634_v33 }
 0x4c4   :  { %3205 = vmatprep.subr.msk.bf16.mxu0 %vm334_vm5, %v591_v16 }
 0x4cb   :  { %2968 = vmatpush3.bf16.xpose.msra.mxu0 %v637_v34  ;;  %v326_v34 = vld [vmem:[%s4781_s21 + $0x50] sm:$0xff] }
 0x4cc   :  { %3206 = vmatprep.subr.msk.bf16.mxu0 %vm334_vm5, %v593_v15 }
 0x4d3   :  { %2970 = vmatpush3.bf16.xpose.msra.mxu0 %v640_v35 }
 0x4da   :  { %2972 = vmatmul.mubr.msk.bf16.vlgmr.msra.gmra.mrb[4].mxu0 %vm334_vm5, %v519_v36 }
 0x4db   :  { %2975 = vmatprep.mubr.msk.bf16.mxu0 %vm334_vm5, %v520_v37 }
 0x4e2   :  { %2976 = vmatmul.mubr.msk.bf16.gmra.mrb[8].mxu0 %vm334_vm5, %v521_v38 }
 0x4e3   :  { %2979 = vmatprep.mubr.msk.bf16.mxu0 %vm334_vm5, %v522_v41 }
 0x4ea   :  { %2980 = vmatmul.mubr.msk.bf16.gmra.mrb[12].mxu0 %vm334_vm5, %v523_v42 }
 0x4eb   :  { %2983 = vmatprep.mubr.msk.bf16.mxu0 %vm334_vm5, %v524_v43 }
 0x4f2   :  { %2984 = vmatmul.mubr.msk.bf16.gmra.mrb[16].mxu0 %vm334_vm5, %v525_v39 }
 0x51d   :  { %v858_v47 = vpop.permute.xlu1 %857 }
 0x51e   :  { %v854_v40 = vpop.permute.xlu0 %853 }
 0x521   :  { %v856_v49 = vpop.permute.xlu1 %855 }
 0x522   :  { %v862_v45 = vpop.permute.xlu0 %861 }
 0x525   :  { %v860_v50 = vpop.permute.xlu1 %859 }
 0x526   :  { %v852_v48 = vpop.permute.xlu0 %851 }
 0x527   :  { %2987 = vmatprep.subr.bf16.mxu1 %v852_v48 }
 0x528   :  { %2988 = vmatpush3.bf16.msra.mxu1 %v852_v48 }
 0x529   :  { %2989 = vmatprep.subr.bf16.mxu1 %v854_v40 }
 0x52c   :  { %2990 = vmatpush3.bf16.msra.mxu1 %v854_v40  ;;  %v325_v40 = vld [vmem:[%s4781_s21 + $0x48] sm:$0xff] }
 0x52d   :  { %2991 = vmatprep.subr.bf16.mxu1 %v856_v49 }
 0x530   :  { %2992 = vmatpush3.bf16.msra.mxu1 %v856_v49 }
 0x531   :  { %2993 = vmatprep.subr.bf16.mxu1 %v858_v47 }
 0x534   :  { %2994 = vmatpush3.bf16.msra.mxu1 %v858_v47 }
 0x535   :  { %2995 = vmatprep.subr.bf16.mxu1 %v860_v50 }
 0x538   :  { %2996 = vmatpush3.bf16.msra.mxu1 %v860_v50 }
 0x539   :  { %2997 = vmatprep.subr.bf16.mxu1 %v862_v45 }
 0x53c   :  { %2998 = vmatpush3.bf16.msra.mxu1 %v862_v45 }
 0x5ad   :  { %v2973_v55 = vpop.f32.mrb[4].mxu0 }
 0x5ae   :  { %v685_v58 = vadd.f32 %v2973_v55, %v318_v52  ;;  %v676_v60 = vpop.f32.mrb[5].mxu0 }
 0x5af   :  { %v677_v62 = vadd.f32 %v676_v60, %v316_v53  ;;  %v2974_v0 = vpop.f32.mrb[6].mxu0 }
 0x5b0   :  { %v743_v1 = vmul.f32 1.442695, %v685_v58  ;;  %v688_v5 = vadd.f32 %v2974_v0, %v319_v57  ;;  %v679_v7 = vpop.f32.mrb[7].mxu0 }
 0x5b1   :  { %v739_v8 = vmul.f32 1.442695, %v677_v62  ;;  %v680_v9 = vadd.f32 %v679_v7, %v317_v61  ;;  %v324_v7 = vld [vmem:[%s4781_s21 + $0x40] sm:$0xff] }
 0x5b2   :  { %3274 = vpow2.f32 %v743_v1  ;;  %v745_v10 = vmul.f32 1.442695, %v688_v5  ;;  %v568_v5 = vmul.bf16 %v4133_v44, %v4029_v51  ;;  %v330_v51 = vld [vmem:[%s4781_s21 + $0x70] sm:$0xff] }
 0x5b3   :  { %3276 = vpow2.f32 %v739_v8  ;;  %v741_v11 = vmul.f32 1.442695, %v680_v9  ;;  %v569_v8 = vmul.bf16 %v4133_v44, %v4027_v54  ;;  %v328_v54 = vld [vmem:[%s4781_s21 + $0x60] sm:$0xff] }
 0x5b5   :  { %3278 = vpow2.f32 %v741_v11  ;;  %v2977_v14 = vpop.f32.mrb[8].mxu0 }
 0x5b6   :  { %v701_v15 = vadd.f32 %v2977_v14, %v322_v12  ;;  %v692_v16 = vpop.f32.mrb[9].mxu0  ;;  %3280 = vpow2.f32 %v745_v10  ;;  %v327_v10 = vld [vmem:[%s4781_s21 + $0x58] sm:$0xff] }
 0x5b7   :  { %v693_v20 = vadd.f32 %v692_v16, %v320_v13  ;;  %v2978_v25 = vpop.f32.mrb[10].mxu0 }
 0x5b8   :  { %v751_v26 = vmul.f32 1.442695, %v701_v15  ;;  %v695_v27 = vpop.f32.mrb[11].mxu0  ;;  %v704_v30 = vadd.f32 %v2978_v25, %v323_v21  ;;  %v331_v25 = vld [vmem:[%s4781_s21 + $0x78] sm:$0xff] }
 0x5b9   :  { %v696_v28 = vadd.f32 %v695_v27, %v321_v19  ;;  %v747_v29 = vmul.f32 1.442695, %v693_v20  ;;  %v329_v19 = vld [vmem:[%s4781_s21 + $0x68] sm:$0xff] }
 0x5ba   :  { %3282 = vpow2.f32 %v751_v26  ;;  %v753_v38 = vmul.f32 1.442695, %v704_v30 }
 0x5bb   :  { %v749_v33 = vmul.f32 1.442695, %v696_v28 }
 0x5bc   :  { %v4162_v35 = vpop.eup %3274 }
 0x5bd   :  { %v4164_v36 = vpop.eup %3276  ;;  %3284 = vpow2.f32 %v749_v33  ;;  %v2981_v37 = vpop.f32.mrb[12].mxu0  ;;  %775 = vadd.xlane.f32.xlu0 %v4162_v35 }
 0x5be   :  { %3286 = vpow2.f32 %v747_v29  ;;  %v717_v41 = vadd.f32 %v2981_v37, %v326_v34  ;;  %v708_v42 = vpop.f32.mrb[13].mxu0  ;;  %771 = vadd.xlane.f32.xlu1 %v4164_v36 }
 0x5bf   :  { %v4168_v43 = vpop.eup %3278  ;;  %v2982_v39 = vpop.f32.mrb[14].mxu0  ;;  %3288 = vpow2.f32 %v753_v38  ;;  %v709_v9 = vadd.f32 %v708_v42, %v324_v7 }
 0x5c0   :  { %v711_v45 = vpop.f32.mrb[15].mxu0  ;;  %v4173_v47 = vpop.eup %3280  ;;  %v759_v48 = vmul.f32 1.442695, %v717_v41  ;;  %v720_v12 = vadd.f32 %v2982_v39, %v327_v10 }
 0x5c1   :  { %773 = vadd.xlane.f32.xlu0 %v4168_v43  ;;  %v712_v49 = vadd.f32 %v711_v45, %v325_v40  ;;  %v755_v11 = vmul.f32 1.442695, %v709_v9 }
 0x5c2   :  { %777 = vadd.xlane.f32.xlu1 %v4173_v47  ;;  %3290 = vpow2.f32 %v759_v48  ;;  %v761_v13 = vmul.f32 1.442695, %v720_v12 }
 0x5c3   :  { %v757_v53 = vmul.f32 1.442695, %v712_v49 }
 0x5c4   :  { %v4177_v50 = vpop.eup %3282 }
 0x5c5   :  { %v2985_v52 = vpop.f32.mrb[16].mxu0  ;;  %783 = vadd.xlane.f32.xlu0 %v4177_v50  ;;  %3292 = vpow2.f32 %v757_v53 }
 0x5c6   :  { %v724_v55 = vpop.f32.mrb[17].mxu0  ;;  %3294 = vpow2.f32 %v755_v11  ;;  %v733_v14 = vadd.f32 %v2985_v52, %v330_v51 }
 0x5c7   :  { %v4180_v57 = vpop.eup %3284  ;;  %v2986_v58 = vpop.f32.mrb[18].mxu0  ;;  %3296 = vpow2.f32 %v761_v13  ;;  %v725_v16 = vadd.f32 %v724_v55, %v328_v54 }
 0x5c8   :  { %v4182_v60 = vpop.eup %3286  ;;  %v727_v61 = vpop.f32.mrb[19].mxu0  ;;  %781 = vadd.xlane.f32.xlu1 %v4180_v57  ;;  %v767_v15 = vmul.f32 1.442695, %v733_v14  ;;  %v736_v27 = vadd.f32 %v2986_v58, %v331_v25  ;;  %v3238_v14 = vld [vmem:[#allocation9] sm:$0xff]  }
 0x5c9   :  { %779 = vadd.xlane.f32.xlu0 %v4182_v60  ;;  %v4186_v62 = vpop.eup %3288  ;;  %v763_v20 = vmul.f32 1.442695, %v725_v16  ;;  %v728_v21 = vadd.f32 %v727_v61, %v329_v19  ;;  %v3239_v19 = vld [vmem:[#allocation9 + $0x8] sm:$0xff]  }
 0x5ca   :  { %3298 = vpow2.f32 %v767_v15  ;;  %v769_v30 = vmul.f32 1.442695, %v736_v27 }
 0x5cb   :  { %3300 = vpow2.f32 %v763_v20  ;;  %v765_v28 = vmul.f32 1.442695, %v728_v21 }
 0x5cc   :  { %v4189_v0 = vpop.eup %3290 }
 0x5cd   :  { %785 = vadd.xlane.f32.xlu0 %v4186_v62  ;;  %3302 = vpow2.f32 %v765_v28 }
 0x5ce   :  { %3304 = vpow2.f32 %v769_v30 }
 0x5cf   :  { %v4192_v1 = vpop.eup %3292 }
 0x5d0   :  { %v4219_v26 = vpop.eup %3294 }
 0x5d1   :  { %791 = vadd.xlane.f32.xlu0 %v4189_v0  ;;  %v4222_v29 = vpop.eup %3296 }
 0x5d4   :  { %v4225_v33 = vpop.eup %3298 }
 0x5d5   :  { %789 = vadd.xlane.f32.xlu0 %v4192_v1  ;;  %v4228_v34 = vpop.eup %3300 }
 0x5d7   :  { %v4231_v37 = vpop.eup %3302 }
 0x5d8   :  { %v4234_v38 = vpop.eup %3304 }
 0x5d9   :  { %863 = vrot.lane.b32.xlu1 %v568_v5, %s3678_s6 }
 0x5eb   :  { %865 = vrot.lane.b32.xlu0 %v569_v8, %s3678_s6 }
 0x5fd   :  { %787 = vadd.xlane.f32.xlu1 %v4219_v26 }
 0x601   :  { %793 = vadd.xlane.f32.xlu1 %v4222_v29 }
 0x605   :  { %799 = vadd.xlane.f32.xlu1 %v4225_v33 }
 0x609   :  { %795 = vadd.xlane.f32.xlu1 %v4228_v34 }
 0x60d   :  { %797 = vadd.xlane.f32.xlu1 %v4231_v37 }
 0x611   :  { %801 = vadd.xlane.f32.xlu1 %v4234_v38 }
 0x64a   :  { %v776_v41 = vpop.xlane.xlu0 %775 }
 0x64b   :  { %v772_v42 = vpop.xlane.xlu1 %771 }
 0x64c   :  { %3306 = vrcp.f32 %v772_v42 }
 0x64e   :  { %v774_v39 = vpop.xlane.xlu0 %773 }
 0x64f   :  { %3308 = vrcp.f32 %v774_v39  ;;  %v778_v40 = vpop.xlane.xlu1 %777 }
 0x650   :  { %3310 = vrcp.f32 %v778_v40 }
 0x652   :  { %v784_v45 = vpop.xlane.xlu0 %783 }
 0x655   :  { %v782_v48 = vpop.xlane.xlu1 %781 }
 0x656   :  { %v780_v49 = vpop.xlane.xlu0 %779  ;;  %v3307_v52 = vpop.eup %3306  ;;  %3312 = vrcp.f32 %v782_v48 }
 0x657   :  { %3314 = vrcp.f32 %v780_v49  ;;  %v819_v61 = vmul.f32 %v3307_v52, %v4164_v36 }
 0x658   :  { %3316 = vrcp.f32 %v776_v41 }
 0x659   :  { %v3309_v53 = vpop.eup %3308  ;;  %v864_v55 = vpop.permute.xlu1 %863 }
 0x65a   :  { %2999 = vmatprep.subr.bf16.mxu1 %v864_v55  ;;  %v786_v58 = vpop.xlane.xlu0 %785  ;;  %v820_v5 = vmul.f32 %v3309_v53, %v4168_v43  ;;  %v3311_v9 = vpop.eup %3310 }
 0x65b   :  { %3000 = vmatpush3.bf16.msra.mxu1 %v864_v55  ;;  %3318 = vrcp.f32 %v786_v58  ;;  %v822_v13 = vmul.f32 %v3311_v9, %v4173_v47 }
 0x65c   :  { %v835_v7 = vpack.c.bf16 %v820_v5, %v819_v61  ;;  %3320 = vrcp.f32 %v784_v45 }
 0x65e   :  { %3003 = vmatprep.mubr.bf16.mxu1 %v835_v7  ;;  %v792_v8 = vpop.xlane.xlu0 %791 }
 0x660   :  { %v3313_v10 = vpop.eup %3312 }
 0x661   :  { %v3315_v12 = vpop.eup %3314  ;;  %v824_v36 = vmul.f32 %v3313_v10, %v4180_v57 }
 0x662   :  { %v790_v11 = vpop.xlane.xlu0 %789  ;;  %v3317_v51 = vpop.eup %3316  ;;  %v823_v15 = vmul.f32 %v3315_v12, %v4182_v60 }
 0x663   :  { %v821_v43 = vmul.f32 %v3317_v51, %v4162_v35  ;;  %3322 = vrcp.f32 %v790_v11 }
 0x664   :  { %v837_v20 = vpack.c.bf16 %v824_v36, %v823_v15 }
 0x665   :  { %v836_v16 = vpack.c.bf16 %v822_v13, %v821_v43  ;;  %v3319_v47 = vpop.eup %3318 }
 0x666   :  { %v866_v54 = vpop.permute.xlu0 %865  ;;  %v3321_v21 = vpop.eup %3320  ;;  %v826_v25 = vmul.f32 %v3319_v47, %v4186_v62 }
 0x667   :  { %3001 = vmatprep.subr.bf16.mxu1 %v866_v54  ;;  %v825_v60 = vmul.f32 %v3321_v21, %v4177_v50 }
 0x668   :  { %3002 = vmatpush3.bf16.msra.mxu1 %v866_v54 }
 0x669   :  { %3019 = vmatprep.subr.bf16.mxu1 %v3238_v14  ;;  %v838_v57 = vpack.c.bf16 %v826_v25, %v825_v60 }
 0x66b   :  { %3004 = vmatmul.mubr.bf16.vlgmr.msra.gmra.mrb[4].mxu1 %v836_v16 }
 0x66c   :  { %3007 = vmatprep.mubr.bf16.mxu1 %v837_v20  ;;  %3020 = vmatpush3.bf16.msra.mxu1 %v3238_v14 }
 0x66d   :  { %3021 = vmatprep.subr.bf16.mxu1 %v3239_v19  ;;  %v3323_v30 = vpop.eup %3322 }
 0x66e   :  { %v828_v40 = vmul.f32 %v3323_v30, %v4192_v1 }
 0x670   :  { %3022 = vmatpush3.bf16.msra.mxu1 %v3239_v19 }
 0x677   :  { %3008 = vmatmul.mubr.bf16.gmra.mrb[4].mxu1 %v838_v57 }
 0x68a   :  { %v788_v35 = vpop.xlane.xlu1 %787 }
 0x68b   :  { %3324 = vrcp.f32 %v788_v35 }
 0x68c   :  { %3326 = vrcp.f32 %v792_v8 }
 0x68e   :  { %v794_v27 = vpop.xlane.xlu1 %793 }
 0x68f   :  { %3328 = vrcp.f32 %v794_v27 }
 0x692   :  { %v800_v28 = vpop.xlane.xlu1 %799 }
 0x695   :  { %v3325_v41 = vpop.eup %3324 }
 0x696   :  { %v796_v42 = vpop.xlane.xlu1 %795  ;;  %v827_v39 = vmul.f32 %v3325_v41, %v4219_v26  ;;  %v3327_v45 = vpop.eup %3326 }
 0x697   :  { %3330 = vrcp.f32 %v796_v42  ;;  %v829_v49 = vmul.f32 %v3327_v45, %v4189_v0 }
 0x698   :  { %v839_v62 = vpack.c.bf16 %v828_v40, %v827_v39 }
 0x699   :  { %v3329_v48 = vpop.eup %3328 }
 0x69a   :  { %v798_v50 = vpop.xlane.xlu1 %797  ;;  %3011 = vmatprep.mubr.bf16.mxu1 %v839_v62  ;;  %v830_v52 = vmul.f32 %v3329_v48, %v4222_v29 }
 0x69b   :  { %3332 = vrcp.f32 %v798_v50 }
 0x69c   :  { %v840_v53 = vpack.c.bf16 %v830_v52, %v829_v49  ;;  %3334 = vrcp.f32 %v800_v28 }
 0x69e   :  { %v802_v55 = vpop.xlane.xlu1 %801  ;;  %3012 = vmatmul.mubr.bf16.gmra.mrb[4].mxu1 %v840_v53 }
 0x69f   :  { %3336 = vrcp.f32 %v802_v55 }
 0x6a1   :  { %v3331_v58 = vpop.eup %3330 }
 0x6a2   :  { %v831_v1 = vmul.f32 %v3331_v58, %v4228_v34  ;;  %v2732_v34 = vld [vmem:[#allocation10] ss:$0 sm:$0xff] }
 0x6a5   :  { %v3333_v26 = vpop.eup %3332 }
 0x6a6   :  { %v832_v61 = vmul.f32 %v3333_v26, %v4231_v37  ;;  %v3335_v5 = vpop.eup %3334  ;;  %v3240_v26 = vld [vmem:[#allocation13] sm:$0xff]  }
 0x6a7   :  { %v833_v0 = vmul.f32 %v3335_v5, %v4225_v33  ;;  %3027 = vmatprep.subr.bf16.mxu1 %v3240_v26 }
 0x6a8   :  { %v841_v7 = vpack.c.bf16 %v832_v61, %v831_v1  ;;  %v3241_v1 = vld [vmem:[#allocation13 + $0x8] sm:$0xff]  }
 0x6a9   :  { %v3337_v8 = vpop.eup %3336 }
 0x6aa   :  { %3015 = vmatprep.mubr.bf16.mxu1 %v841_v7  ;;  %v834_v29 = vmul.f32 %v3337_v8, %v4234_v38 }
 0x6ac   :  { %v842_v9 = vpack.c.bf16 %v834_v29, %v833_v0 }
 0x6ae   :  { %3016 = vmatmul.mubr.bf16.gmra.mrb[4].mxu1 %v842_v9 }
 0x781   :  { %v3017_v10 = vpop.f32.mrb[4].mxu1 }
 0x782   :  { %v957_v11 = vpop.f32.mrb[5].mxu1 }
 0x783   :  { %v3018_v12 = vpop.f32.mrb[6].mxu1 }
 0x784   :  { %v985_v51 = vpack.c.bf16 %v3018_v12, %v3017_v10  ;;  %v960_v13 = vpop.f32.mrb[7].mxu1 }
 0x785   :  { %v984_v14 = vpack.c.bf16 %v960_v13, %v957_v11 }
 0x787   :  { %3023 = vmatprep.mubr.msk.bf16.mxu1 %vm334_vm5, %v984_v14 }
 0x788   :  { %3024 = vmatmul.mubr.msk.bf16.vlgmr.msra.gmra.mrb[8].mxu1 %vm334_vm5, %v985_v51 }
 0x789   :  { %3028 = vmatpush3.bf16.msra.mxu1 %v3240_v26 }
 0x78a   :  { %3029 = vmatprep.subr.bf16.mxu1 %v3241_v1 }
 0x78d   :  { %3030 = vmatpush3.bf16.msra.mxu1 %v3241_v1 }
 0x85b   :  { %v3025_v37 = vpop.f32.mrb[8].mxu1 }
 0x85c   :  { %v1058_v54 = vadd.f32 %v3025_v37, %v2732_v34  ;;  %v1049_v15 = vpop.f32.mrb[9].mxu1 }
 0x85d   :  { %v1050_v36 = vadd.f32 %v2732_v34, %v1049_v15  ;;  %v3026_v33 = vpop.f32.mrb[10].mxu1  ;;  %v2737_v15 = vld [vmem:[#allocation12] ss:$0 sm:$0xff] }
 0x85e   :  { %v4256_v38 = vadd.f32 %v1058_v54, %v3961_v31  ;;  %v1052_v43 = vpop.f32.mrb[11].mxu1  ;;  %v1061_v47 = vadd.f32 %v3026_v33, %v2732_v34 }
 0x85f   :  { %v4259_v16 = vadd.f32 %v1050_v36, %v3949_v24  ;;  %v1053_v19 = vadd.f32 %v2732_v34, %v1052_v43 }
 0x860   :  { %v1076_v20 = vsel %vm334_vm5, %v4256_v38, 0.0  ;;  %v4269_v31 = vadd.f32 %v1061_v47, %v3963_v32  ;;  %v2738_v47 = vld [vmem:[%s4751_s12] ss:$0 sm:$0xff] }
 0x861   :  { %v4264_v21 = vadd.f32 %v1053_v19, %v3947_v22  ;;  %1077 = vadd.xlane.f32.xlu0 %v1076_v20  ;;  %v1070_v25 = vsel %vm334_vm5, %v4259_v16, 0.0 }
 0x862   :  { %1071 = vadd.xlane.f32.xlu1 %v1070_v25  ;;  %v1079_v60 = vsel %vm334_vm5, %v4269_v31, 0.0 }
 0x863   :  { %v1073_v24 = vsel %vm334_vm5, %v4264_v21, 0.0 }
 0x866   :  { %1074 = vadd.xlane.f32.xlu1 %v1073_v24 }
 0x86a   :  { %1080 = vadd.xlane.f32.xlu1 %v1079_v60 }
 0x8ee   :  { %v1078_v57 = vpop.xlane.xlu0 %1077 }
 0x8ef   :  { %v1084_v35 = vmul.f32 0.03125, %v1078_v57  ;;  %v1072_v22 = vpop.xlane.xlu1 %1071 }
 0x8f0   :  { %v1082_v27 = vmul.f32 0.03125, %v1072_v22 }
 0x8f1   :  { %v1088_v28 = vsub.f32 %v4256_v38, %v1084_v35 }
 0x8f2   :  { %v1086_v30 = vsub.f32 %v4259_v16, %v1082_v27 }
 0x8f3   :  { %v1075_v41 = vpop.xlane.xlu1 %1074  ;;  %v1092_v42 = vmul.f32 %v1088_v28, %v1088_v28 }
 0x8f4   :  { %v1083_v32 = vmul.f32 0.03125, %v1075_v41  ;;  %v1090_v40 = vmul.f32 %v1086_v30, %v1086_v30 }
 0x8f5   :  { %v1100_v39 = vsel %vm334_vm5, %v1092_v42, 0.0  ;;  %v3243_v42 = vld [vmem:[%s4754_s15 + $0x8] sm:$0xff]  }
 0x8f6   :  { %v1087_v45 = vsub.f32 %v4264_v21, %v1083_v32  ;;  %1101 = vadd.xlane.f32.xlu1 %v1100_v39  ;;  %v1094_v50 = vsel %vm334_vm5, %v1090_v40, 0.0  ;;  %v3244_v32 = vld [vmem:[%s4754_s15 + $0x10] sm:$0xff]   ;;  %v3245_v39 = vld [vmem:[%s4754_s15 + $0x18] sm:$0xff]   ;;  %v3246_v40 = vld [vmem:[%s4754_s15 + $0x20] sm:$0xff]  }
 0x8f7   :  { %v1081_v62 = vpop.xlane.xlu1 %1080 }
 0x8f8   :  { %v1085_v48 = vmul.f32 0.03125, %v1081_v62  ;;  %v1091_v49 = vmul.f32 %v1087_v45, %v1087_v45  ;;  %v3248_v62 = vld [vmem:[%s4754_s15 + $0x30] sm:$0xff]  }
 0x8fa   :  { %v1089_v52 = vsub.f32 %v4269_v31, %v1085_v48  ;;  %1095 = vadd.xlane.f32.xlu1 %v1094_v50  ;;  %v1097_v53 = vsel %vm334_vm5, %v1091_v49, 0.0  ;;  %v3249_v48 = vld [vmem:[%s4754_s15 + $0x38] sm:$0xff]   ;;  %v2739_v50 = vld [vmem:[%s4753_s14] ss:$0 sm:$0xff] }
 0x8fc   :  { %v1093_v55 = vmul.f32 %v1089_v52, %v1089_v52 }
 0x8fe   :  { %1098 = vadd.xlane.f32.xlu1 %v1097_v53  ;;  %v1103_v58 = vsel %vm334_vm5, %v1093_v55, 0.0 }
 0x902   :  { %1104 = vadd.xlane.f32.xlu1 %v1103_v58 }
 0x983   :  { %v1102_v61 = vpop.xlane.xlu1 %1101 }
 0x984   :  { %v1108_v5 = vmul.f32 0.03125, %v1102_v61 }
 0x986   :  { %v1112_v0 = vadd.f32 1e-05, %v1108_v5 }
 0x987   :  { %v1096_v7 = vpop.xlane.xlu1 %1095 }
 0x988   :  { %v1106_v8 = vmul.f32 0.03125, %v1096_v7 }
 0x98a   :  { %v1110_v29 = vadd.f32 1e-05, %v1106_v8 }
 0x98b   :  { %v1099_v9 = vpop.xlane.xlu1 %1098 }
 0x98c   :  { %3338 = vrsqrt.f32 %v1110_v29  ;;  %v1107_v10 = vmul.f32 0.03125, %v1099_v9 }
 0x98d   :  { %3340 = vrsqrt.f32 %v1112_v0 }
 0x98e   :  { %v1111_v11 = vadd.f32 1e-05, %v1107_v10 }
 0x98f   :  { %v1105_v12 = vpop.xlane.xlu1 %1104 }
 0x990   :  { %3342 = vrsqrt.f32 %v1111_v11  ;;  %v1109_v51 = vmul.f32 0.03125, %v1105_v12 }
 0x992   :  { %v1113_v13 = vadd.f32 1e-05, %v1109_v51 }
 0x994   :  { %3344 = vrsqrt.f32 %v1113_v13 }
 0x996   :  { %v3339_v14 = vpop.eup %3338 }
 0x997   :  { %v1118_v34 = vmul.f32 %v3339_v14, %v1086_v30  ;;  %v3341_v37 = vpop.eup %3340 }
 0x998   :  { %v1120_v36 = vmul.f32 %v3341_v37, %v1088_v28  ;;  %v3242_v28 = vld [vmem:[%s4754_s15] sm:$0xff]  }
 0x999   :  { %v1128_v43 = vmul.f32 %v2737_v15, %v1118_v34  ;;  %3035 = vmatprep.subr.bf16.mxu0 %v3242_v28 }
 0x99a   :  { %v3343_v54 = vpop.eup %3342  ;;  %v1130_v25 = vmul.f32 %v2737_v15, %v1120_v36  ;;  %3036 = vmatpush3.bf16.msra.mxu0 %v3242_v28 }
 0x99b   :  { %v1119_v33 = vmul.f32 %v3343_v54, %v1087_v45  ;;  %v1138_v60 = vadd.f32 %v2738_v47, %v1128_v43  ;;  %3037 = vmatprep.subr.bf16.mxu0 %v3243_v42  ;;  %v3247_v45 = vld [vmem:[%s4754_s15 + $0x28] sm:$0xff]  }
 0x99c   :  { %v1140_v27 = vadd.f32 %v2738_v47, %v1130_v25 }
 0x99d   :  { %v1129_v19 = vmul.f32 %v2737_v15, %v1119_v33 }
 0x99e   :  { %v3345_v20 = vpop.eup %3344  ;;  %3038 = vmatpush3.bf16.msra.mxu0 %v3243_v42 }
 0x99f   :  { %v1121_v24 = vmul.f32 %v3345_v20, %v1089_v52  ;;  %v1139_v57 = vadd.f32 %v2738_v47, %v1129_v19  ;;  %3039 = vmatprep.subr.bf16.mxu0 %v3244_v32 }
 0x9a1   :  { %v1131_v35 = vmul.f32 %v2737_v15, %v1121_v24  ;;  %v1142_v22 = vpack.c.bf16 %v1139_v57, %v1138_v60 }
 0x9a2   :  { %3040 = vmatpush3.bf16.msra.mxu0 %v3244_v32 }
 0x9a3   :  { %3031 = vmatprep.mubr.msk.bf16.mxu1 %vm334_vm5, %v1142_v22  ;;  %v1141_v30 = vadd.f32 %v2738_v47, %v1131_v35  ;;  %3041 = vmatprep.subr.bf16.mxu0 %v3245_v39 }
 0x9a5   :  { %v1143_v41 = vpack.c.bf16 %v1141_v30, %v1140_v27 }
 0x9a6   :  { %3042 = vmatpush3.bf16.msra.mxu0 %v3245_v39 }
 0x9a7   :  { %3032 = vmatmul.mubr.msk.bf16.vlgmr.msra.gmra.mrb[12].mxu1 %vm334_vm5, %v1143_v41  ;;  %3043 = vmatprep.subr.bf16.mxu0 %v3246_v40 }
 0x9aa   :  { %3044 = vmatpush3.bf16.msra.mxu0 %v3246_v40 }
 0x9ab   :  { %3045 = vmatprep.subr.bf16.mxu0 %v3247_v45 }
 0x9ae   :  { %3046 = vmatpush3.bf16.msra.mxu0 %v3247_v45 }
 0x9af   :  { %3047 = vmatprep.subr.bf16.mxu0 %v3248_v62 }
 0x9b2   :  { %3048 = vmatpush3.bf16.msra.mxu0 %v3248_v62 }
 0x9b3   :  { %3049 = vmatprep.subr.bf16.mxu0 %v3249_v48 }
 0x9b6   :  { %3050 = vmatpush3.bf16.msra.mxu0 %v3249_v48 }
 0xa7a   :  { %v3033_v49 = vpop.f32.mrb[12].mxu1 }
 0xa7b   :  { %v4315_v52 = vadd.f32 %v3033_v49, %v2739_v50  ;;  %v1207_v53 = vpop.f32.mrb[13].mxu1 }
 0xa7c   :  { %v4317_v55 = vadd.f32 %v2739_v50, %v1207_v53  ;;  %v3034_v58 = vpop.f32.mrb[14].mxu1 }
 0xa7d   :  { %v4320_v26 = vmul.f32 0.70710677, %v4315_v52  ;;  %v4322_v1 = vadd.f32 %v3034_v58, %v2739_v50  ;;  %v1210_v61 = vpop.f32.mrb[15].mxu1 }
 0xa7e   :  { %v4325_v5 = vmul.f32 0.70710677, %v4317_v55  ;;  %v4331_v0 = vadd.f32 %v2739_v50, %v1210_v61 }
 0xa7f   :  { %v1240_v7 = vand.u32 2147483647, %v4320_v26  ;;  %v4329_v8 = vmul.f32 0.70710677, %v4322_v1  ;;  %vm1232_vm6 = vcmp.ge.f32.partialorder %v4320_v26, 0.0 }
 0xa80   :  { %v1238_v29 = vand.u32 2147483647, %v4325_v5  ;;  %v4336_v51 = vmul.f32 0.70710677, %v4331_v0  ;;  %vm1230_vm7 = vcmp.ge.f32.partialorder %v4325_v5, 0.0 }
 0xa81   :  { %v1244_v9 = vmul.f32 0.3275911, %v1240_v7  ;;  %v1241_v11 = vand.u32 2147483647, %v4329_v8  ;;  %v1296_v36 = vsub.f32 0.0, %v1240_v7  ;;  %vm1233_vm8 = vcmp.ge.f32.partialorder %v4329_v8, 0.0 }
 0xa82   :  { %v1242_v10 = vmul.f32 0.3275911, %v1238_v29  ;;  %v1239_v34 = vand.u32 2147483647, %v4336_v51  ;;  %v1294_v33 = vsub.f32 0.0, %v1238_v29  ;;  %vm1231_vm9 = vcmp.ge.f32.partialorder %v4336_v51, 0.0 }
 0xa83   :  { %v1248_v12 = vadd.f32 1.0, %v1244_v9  ;;  %v1245_v14 = vmul.f32 0.3275911, %v1241_v11  ;;  %v1300_v19 = vmul.f32 %v1296_v36, %v1240_v7  ;;  %v1297_v20 = vsub.f32 0.0, %v1241_v11 }
 0xa84   :  { %v1246_v13 = vadd.f32 1.0, %v1242_v10  ;;  %v1243_v54 = vmul.f32 0.3275911, %v1239_v34  ;;  %v1298_v24 = vmul.f32 %v1294_v33, %v1238_v29  ;;  %v1295_v57 = vsub.f32 0.0, %v1239_v34 }
 0xa85   :  { %3346 = vrcp.f32 %v1248_v12  ;;  %v1249_v37 = vadd.f32 1.0, %v1245_v14  ;;  %v1306_v27 = vmul.f32 1.442695, %v1300_v19  ;;  %v1301_v41 = vmul.f32 %v1297_v20, %v1241_v11 }
 0xa86   :  { %3348 = vrcp.f32 %v1246_v13  ;;  %v1247_v15 = vadd.f32 1.0, %v1243_v54  ;;  %v1302_v42 = vmul.f32 1.442695, %v1298_v24  ;;  %v1299_v45 = vmul.f32 %v1295_v57, %v1239_v34 }
 0xa87   :  { %3350 = vrcp.f32 %v1249_v37  ;;  %v1308_v53 = vmul.f32 1.442695, %v1301_v41  ;;  %v1223_v51 = vmul.f32 0.5, %v4331_v0 }
 0xa88   :  { %3352 = vrcp.f32 %v1247_v15  ;;  %v1304_v9 = vmul.f32 1.442695, %v1299_v45 }
 0xa89   :  { %3354 = vpow2.f32 %v1306_v27 }
 0xa8a   :  { %3356 = vpow2.f32 %v1302_v42 }
 0xa8b   :  { %3358 = vpow2.f32 %v1308_v53 }
 0xa8c   :  { %3360 = vpow2.f32 %v1304_v9 }
 0xa8f   :  { %v3347_v43 = vpop.eup %3346 }
 0xa90   :  { %v3349_v47 = vpop.eup %3348  ;;  %v1260_v25 = vmul.f32 1.0614054, %v3347_v43 }
 0xa91   :  { %v1258_v60 = vmul.f32 1.0614054, %v3349_v47  ;;  %v3351_v22 = vpop.eup %3350 }
 0xa92   :  { %v1264_v35 = vadd.f32 -1.4531521, %v1260_v25  ;;  %v1261_v32 = vmul.f32 1.0614054, %v3351_v22  ;;  %v3353_v39 = vpop.eup %3352 }
 0xa93   :  { %v1262_v30 = vadd.f32 -1.4531521, %v1258_v60  ;;  %v1259_v50 = vmul.f32 1.0614054, %v3353_v39  ;;  %v3355_v60 = vpop.eup %3354 }
 0xa94   :  { %v1268_v28 = vmul.f32 %v3347_v43, %v1264_v35  ;;  %v1265_v48 = vadd.f32 -1.4531521, %v1261_v32  ;;  %v3357_v35 = vpop.eup %3356 }
 0xa95   :  { %v1266_v40 = vmul.f32 %v3349_v47, %v1262_v30  ;;  %v1263_v7 = vadd.f32 -1.4531521, %v1259_v50  ;;  %v3359_v45 = vpop.eup %3358 }
 0xa96   :  { %v1272_v62 = vadd.f32 1.4214138, %v1268_v28  ;;  %v1269_v61 = vmul.f32 %v3351_v22, %v1265_v48  ;;  %v3361_v26 = vpop.eup %3360 }
 0xa97   :  { %v1270_v49 = vadd.f32 1.4214138, %v1266_v40  ;;  %v1267_v12 = vmul.f32 %v3353_v39, %v1263_v7 }
 0xa98   :  { %v1276_v58 = vmul.f32 %v3347_v43, %v1272_v62  ;;  %v1273_v11 = vadd.f32 1.4214138, %v1269_v61  ;;  %v3686_v62 = vmov -1.0  }
 0xa99   :  { %v1274_v29 = vmul.f32 %v3349_v47, %v1270_v49  ;;  %v1271_v34 = vadd.f32 1.4214138, %v1267_v12  ;;  %v1234_v53 = vsel %vm1230_vm7, 1.0, %v3686_v62 }
 0xa9a   :  { %v1280_v10 = vadd.f32 -0.28449672, %v1276_v58  ;;  %v1277_v37 = vmul.f32 %v3351_v22, %v1273_v11  ;;  %v1235_v11 = vsel %vm1231_vm9, 1.0, %v3686_v62 }
 0xa9b   :  { %v1278_v13 = vadd.f32 -0.28449672, %v1274_v29  ;;  %v1275_v33 = vmul.f32 %v3353_v39, %v1271_v34 }
 0xa9c   :  { %v1284_v14 = vmul.f32 %v3347_v43, %v1280_v10  ;;  %v1281_v36 = vadd.f32 -0.28449672, %v1277_v37  ;;  %v1224_v10 = vmul.f32 0.5, %v4315_v52 }
 0xa9d   :  { %v1282_v54 = vmul.f32 %v3349_v47, %v1278_v13  ;;  %v1279_v24 = vadd.f32 -0.28449672, %v1275_v33 }
 0xa9e   :  { %v1288_v15 = vadd.f32 0.2548296, %v1284_v14  ;;  %v1285_v25 = vmul.f32 %v3351_v22, %v1281_v36  ;;  %v1222_v14 = vmul.f32 0.5, %v4317_v55 }
 0xa9f   :  { %v1286_v19 = vadd.f32 0.2548296, %v1282_v54  ;;  %v1283_v41 = vmul.f32 %v3353_v39, %v1279_v24 }
 0xaa0   :  { %v1292_v20 = vmul.f32 %v3347_v43, %v1288_v15  ;;  %v1289_v30 = vadd.f32 0.2548296, %v1285_v25  ;;  %v1236_v43 = vsel %vm1232_vm6, 1.0, %v3686_v62 }
 0xaa1   :  { %v1290_v57 = vmul.f32 %v3349_v47, %v1286_v19  ;;  %v1287_v40 = vadd.f32 0.2548296, %v1283_v41 }
 0xaa2   :  { %v1312_v27 = vmul.f32 %v3355_v60, %v1292_v20  ;;  %v1293_v32 = vmul.f32 %v3351_v22, %v1289_v30  ;;  %v1237_v22 = vsel %vm1233_vm8, 1.0, %v3686_v62 }
 0xaa3   :  { %v1310_v28 = vmul.f32 %v3357_v35, %v1290_v57  ;;  %v1291_v49 = vmul.f32 %v3353_v39, %v1287_v40  ;;  %v1225_v39 = vmul.f32 0.5, %v4322_v1  ;;  %v2752_v1 = vld [vmem:[%s4755_s16] ss:$0 sm:$0xff] }
 0xaa4   :  { %v1316_v42 = vsub.f32 1.0, %v1312_v27  ;;  %v1313_v47 = vmul.f32 %v3359_v45, %v1293_v32 }
 0xaa5   :  { %v1314_v48 = vsub.f32 1.0, %v1310_v28  ;;  %v1311_v5 = vmul.f32 %v3361_v26, %v1291_v49 }
 0xaa6   :  { %v1320_v50 = vmul.f32 %v1316_v42, %v1236_v43  ;;  %v1317_v61 = vsub.f32 1.0, %v1313_v47 }
 0xaa7   :  { %v1318_v58 = vmul.f32 %v1314_v48, %v1234_v53  ;;  %v1315_v9 = vsub.f32 1.0, %v1311_v5 }
 0xaa8   :  { %v1324_v7 = vadd.f32 1.0, %v1320_v50  ;;  %v1321_v29 = vmul.f32 %v1317_v61, %v1237_v22 }
 0xaa9   :  { %v1322_v8 = vadd.f32 1.0, %v1318_v58  ;;  %v1319_v13 = vmul.f32 %v1315_v9, %v1235_v11  ;;  %v3250_v11 = vld [vmem:[%s4746_s7 + $0x10] sm:$0xff]  }
 0xaaa   :  { %v1325_v12 = vadd.f32 1.0, %v1321_v29  ;;  %v1328_v37 = vmul.f32 %v1324_v7, %v1224_v10  ;;  %3055 = vmatprep.subr.bf16.mxu1 %v3250_v11 }
 0xaab   :  { %v1323_v54 = vadd.f32 1.0, %v1319_v13  ;;  %v1326_v15 = vmul.f32 %v1322_v8, %v1222_v14  ;;  %3056 = vmatpush3.bf16.msra.mxu1 %v3250_v11  ;;  %v3251_v8 = vld [vmem:[%s4746_s7 + $0x18] sm:$0xff]  }
 0xaac   :  { %v1329_v34 = vmul.f32 %v1325_v12, %v1225_v39  ;;  %3057 = vmatprep.subr.bf16.mxu1 %v3251_v8 }
 0xaad   :  { %v1327_v33 = vmul.f32 %v1323_v54, %v1223_v51 }
 0xaae   :  { %v1331_v36 = vpack.c.bf16 %v1329_v34, %v1328_v37 }
 0xaaf   :  { %v1330_v19 = vpack.c.bf16 %v1327_v33, %v1326_v15  ;;  %3058 = vmatpush3.bf16.msra.mxu1 %v3251_v8 }
 0xab1   :  { %3051 = vmatprep.mubr.bf16.mxu0 %v1330_v19 }
 0xab2   :  { %3052 = vmatmul.mubr.bf16.vlgmr.msra.gmra.mrb[20].mxu0 %v1331_v36 }
 0xb85   :  { %v3053_v52 = vpop.f32.mrb[20].mxu0 }
 0xb86   :  { %v1447_v20 = vadd.f32 %v3053_v52, %v4256_v38  ;;  %v1430_v25 = vpop.f32.mrb[21].mxu0 }
 0xb87   :  { %v1445_v55 = vadd.f32 %v1430_v25, %v4259_v16  ;;  %v3054_v24 = vpop.f32.mrb[22].mxu0 }
 0xb88   :  { %v4356_v60 = vadd.f32 %v2752_v1, %v1447_v20  ;;  %v1433_v0 = vpop.f32.mrb[23].mxu0  ;;  %v1448_v30 = vadd.f32 %v3054_v24, %v4269_v31  ;;  %v2753_v20 = vld [vmem:[#allocation4 + $0x1] ss:$0 sm:$0xff] }
 0xb89   :  { %v4358_v57 = vadd.f32 %v2752_v1, %v1445_v55  ;;  %v1446_v35 = vadd.f32 %v1433_v0, %v4264_v21 }
 0xb8a   :  { %v1470_v27 = vsel %vm334_vm5, %v4356_v60, 0.0  ;;  %v4368_v16 = vadd.f32 %v2752_v1, %v1448_v30 }
 0xb8b   :  { %v4364_v41 = vadd.f32 %v2752_v1, %v1446_v35  ;;  %1471 = vadd.xlane.f32.xlu0 %v1470_v27  ;;  %v1464_v38 = vsel %vm334_vm5, %v4358_v57, 0.0  ;;  %v2754_v27 = vld [vmem:[#allocation6 + $0x1] ss:$0 sm:$0xff] }
 0xb8c   :  { %1465 = vadd.xlane.f32.xlu1 %v1464_v38  ;;  %v1473_v21 = vsel %vm334_vm5, %v4368_v16, 0.0 }
 0xb8d   :  { %v1467_v28 = vsel %vm334_vm5, %v4364_v41, 0.0 }
 0xb90   :  { %1468 = vadd.xlane.f32.xlu1 %v1467_v28 }
 0xb94   :  { %1474 = vadd.xlane.f32.xlu1 %v1473_v21 }
 0xc18   :  { %v1472_v42 = vpop.xlane.xlu0 %1471 }
 0xc19   :  { %v1478_v32 = vmul.f32 0.03125, %v1472_v42  ;;  %v1466_v31 = vpop.xlane.xlu1 %1465 }
 0xc1a   :  { %v1476_v40 = vmul.f32 0.03125, %v1466_v31 }
 0xc1b   :  { %v1482_v45 = vsub.f32 %v4356_v60, %v1478_v32 }
 0xc1c   :  { %v1480_v43 = vsub.f32 %v4358_v57, %v1476_v40 }
 0xc1d   :  { %v1469_v48 = vpop.xlane.xlu1 %1468  ;;  %v1486_v53 = vmul.f32 %v1482_v45, %v1482_v45 }
 0xc1e   :  { %v1477_v50 = vmul.f32 0.03125, %v1469_v48  ;;  %v1484_v47 = vmul.f32 %v1480_v43, %v1480_v43 }
 0xc1f   :  { %v1494_v7 = vsel %vm334_vm5, %v1486_v53, 0.0 }
 0xc20   :  { %v1481_v49 = vsub.f32 %v4364_v41, %v1477_v50  ;;  %v1488_v26 = vsel %vm334_vm5, %v1484_v47, 0.0 }
 0xc21   :  { %1489 = vadd.xlane.f32.xlu0 %v1488_v26  ;;  %v1475_v58 = vpop.xlane.xlu1 %1474 }
 0xc22   :  { %v1479_v61 = vmul.f32 0.03125, %v1475_v58  ;;  %v1485_v5 = vmul.f32 %v1481_v49, %v1481_v49 }
 0xc24   :  { %v1483_v22 = vsub.f32 %v4368_v16, %v1479_v61  ;;  %v1491_v29 = vsel %vm334_vm5, %v1485_v5, 0.0 }
 0xc25   :  { %1495 = vadd.xlane.f32.xlu0 %v1494_v7  ;;  %1492 = vadd.xlane.f32.xlu1 %v1491_v29 }
 0xc26   :  { %v1487_v9 = vmul.f32 %v1483_v22, %v1483_v22 }
 0xc28   :  { %v1497_v10 = vsel %vm334_vm5, %v1487_v9, 0.0 }
 0xc29   :  { %1498 = vadd.xlane.f32.xlu1 %v1497_v10 }
 0xcae   :  { %v1490_v39 = vpop.xlane.xlu0 %1489 }
 0xcaf   :  { %v1500_v12 = vmul.f32 0.03125, %v1490_v39 }
 0xcb1   :  { %v1504_v13 = vadd.f32 1e-05, %v1500_v12 }
 0xcb2   :  { %v1496_v14 = vpop.xlane.xlu0 %1495  ;;  %v1493_v37 = vpop.xlane.xlu1 %1492 }
 0xcb3   :  { %3362 = vrsqrt.f32 %v1504_v13  ;;  %v1502_v34 = vmul.f32 0.03125, %v1496_v14  ;;  %v1501_v51 = vmul.f32 0.03125, %v1493_v37 }
 0xcb5   :  { %v1506_v54 = vadd.f32 1e-05, %v1502_v34  ;;  %v1505_v15 = vadd.f32 1e-05, %v1501_v51 }
 0xcb6   :  { %v1499_v36 = vpop.xlane.xlu1 %1498 }
 0xcb7   :  { %3364 = vrsqrt.f32 %v1506_v54  ;;  %v1503_v33 = vmul.f32 0.03125, %v1499_v36 }
 0xcb8   :  { %3366 = vrsqrt.f32 %v1505_v15 }
 0xcb9   :  { %v1507_v19 = vadd.f32 1e-05, %v1503_v33 }
 0xcbb   :  { %3368 = vrsqrt.f32 %v1507_v19 }
 0xcbd   :  { %v3363_v52 = vpop.eup %3362 }
 0xcbe   :  { %v1512_v1 = vmul.f32 %v3363_v52, %v1480_v43 }
 0xcc0   :  { %v1522_v35 = vmul.f32 %v2753_v20, %v1512_v1 }
 0xcc1   :  { %v3365_v25 = vpop.eup %3364 }
 0xcc2   :  { %v3367_v55 = vpop.eup %3366  ;;  %v1514_v24 = vmul.f32 %v3365_v25, %v1482_v45  ;;  %v1532_v42 = vadd.f32 %v2754_v27, %v1522_v35  ;;  %v2759_v45 = vld [vmem:[#allocation7 + $0x1] ss:$0 sm:$0xff] }
 0xcc3   :  { %v1513_v0 = vmul.f32 %v3367_v55, %v1481_v49 }
 0xcc4   :  { %v1524_v28 = vmul.f32 %v2753_v20, %v1514_v24 }
 0xcc5   :  { %v3369_v30 = vpop.eup %3368  ;;  %v1523_v38 = vmul.f32 %v2753_v20, %v1513_v0 }
 0xcc6   :  { %v1515_v21 = vmul.f32 %v3369_v30, %v1483_v22  ;;  %v1534_v48 = vadd.f32 %v2754_v27, %v1524_v28 }
 0xcc7   :  { %v1533_v32 = vadd.f32 %v2754_v27, %v1523_v38 }
 0xcc8   :  { %v1525_v31 = vmul.f32 %v2753_v20, %v1515_v21 }
 0xcc9   :  { %v1536_v40 = vpack.c.bf16 %v1533_v32, %v1532_v42 }
 0xcca   :  { %v1535_v50 = vadd.f32 %v2754_v27, %v1525_v31 }
 0xccb   :  { %3059 = vmatprep.mubr.msk.bf16.mxu1 %vm334_vm5, %v1536_v40 }
 0xccc   :  { %v1537_v43 = vpack.c.bf16 %v1535_v50, %v1534_v48  ;;  %v3466_v48 = vld [vmem:[%s4781_s21 + $0x10] sm:$0xff] }
 0xcce   :  { %3060 = vmatmul.mubr.msk.bf16.vlgmr.msra.gmra.mrb[16].mxu1 %vm334_vm5, %v1537_v43 }
 0xda1   :  { %v3061_v47 = vpop.f32.mrb[16].mxu1 }
 0xda2   :  { %v1603_v49 = vpop.f32.mrb[17].mxu1  ;;  %v1612_v53 = vadd.f32 %v3061_v47, %v2759_v45 }
 0xda3   :  { %v3062_v26 = vpop.f32.mrb[18].mxu1  ;;  %v1604_v5 = vadd.f32 %v2759_v45, %v1603_v49 }
 0xda4   :  { %v1615_v58 = vadd.f32 %v3062_v26, %v2759_v45  ;;  %v1606_v61 = vpop.f32.mrb[19].mxu1 }
 0xda5   :  { %v1607_v22 = vadd.f32 %v2759_v45, %v1606_v61 }
 0xda6   :  { %v4390_v7 = vpack.c.bf16 %v1615_v58, %v1612_v53 }
 0xda7   :  { %v4392_v29 = vpack.c.bf16 %v1607_v22, %v1604_v5  ;;  %v3469_v5 = vld [vmem:[%s4781_s21 + $0x8] sm:$0xff] }
 0xda8   :  { %v1629_v9 = vmul.bf16 %v4390_v7, %v4025_v46  ;;  %v1633_v13 = vmul.bf16 %v4390_v7, %v4040_v59  ;;  %v1639_v34 = vmul.bf16 %v4390_v7, %v4077_v17  ;;  %v1621_v28 = vmul.bf16 %v4390_v7, %v4008_v2 }
 0xda9   :  { %v1628_v10 = vmul.bf16 %v4392_v29, %v4025_v46  ;;  %v1620_v11 = vmul.bf16 %v4392_v29, %v4008_v2  ;;  %v1630_v8 = vmul.bf16 %v4392_v29, %v4033_v56  ;;  %v1632_v39 = vmul.bf16 %v4392_v29, %v4040_v59 }
 0xdaa   :  { %1654 = vrot.lane.b32.xlu1 %v1629_v9, %s3685_s25  ;;  %v1631_v46 = vmul.bf16 %v4390_v7, %v4033_v56  ;;  %v1634_v12 = vmul.bf16 %v4392_v29, %v4052_v63  ;;  %v1636_v14 = vmul.bf16 %v4392_v29, %v4079_v18  ;;  %v1635_v56 = vmul.bf16 %v4390_v7, %v4052_v63 }
 0xdab   :  { %1652 = vrot.lane.b32.xlu0 %v1628_v10, %s3685_s25  ;;  %3079 = vmatprep.mubr.msk.bf16.mxu1 %vm334_vm5, %v1620_v11  ;;  %v1638_v37 = vmul.bf16 %v4392_v29, %v4077_v17  ;;  %v1637_v59 = vmul.bf16 %v4390_v7, %v4079_v18  ;;  %v1622_v21 = vmul.bf16 %v4392_v29, %v4010_v3 }
 0xdac   :  { %v1623_v42 = vmul.bf16 %v4390_v7, %v4010_v3  ;;  %v1624_v32 = vmul.bf16 %v4392_v29, %v4013_v4  ;;  %v1625_v2 = vmul.bf16 %v4390_v7, %v4013_v4  ;;  %v1626_v31 = vmul.bf16 %v4392_v29, %v4017_v6  ;;  %v3467_v4 = vld [vmem:[%s4781_s21] sm:$0xff] }
 0xdad   :  { %v1627_v3 = vmul.bf16 %v4390_v7, %v4017_v6  ;;  %v3468_v6 = vld [vmem:[%s4781_s21 + $0x18] sm:$0xff] }
 0xdae   :  { %1656 = vrot.lane.b32.xlu1 %v1630_v8, %s3685_s25 }
 0xdaf   :  { %1660 = vrot.lane.b32.xlu0 %v1632_v39, %s3685_s25 }
 0xdb2   :  { %1658 = vrot.lane.b32.xlu1 %v1631_v46, %s3685_s25 }
 0xdb3   :  { %1664 = vrot.lane.b32.xlu0 %v1634_v12, %s3685_s25 }
 0xdb6   :  { %1662 = vrot.lane.b32.xlu1 %v1633_v13, %s3685_s25 }
 0xdb7   :  { %1925 = vrot.lane.b32.xlu0 %v1636_v14, %s3678_s6 }
 0xdba   :  { %1666 = vrot.lane.b32.xlu1 %v1635_v56, %s3685_s25 }
 0xdbb   :  { %1929 = vrot.lane.b32.xlu0 %v1638_v37, %s3678_s6 }
 0xdbe   :  { %1927 = vrot.lane.b32.xlu1 %v1637_v59, %s3678_s6 }
 0xdc2   :  { %1931 = vrot.lane.b32.xlu1 %v1639_v34, %s3678_s6 }
 0xe1c   :  { %v1655_v51 = vpop.permute.xlu1 %1654 }
 0xe1d   :  { %v1653_v54 = vpop.permute.xlu0 %1652  ;;  %v1696_v19 = vsel %vm334_vm5, %v1655_v51, 0 }
 0xe1e   :  { %v1693_v63 = vsel %vm334_vm5, %v1653_v54, 0  ;;  %3207 = vmatprep.subr.msk.bf16.mxu1 %vm334_vm5, %v1653_v54 }
 0xe1f   :  { %3064 = vmatpush3.bf16.xpose.msra.mxu1 %v1693_v63 }
 0xe20   :  { %v1657_v15 = vpop.permute.xlu1 %1656  ;;  %3208 = vmatprep.subr.msk.bf16.mxu1 %vm334_vm5, %v1655_v51 }
 0xe21   :  { %v1661_v36 = vpop.permute.xlu0 %1660  ;;  %v1699_v20 = vsel %vm334_vm5, %v1657_v15, 0 }
 0xe22   :  { %v1705_v35 = vsel %vm334_vm5, %v1661_v36, 0 }
 0xe24   :  { %v1659_v33 = vpop.permute.xlu1 %1658 }
 0xe25   :  { %v1665_v18 = vpop.permute.xlu0 %1664  ;;  %v1702_v24 = vsel %vm334_vm5, %v1659_v33, 0 }
 0xe26   :  { %v1711_v30 = vsel %vm334_vm5, %v1665_v18, 0 }
 0xe27   :  { %3066 = vmatpush3.bf16.xpose.msra.mxu1 %v1696_v19  ;;  %v3470_v19 = vld [vmem:[%s4781_s21 + $0x20] sm:$0xff] }
 0xe28   :  { %v1663_v52 = vpop.permute.xlu1 %1662  ;;  %3209 = vmatprep.subr.msk.bf16.mxu1 %vm334_vm5, %v1657_v15 }
 0xe29   :  { %v1926_v17 = vpop.permute.xlu0 %1925  ;;  %v1708_v27 = vsel %vm334_vm5, %v1663_v52, 0 }
 0xe2a   :  { %3095 = vmatprep.subr.bf16.mxu0 %v1926_v17 }
 0xe2b   :  { %3096 = vmatpush3.bf16.msra.mxu0 %v1926_v17  ;;  %v3471_v17 = vld [vmem:[%s4781_s21 + $0x30] sm:$0xff] }
 0xe2c   :  { %v1667_v1 = vpop.permute.xlu1 %1666 }
 0xe2d   :  { %v1930_v55 = vpop.permute.xlu0 %1929  ;;  %v1714_v38 = vsel %vm334_vm5, %v1667_v1, 0 }
 0xe2f   :  { %3068 = vmatpush3.bf16.xpose.msra.mxu1 %v1699_v20 }
 0xe30   :  { %v1928_v25 = vpop.permute.xlu1 %1927  ;;  %3210 = vmatprep.subr.msk.bf16.mxu1 %vm334_vm5, %v1659_v33  ;;  %v1642_v33 = vmul.bf16 %v4392_v29, %v4133_v44 }
 0xe31   :  { %3097 = vmatprep.subr.bf16.mxu0 %v1928_v25 }
 0xe32   :  { %3098 = vmatpush3.bf16.msra.mxu0 %v1928_v25  ;;  %v3472_v25 = vld [vmem:[%s4781_s21 + $0x38] sm:$0xff] }
 0xe33   :  { %3099 = vmatprep.subr.bf16.mxu0 %v1930_v55 }
 0xe34   :  { %v1932_v0 = vpop.permute.xlu1 %1931 }
 0xe36   :  { %3100 = vmatpush3.bf16.msra.mxu0 %v1930_v55 }
 0xe37   :  { %3070 = vmatpush3.bf16.xpose.msra.mxu1 %v1702_v24  ;;  %3101 = vmatprep.subr.bf16.mxu0 %v1932_v0 }
 0xe38   :  { %3211 = vmatprep.subr.msk.bf16.mxu1 %vm334_vm5, %v1661_v36  ;;  %v1641_v36 = vmul.bf16 %v4390_v7, %v4089_v23 }
 0xe3a   :  { %3102 = vmatpush3.bf16.msra.mxu0 %v1932_v0 }
 0xe3f   :  { %3072 = vmatpush3.bf16.xpose.msra.mxu1 %v1705_v35  ;;  %v3474_v35 = vld [vmem:[%s4781_s21 + $0x40] sm:$0xff] }
 0xe40   :  { %3212 = vmatprep.subr.msk.bf16.mxu1 %vm334_vm5, %v1663_v52 }
 0xe47   :  { %3074 = vmatpush3.bf16.xpose.msra.mxu1 %v1708_v27 }
 0xe48   :  { %3213 = vmatprep.subr.msk.bf16.mxu1 %vm334_vm5, %v1665_v18  ;;  %v1640_v18 = vmul.bf16 %v4392_v29, %v4089_v23  ;;  %v3473_v23 = vld [vmem:[%s4781_s21 + $0x28] sm:$0xff] }
 0xe4f   :  { %3076 = vmatpush3.bf16.xpose.msra.mxu1 %v1711_v30 }
 0xe50   :  { %3214 = vmatprep.subr.msk.bf16.mxu1 %vm334_vm5, %v1667_v1 }
 0xe57   :  { %3078 = vmatpush3.bf16.xpose.msra.mxu1 %v1714_v38  ;;  %v3475_v38 = vld [vmem:[%s4781_s21 + $0x50] sm:$0xff] }
 0xe5e   :  { %3080 = vmatmul.mubr.msk.bf16.vlgmr.msra.gmra.mrb[20].mxu1 %vm334_vm5, %v1621_v28 }
 0xe5f   :  { %3083 = vmatprep.mubr.msk.bf16.mxu1 %vm334_vm5, %v1622_v21 }
 0xe66   :  { %3084 = vmatmul.mubr.msk.bf16.gmra.mrb[24].mxu1 %vm334_vm5, %v1623_v42 }
 0xe67   :  { %3087 = vmatprep.mubr.msk.bf16.mxu1 %vm334_vm5, %v1624_v32  ;;  %v3476_v32 = vld [vmem:[%s4781_s21 + $0x58] sm:$0xff] }
 0xe6e   :  { %3088 = vmatmul.mubr.msk.bf16.gmra.mrb[28].mxu1 %vm334_vm5, %v1625_v2 }
 0xe6f   :  { %3091 = vmatprep.mubr.msk.bf16.mxu1 %vm334_vm5, %v1626_v31 }
 0xe76   :  { %3092 = vmatmul.mubr.msk.bf16.gmra.mrb[32].mxu1 %vm334_vm5, %v1627_v3 }
 0xf31   :  { %v3081_v40 = vpop.f32.mrb[20].mxu1 }
 0xf32   :  { %v1759_v50 = vadd.f32 %v3466_v48, %v3081_v40  ;;  %v1750_v43 = vpop.f32.mrb[21].mxu1  ;;  %v3477_v40 = vld [vmem:[%s4781_s21 + $0x48] sm:$0xff] }
 0xf33   :  { %v1751_v47 = vadd.f32 %v3467_v4, %v1750_v43  ;;  %v3082_v45 = vpop.f32.mrb[22].mxu1 }
 0xf34   :  { %v1817_v49 = vmul.f32 1.442695, %v1759_v50  ;;  %v1762_v26 = vadd.f32 %v3468_v6, %v3082_v45  ;;  %v1753_v53 = vpop.f32.mrb[23].mxu1 }
 0xf35   :  { %v1813_v58 = vmul.f32 1.442695, %v1751_v47  ;;  %v1754_v22 = vadd.f32 %v3469_v5, %v1753_v53  ;;  %v3478_v47 = vld [vmem:[%s4781_s21 + $0x70] sm:$0xff]  ;;  %v3479_v53 = vld [vmem:[%s4781_s21 + $0x60] sm:$0xff] }
 0xf36   :  { %3370 = vpow2.f32 %v1817_v49  ;;  %v1819_v61 = vmul.f32 1.442695, %v1762_v26 }
 0xf37   :  { %3372 = vpow2.f32 %v1813_v58  ;;  %v1815_v10 = vmul.f32 1.442695, %v1754_v22  ;;  %v3480_v22 = vld [vmem:[%s4781_s21 + $0x68] sm:$0xff] }
 0xf38   :  { %3374 = vpow2.f32 %v1819_v61 }
 0xf39   :  { %v3085_v9 = vpop.f32.mrb[24].mxu1  ;;  %3376 = vpow2.f32 %v1815_v10 }
 0xf3a   :  { %v1766_v11 = vpop.f32.mrb[25].mxu1  ;;  %v1775_v1 = vadd.f32 %v3471_v17, %v3085_v9 }
 0xf3b   :  { %v3086_v8 = vpop.f32.mrb[26].mxu1  ;;  %v1767_v52 = vadd.f32 %v3470_v19, %v1766_v11  ;;  %v3481_v11 = vld [vmem:[%s4781_s21 + $0x78] sm:$0xff] }
 0xf3c   :  { %v1769_v39 = vpop.f32.mrb[27].mxu1  ;;  %v1778_v55 = vadd.f32 %v3472_v25, %v3086_v8  ;;  %v1825_v24 = vmul.f32 1.442695, %v1775_v1 }
 0xf3d   :  { %v1821_v20 = vmul.f32 1.442695, %v1767_v52  ;;  %v1770_v29 = vadd.f32 %v3473_v23, %v1769_v39 }
 0xf3e   :  { %v1827_v0 = vmul.f32 1.442695, %v1778_v55 }
 0xf3f   :  { %3378 = vpow2.f32 %v1821_v20  ;;  %v1823_v30 = vmul.f32 1.442695, %v1770_v29 }
 0xf40   :  { %v4482_v46 = vpop.eup %3370  ;;  %3380 = vpow2.f32 %v1825_v24 }
 0xf41   :  { %v4484_v12 = vpop.eup %3372  ;;  %1849 = vadd.xlane.f32.xlu0 %v4482_v46  ;;  %v3089_v13 = vpop.f32.mrb[28].mxu1  ;;  %3382 = vpow2.f32 %v1827_v0 }
 0xf42   :  { %v1782_v14 = vpop.f32.mrb[29].mxu1  ;;  %1845 = vadd.xlane.f32.xlu1 %v4484_v12  ;;  %v4488_v37 = vpop.eup %3374  ;;  %v1791_v28 = vadd.f32 %v3475_v38, %v3089_v13  ;;  %3384 = vpow2.f32 %v1823_v30 }
 0xf43   :  { %v3090_v56 = vpop.f32.mrb[30].mxu1  ;;  %v4491_v34 = vpop.eup %3376  ;;  %v1783_v27 = vadd.f32 %v3474_v35, %v1782_v14 }
 0xf44   :  { %v1785_v59 = vpop.f32.mrb[31].mxu1  ;;  %v1833_v42 = vmul.f32 1.442695, %v1791_v28  ;;  %v1794_v2 = vadd.f32 %v3476_v32, %v3090_v56  ;;  %v3253_v32 = vld [vmem:[#allocation9 + $0x18] sm:$0xff]  }
 0xf45   :  { %1851 = vadd.xlane.f32.xlu0 %v4488_v37  ;;  %v1829_v21 = vmul.f32 1.442695, %v1783_v27  ;;  %v1786_v48 = vadd.f32 %v3477_v40, %v1785_v59  ;;  %v1643_v59 = vmul.bf16 %v4390_v7, %v4133_v44 }
 0xf46   :  { %v1835_v3 = vmul.f32 1.442695, %v1794_v2 }
 0xf47   :  { %3386 = vpow2.f32 %v1829_v21  ;;  %v1831_v4 = vmul.f32 1.442695, %v1786_v48 }
 0xf48   :  { %3388 = vpow2.f32 %v1833_v42 }
 0xf49   :  { %v3093_v51 = vpop.f32.mrb[32].mxu1  ;;  %1847 = vadd.xlane.f32.xlu0 %v4491_v34  ;;  %v4526_v31 = vpop.eup %3378  ;;  %3390 = vpow2.f32 %v1835_v3 }
 0xf4a   :  { %v1798_v54 = vpop.f32.mrb[33].mxu1  ;;  %v4532_v50 = vpop.eup %3380  ;;  %v1807_v45 = vadd.f32 %v3478_v47, %v3093_v51  ;;  %3392 = vpow2.f32 %v1831_v4 }
 0xf4b   :  { %v4494_v63 = vpop.f32.mrb[34].mxu1  ;;  %v4534_v43 = vpop.eup %3382  ;;  %v1799_v58 = vadd.f32 %v3479_v53, %v1798_v54 }
 0xf4c   :  { %v1801_v15 = vpop.f32.mrb[35].mxu1  ;;  %v4541_v49 = vpop.eup %3384  ;;  %v1841_v26 = vmul.f32 1.442695, %v1807_v45  ;;  %v1810_v8 = vadd.f32 %v3481_v11, %v4494_v63 }
 0xf4d   :  { %v1837_v5 = vmul.f32 1.442695, %v1799_v58  ;;  %v1802_v9 = vadd.f32 %v3480_v22, %v1801_v15 }
 0xf4e   :  { %3394 = vpow2.f32 %v1841_v26  ;;  %v1843_v14 = vmul.f32 1.442695, %v1810_v8 }
 0xf4f   :  { %3396 = vpow2.f32 %v1837_v5  ;;  %v1839_v39 = vmul.f32 1.442695, %v1802_v9 }
 0xf51   :  { %v4543_v6 = vpop.eup %3386  ;;  %3398 = vpow2.f32 %v1839_v39 }
 0xf52   :  { %v4550_v61 = vpop.eup %3388  ;;  %3400 = vpow2.f32 %v1843_v14 }
 0xf53   :  { %1935 = vrot.lane.b32.xlu1 %v1641_v36, %s3678_s6  ;;  %v4556_v10 = vpop.eup %3390 }
 0xf54   :  { %v4563_v13 = vpop.eup %3392 }
 0xf57   :  { %1937 = vrot.lane.b32.xlu1 %v1642_v33, %s3678_s6 }
 0xf58   :  { %v4566_v56 = vpop.eup %3394 }
 0xf59   :  { %v4572_v51 = vpop.eup %3396 }
 0xf5b   :  { %v4575_v54 = vpop.eup %3398 }
 0xf5c   :  { %v4578_v63 = vpop.eup %3400 }
 0xf5f   :  { %1933 = vrot.lane.b32.xlu0 %v1640_v18, %s3678_s6 }
 0xf7b   :  { %1853 = vadd.xlane.f32.xlu1 %v4526_v31 }
 0xf7e   :  { %1857 = vadd.xlane.f32.xlu0 %v4532_v50 }
 0xf7f   :  { %1859 = vadd.xlane.f32.xlu1 %v4534_v43 }
 0xf82   :  { %1855 = vadd.xlane.f32.xlu0 %v4541_v49 }
 0xf83   :  { %1861 = vadd.xlane.f32.xlu1 %v4543_v6 }
 0xf86   :  { %1865 = vadd.xlane.f32.xlu0 %v4550_v61 }
 0xf8a   :  { %1867 = vadd.xlane.f32.xlu0 %v4556_v10 }
 0xf8e   :  { %1863 = vadd.xlane.f32.xlu0 %v4563_v13 }
 0xf92   :  { %1873 = vadd.xlane.f32.xlu0 %v4566_v56 }
 0xf94   :  { %1939 = vrot.lane.b32.xlu1 %v1643_v59, %s3678_s6 }
 0xf96   :  { %1869 = vadd.xlane.f32.xlu0 %v4572_v51 }
 0xf9a   :  { %1871 = vadd.xlane.f32.xlu0 %v4575_v54 }
 0xf9e   :  { %1875 = vadd.xlane.f32.xlu0 %v4578_v63 }
 0xfce   :  { %v1850_v15 = vpop.xlane.xlu0 %1849 }
 0xfcf   :  { %v1846_v36 = vpop.xlane.xlu1 %1845 }
 0xfd0   :  { %3402 = vrcp.f32 %v1846_v36 }
 0xfd2   :  { %v1852_v33 = vpop.xlane.xlu0 %1851 }
 0xfd3   :  { %v1936_v7 = vpop.permute.xlu1 %1935 }
 0xfd6   :  { %v1848_v44 = vpop.xlane.xlu0 %1847 }
 0xfd7   :  { %3404 = vrcp.f32 %v1848_v44  ;;  %v1938_v52 = vpop.permute.xlu1 %1937 }
 0xfd8   :  { %3406 = vrcp.f32 %v1852_v33 }
 0xfd9   :  { %3408 = vrcp.f32 %v1850_v15 }
 0xfda   :  { %v1934_v18 = vpop.permute.xlu0 %1933  ;;  %v3403_v19 = vpop.eup %3402 }
 0xfdb   :  { %3103 = vmatprep.subr.bf16.mxu0 %v1934_v18  ;;  %v1893_v1 = vmul.f32 %v3403_v19, %v4484_v12 }
 0xfdc   :  { %3104 = vmatpush3.bf16.msra.mxu0 %v1934_v18 }
 0xfdd   :  { %3105 = vmatprep.subr.bf16.mxu0 %v1936_v7 }
 0xfe0   :  { %3106 = vmatpush3.bf16.msra.mxu0 %v1936_v7 }
 0xfe1   :  { %v3405_v17 = vpop.eup %3404  ;;  %3107 = vmatprep.subr.bf16.mxu0 %v1938_v52 }
 0xfe2   :  { %v1894_v20 = vmul.f32 %v3405_v17, %v4491_v34  ;;  %v3407_v0 = vpop.eup %3406  ;;  %v3252_v34 = vld [vmem:[#allocation9 + $0x10] sm:$0xff]  }
 0xfe3   :  { %v3409_v27 = vpop.eup %3408  ;;  %v1896_v12 = vmul.f32 %v3407_v0, %v4488_v37 }
 0xfe4   :  { %3108 = vmatpush3.bf16.msra.mxu0 %v1938_v52  ;;  %v1909_v25 = vpack.c.bf16 %v1894_v20, %v1893_v1  ;;  %v1895_v28 = vmul.f32 %v3409_v27, %v4482_v46 }
 0xfe6   :  { %3111 = vmatprep.mubr.bf16.mxu0 %v1909_v25  ;;  %v1910_v42 = vpack.c.bf16 %v1896_v12, %v1895_v28 }
0x1008   :  { %v1854_v55 = vpop.xlane.xlu1 %1853 }
0x1009   :  { %3410 = vrcp.f32 %v1854_v55 }
0x100b   :  { %v1858_v24 = vpop.xlane.xlu0 %1857 }
0x100c   :  { %v1860_v23 = vpop.xlane.xlu1 %1859 }
0x100f   :  { %v1856_v29 = vpop.xlane.xlu0 %1855 }
0x1010   :  { %3412 = vrcp.f32 %v1856_v29  ;;  %v1862_v35 = vpop.xlane.xlu1 %1861 }
0x1011   :  { %3414 = vrcp.f32 %v1858_v24 }
0x1012   :  { %3416 = vrcp.f32 %v1860_v23 }
0x1013   :  { %v1866_v30 = vpop.xlane.xlu0 %1865  ;;  %v3411_v2 = vpop.eup %3410  ;;  %3418 = vrcp.f32 %v1862_v35 }
0x1014   :  { %v1940_v38 = vpop.permute.xlu1 %1939  ;;  %v1897_v4 = vmul.f32 %v3411_v2, %v4526_v31 }
0x1015   :  { %3109 = vmatprep.subr.bf16.mxu0 %v1940_v38 }
0x1016   :  { %3110 = vmatpush3.bf16.msra.mxu0 %v1940_v38 }
0x1017   :  { %v1868_v21 = vpop.xlane.xlu0 %1867  ;;  %3127 = vmatprep.subr.bf16.mxu0 %v3252_v34 }
0x1019   :  { %3112 = vmatmul.mubr.bf16.vlgmr.msra.gmra.mrb[24].mxu0 %v1910_v42 }
0x101a   :  { %v3413_v3 = vpop.eup %3412  ;;  %3128 = vmatpush3.bf16.msra.mxu0 %v3252_v34 }
0x101b   :  { %v3415_v40 = vpop.eup %3414  ;;  %v1864_v48 = vpop.xlane.xlu0 %1863  ;;  %v1898_v37 = vmul.f32 %v3413_v3, %v4541_v49  ;;  %3129 = vmatprep.subr.bf16.mxu0 %v3253_v32 }
0x101c   :  { %v3417_v47 = vpop.eup %3416  ;;  %3420 = vrcp.f32 %v1864_v48  ;;  %v1899_v26 = vmul.f32 %v3415_v40, %v4532_v50 }
0x101d   :  { %v1911_v46 = vpack.c.bf16 %v1898_v37, %v1897_v4  ;;  %3422 = vrcp.f32 %v1868_v21  ;;  %v1900_v53 = vmul.f32 %v3417_v47, %v4534_v43  ;;  %v3419_v22 = vpop.eup %3418 }
0x101e   :  { %3130 = vmatpush3.bf16.msra.mxu0 %v3253_v32  ;;  %3424 = vrcp.f32 %v1866_v30  ;;  %v1901_v9 = vmul.f32 %v3419_v22, %v4543_v6 }
0x101f   :  { %v1874_v45 = vpop.xlane.xlu0 %1873  ;;  %3115 = vmatprep.mubr.bf16.mxu0 %v1911_v46  ;;  %v1912_v5 = vpack.c.bf16 %v1900_v53, %v1899_v26 }
0x1023   :  { %v1870_v58 = vpop.xlane.xlu0 %1869 }
0x1024   :  { %3426 = vrcp.f32 %v1870_v58 }
0x1025   :  { %3116 = vmatmul.mubr.bf16.gmra.mrb[24].mxu0 %v1912_v5 }
0x1026   :  { %v3421_v31 = vpop.eup %3420 }
0x1027   :  { %v1872_v49 = vpop.xlane.xlu0 %1871  ;;  %v1902_v11 = vmul.f32 %v3421_v31, %v4563_v13  ;;  %v3423_v8 = vpop.eup %3422 }
0x1028   :  { %3428 = vrcp.f32 %v1872_v49  ;;  %v3425_v14 = vpop.eup %3424  ;;  %v1904_v43 = vmul.f32 %v3423_v8, %v4556_v10  ;;  %v3254_v49 = vld [vmem:[#allocation13 + $0x10] sm:$0xff]  }
0x1029   :  { %v1913_v39 = vpack.c.bf16 %v1902_v11, %v1901_v9  ;;  %3430 = vrcp.f32 %v1874_v45  ;;  %v1903_v59 = vmul.f32 %v3425_v14, %v4550_v61  ;;  %v3255_v9 = vld [vmem:[#allocation13 + $0x18] sm:$0xff]   ;;  %3135 = vmatprep.subr.bf16.mxu0 %v3254_v49 }
0x102b   :  { %v1876_v50 = vpop.xlane.xlu0 %1875  ;;  %3119 = vmatprep.mubr.bf16.mxu0 %v1913_v39  ;;  %v1914_v15 = vpack.c.bf16 %v1904_v43, %v1903_v59 }
0x102c   :  { %3432 = vrcp.f32 %v1876_v50 }
0x102e   :  { %v3427_v36 = vpop.eup %3426 }
0x102f   :  { %v1905_v6 = vmul.f32 %v3427_v36, %v4572_v51  ;;  %v2772_v51 = vld [vmem:[#allocation10 + $0x1] ss:$0 sm:$0xff] }
0x1031   :  { %3120 = vmatmul.mubr.bf16.gmra.mrb[24].mxu0 %v1914_v15 }
0x1032   :  { %v3429_v33 = vpop.eup %3428 }
0x1033   :  { %v1906_v13 = vmul.f32 %v3429_v33, %v4575_v54  ;;  %v3431_v44 = vpop.eup %3430 }
0x1034   :  { %v1907_v52 = vmul.f32 %v3431_v44, %v4566_v56 }
0x1035   :  { %v1915_v7 = vpack.c.bf16 %v1906_v13, %v1905_v6 }
0x1036   :  { %v3433_v18 = vpop.eup %3432 }
0x1037   :  { %3123 = vmatprep.mubr.bf16.mxu0 %v1915_v7  ;;  %v1908_v19 = vmul.f32 %v3433_v18, %v4578_v63 }
0x1039   :  { %v1916_v10 = vpack.c.bf16 %v1908_v19, %v1907_v52  ;;  %v2778_v52 = vld [vmem:[#allocation12 + $0x1] ss:$0 sm:$0xff] }
0x103d   :  { %3124 = vmatmul.mubr.bf16.gmra.mrb[24].mxu0 %v1916_v10 }
0x1110   :  { %v3125_v17 = vpop.f32.mrb[24].mxu0 }
0x1111   :  { %v2031_v61 = vpop.f32.mrb[25].mxu0 }
0x1112   :  { %v3126_v1 = vpop.f32.mrb[26].mxu0 }
0x1113   :  { %v2059_v20 = vpack.c.bf16 %v3126_v1, %v3125_v17  ;;  %v2034_v25 = vpop.f32.mrb[27].mxu0 }
0x1114   :  { %v2058_v55 = vpack.c.bf16 %v2034_v25, %v2031_v61  ;;  %v2779_v25 = vld [vmem:[%s4751_s12 + $0x1] ss:$0 sm:$0xff]  ;;  %s4783_s12 = sld [smem:[#allocation27_spill]] }
0x1116   :  { %3131 = vmatprep.mubr.msk.bf16.mxu0 %vm334_vm5, %v2058_v55 }
0x1117   :  { %3132 = vmatmul.mubr.msk.bf16.vlgmr.msra.gmra.mrb[28].mxu0 %vm334_vm5, %v2059_v20 }
0x1118   :  { %3136 = vmatpush3.bf16.msra.mxu0 %v3254_v49 }
0x1119   :  { %3137 = vmatprep.subr.bf16.mxu0 %v3255_v9 }
0x111c   :  { %3138 = vmatpush3.bf16.msra.mxu0 %v3255_v9 }
0x11ea   :  { %v3133_v54 = vpop.f32.mrb[28].mxu0 }
0x11eb   :  { %v2134_v24 = vadd.f32 %v3133_v54, %v2772_v51  ;;  %v2125_v23 = vpop.f32.mrb[29].mxu0 }
0x11ec   :  { %v2126_v29 = vadd.f32 %v2772_v51, %v2125_v23  ;;  %v3134_v63 = vpop.f32.mrb[30].mxu0 }
0x11ed   :  { %v4600_v56 = vadd.f32 %v2134_v24, %v4356_v60  ;;  %v2128_v0 = vpop.f32.mrb[31].mxu0  ;;  %v2137_v30 = vadd.f32 %v3134_v63, %v2772_v51 }
0x11ee   :  { %v4603_v35 = vadd.f32 %v2126_v29, %v4358_v57  ;;  %v2129_v27 = vadd.f32 %v2772_v51, %v2128_v0 }
0x11ef   :  { %v2154_v12 = vsel %vm334_vm5, %v4600_v56, 0.0  ;;  %v4615_v28 = vadd.f32 %v2137_v30, %v4368_v16  ;;  %v3256_v30 = vld [vmem:[%s4754_s15 + $0x40] sm:$0xff]  }
0x11f0   :  { %v4608_v34 = vadd.f32 %v2129_v27, %v4364_v41  ;;  %2155 = vadd.xlane.f32.xlu0 %v2154_v12  ;;  %v2148_v38 = vsel %vm334_vm5, %v4603_v35, 0.0  ;;  %3143 = vmatprep.subr.bf16.mxu1 %v3256_v30  ;;  %v3257_v12 = vld [vmem:[%s4754_s15 + $0x48] sm:$0xff]  }
0x11f1   :  { %2149 = vadd.xlane.f32.xlu1 %v2148_v38  ;;  %v2157_v57 = vsel %vm334_vm5, %v4615_v28, 0.0  ;;  %3144 = vmatpush3.bf16.msra.mxu1 %v3256_v30  ;;  %v3258_v38 = vld [vmem:[%s4754_s15 + $0x50] sm:$0xff]  }
0x11f2   :  { %v2151_v60 = vsel %vm334_vm5, %v4608_v34, 0.0  ;;  %3145 = vmatprep.subr.bf16.mxu1 %v3257_v12 }
0x11f4   :  { %2152 = vadd.xlane.f32.xlu0 %v2151_v60  ;;  %v3259_v60 = vld [vmem:[%s4754_s15 + $0x58] sm:$0xff]  }
0x11f5   :  { %3146 = vmatpush3.bf16.msra.mxu1 %v3257_v12 }
0x11f6   :  { %3147 = vmatprep.subr.bf16.mxu1 %v3258_v38 }
0x11f8   :  { %2158 = vadd.xlane.f32.xlu0 %v2157_v57  ;;  %v3260_v57 = vld [vmem:[%s4754_s15 + $0x60] sm:$0xff]  }
0x11f9   :  { %3148 = vmatpush3.bf16.msra.mxu1 %v3258_v38 }
0x11fa   :  { %3149 = vmatprep.subr.bf16.mxu1 %v3259_v60 }
0x11fd   :  { %3150 = vmatpush3.bf16.msra.mxu1 %v3259_v60 }
0x11fe   :  { %3151 = vmatprep.subr.bf16.mxu1 %v3260_v57 }
0x1201   :  { %3152 = vmatpush3.bf16.msra.mxu1 %v3260_v57 }
0x127d   :  { %v2156_v21 = vpop.xlane.xlu0 %2155 }
0x127e   :  { %v2162_v42 = vmul.f32 0.03125, %v2156_v21  ;;  %v2150_v41 = vpop.xlane.xlu1 %2149  ;;  %v3261_v21 = vld [vmem:[%s4754_s15 + $0x68] sm:$0xff]  }
0x127f   :  { %v2160_v32 = vmul.f32 0.03125, %v2150_v41  ;;  %3153 = vmatprep.subr.bf16.mxu1 %v3261_v21  ;;  %v3263_v41 = vld [vmem:[%s4754_s15 + $0x78] sm:$0xff]  }
0x1280   :  { %v2166_v2 = vsub.f32 %v4600_v56, %v2162_v42  ;;  %3154 = vmatpush3.bf16.msra.mxu1 %v3261_v21  ;;  %v3262_v42 = vld [vmem:[%s4754_s15 + $0x70] sm:$0xff]  }
0x1281   :  { %v2164_v3 = vsub.f32 %v4603_v35, %v2160_v32  ;;  %v2153_v40 = vpop.xlane.xlu0 %2152  ;;  %3155 = vmatprep.subr.bf16.mxu1 %v3262_v42  ;;  %v2781_v32 = vld [vmem:[%s4753_s14 + $0x1] ss:$0 sm:$0xff] }
0x1282   :  { %v2161_v48 = vmul.f32 0.03125, %v2153_v40  ;;  %v2170_v4 = vmul.f32 %v2166_v2, %v2166_v2 }
0x1283   :  { %v2168_v47 = vmul.f32 %v2164_v3, %v2164_v3 }
0x1284   :  { %v2165_v37 = vsub.f32 %v4608_v34, %v2161_v48  ;;  %v2178_v16 = vsel %vm334_vm5, %v2170_v4, 0.0  ;;  %3156 = vmatpush3.bf16.msra.mxu1 %v3262_v42 }
0x1285   :  { %2179 = vadd.xlane.f32.xlu0 %v2178_v16  ;;  %v2159_v46 = vpop.xlane.xlu0 %2158  ;;  %v2172_v53 = vsel %vm334_vm5, %v2168_v47, 0.0  ;;  %3157 = vmatprep.subr.bf16.mxu1 %v3263_v41 }
0x1286   :  { %v2163_v45 = vmul.f32 0.03125, %v2159_v46  ;;  %v2169_v58 = vmul.f32 %v2165_v37, %v2165_v37 }
0x1288   :  { %v2167_v26 = vsub.f32 %v4615_v28, %v2163_v45  ;;  %v2175_v5 = vsel %vm334_vm5, %v2169_v58, 0.0  ;;  %3158 = vmatpush3.bf16.msra.mxu1 %v3263_v41 }
0x1289   :  { %2173 = vadd.xlane.f32.xlu0 %v2172_v53 }
0x128a   :  { %v2171_v22 = vmul.f32 %v2167_v26, %v2167_v26 }
0x128c   :  { %v2181_v31 = vsel %vm334_vm5, %v2171_v22, 0.0 }
0x128d   :  { %2176 = vadd.xlane.f32.xlu0 %v2175_v5 }
0x1291   :  { %2182 = vadd.xlane.f32.xlu0 %v2181_v31 }
0x1312   :  { %v2180_v11 = vpop.xlane.xlu0 %2179 }
0x1313   :  { %v2186_v8 = vmul.f32 0.03125, %v2180_v11 }
0x1315   :  { %v2190_v50 = vadd.f32 1e-05, %v2186_v8 }
0x1316   :  { %v2174_v39 = vpop.xlane.xlu0 %2173 }
0x1317   :  { %v2184_v14 = vmul.f32 0.03125, %v2174_v39 }
0x1319   :  { %v2188_v43 = vadd.f32 1e-05, %v2184_v14 }
0x131a   :  { %v2177_v59 = vpop.xlane.xlu0 %2176 }
0x131b   :  { %3434 = vrsqrt.f32 %v2188_v43  ;;  %v2185_v15 = vmul.f32 0.03125, %v2177_v59 }
0x131c   :  { %3436 = vrsqrt.f32 %v2190_v50 }
0x131d   :  { %v2189_v36 = vadd.f32 1e-05, %v2185_v15 }
0x131e   :  { %v2183_v33 = vpop.xlane.xlu0 %2182 }
0x131f   :  { %3438 = vrsqrt.f32 %v2189_v36  ;;  %v2187_v6 = vmul.f32 0.03125, %v2183_v33 }
0x1321   :  { %v2191_v13 = vadd.f32 1e-05, %v2187_v6 }
0x1323   :  { %3440 = vrsqrt.f32 %v2191_v13 }
0x1325   :  { %v3435_v44 = vpop.eup %3434 }
0x1326   :  { %v2196_v7 = vmul.f32 %v3435_v44, %v2164_v3  ;;  %v3437_v18 = vpop.eup %3436 }
0x1327   :  { %v2198_v10 = vmul.f32 %v3437_v18, %v2166_v2 }
0x1328   :  { %v2206_v61 = vmul.f32 %v2778_v52, %v2196_v7 }
0x1329   :  { %v3439_v19 = vpop.eup %3438  ;;  %v2208_v55 = vmul.f32 %v2778_v52, %v2198_v10 }
0x132a   :  { %v2197_v17 = vmul.f32 %v3439_v19, %v2165_v37  ;;  %v2216_v54 = vadd.f32 %v2779_v25, %v2206_v61 }
0x132b   :  { %v2218_v63 = vadd.f32 %v2779_v25, %v2208_v55 }
0x132c   :  { %v2207_v1 = vmul.f32 %v2778_v52, %v2197_v17 }
0x132d   :  { %v3441_v20 = vpop.eup %3440 }
0x132e   :  { %v2199_v51 = vmul.f32 %v3441_v20, %v2167_v26  ;;  %v2217_v24 = vadd.f32 %v2779_v25, %v2207_v1 }
0x1330   :  { %v2209_v23 = vmul.f32 %v2778_v52, %v2199_v51  ;;  %v2220_v29 = vpack.c.bf16 %v2217_v24, %v2216_v54 }
0x1332   :  { %3139 = vmatprep.mubr.msk.bf16.mxu0 %vm334_vm5, %v2220_v29  ;;  %v2219_v0 = vadd.f32 %v2779_v25, %v2209_v23 }
0x1334   :  { %v2221_v27 = vpack.c.bf16 %v2219_v0, %v2218_v63 }
0x1336   :  { %3140 = vmatmul.mubr.msk.bf16.vlgmr.msra.gmra.mrb[32].mxu0 %vm334_vm5, %v2221_v27 }
0x1409   :  { %v3141_v2 = vpop.f32.mrb[32].mxu0 }
0x140a   :  { %v4659_v3 = vadd.f32 %v3141_v2, %v2781_v32  ;;  %v2287_v40 = vpop.f32.mrb[33].mxu0 }
0x140b   :  { %v4661_v48 = vadd.f32 %v2781_v32, %v2287_v40  ;;  %v3142_v4 = vpop.f32.mrb[34].mxu0 }
0x140c   :  { %v4664_v37 = vmul.f32 0.70710677, %v4659_v3  ;;  %v4666_v16 = vadd.f32 %v3142_v4, %v2781_v32  ;;  %v2290_v47 = vpop.f32.mrb[35].mxu0 }
0x140d   :  { %v4669_v46 = vmul.f32 0.70710677, %v4661_v48  ;;  %v4675_v53 = vadd.f32 %v2781_v32, %v2290_v47 }
0x140e   :  { %v2320_v45 = vand.u32 2147483647, %v4664_v37  ;;  %v4673_v26 = vmul.f32 0.70710677, %v4666_v16  ;;  %vm2312_vm10 = vcmp.ge.f32.partialorder %v4664_v37, 0.0 }
0x140f   :  { %v2318_v58 = vand.u32 2147483647, %v4669_v46  ;;  %v4680_v9 = vmul.f32 0.70710677, %v4675_v53  ;;  %vm2310_vm11 = vcmp.ge.f32.partialorder %v4669_v46, 0.0 }
0x1410   :  { %v2324_v5 = vmul.f32 0.3275911, %v2320_v45  ;;  %v2321_v31 = vand.u32 2147483647, %v4673_v26  ;;  %v2376_v59 = vsub.f32 0.0, %v2320_v45  ;;  %vm2313_vm12 = vcmp.ge.f32.partialorder %v4673_v26, 0.0 }
0x1411   :  { %v2322_v22 = vmul.f32 0.3275911, %v2318_v58  ;;  %v2319_v39 = vand.u32 2147483647, %v4680_v9  ;;  %v2374_v15 = vsub.f32 0.0, %v2318_v58  ;;  %v2314_v37 = vsel %vm2310_vm11, 1.0, %v3686_v62 }
0x1412   :  { %v2328_v49 = vadd.f32 1.0, %v2324_v5  ;;  %v2325_v8 = vmul.f32 0.3275911, %v2321_v31  ;;  %v2380_v33 = vmul.f32 %v2376_v59, %v2320_v45  ;;  %v2377_v6 = vsub.f32 0.0, %v2321_v31 }
0x1413   :  { %v2326_v11 = vadd.f32 1.0, %v2322_v22  ;;  %v2323_v50 = vmul.f32 0.3275911, %v2319_v39  ;;  %v2378_v7 = vmul.f32 %v2374_v15, %v2318_v58  ;;  %v2375_v19 = vsub.f32 0.0, %v2319_v39 }
0x1414   :  { %3442 = vrcp.f32 %v2328_v49  ;;  %v2329_v14 = vadd.f32 1.0, %v2325_v8  ;;  %v2386_v17 = vmul.f32 1.442695, %v2380_v33  ;;  %v2381_v1 = vmul.f32 %v2377_v6, %v2321_v31 }
0x1415   :  { %3444 = vrcp.f32 %v2326_v11  ;;  %v2327_v43 = vadd.f32 1.0, %v2323_v50  ;;  %v2382_v25 = vmul.f32 1.442695, %v2378_v7  ;;  %v2379_v24 = vmul.f32 %v2375_v19, %v2319_v39 }
0x1416   :  { %3446 = vrcp.f32 %v2329_v14  ;;  %v2388_v27 = vmul.f32 1.442695, %v2381_v1  ;;  %vm2311_vm13 = vcmp.ge.f32.partialorder %v4680_v9, 0.0  ;;  %v2317_v46 = vsel %vm2313_vm12, 1.0, %v3686_v62 }
0x1417   :  { %3448 = vrcp.f32 %v2327_v43  ;;  %v2384_v57 = vmul.f32 1.442695, %v2379_v24  ;;  %v2315_v24 = vsel %vm2311_vm13, 1.0, %v3686_v62  ;;  %v2303_v9 = vmul.f32 0.5, %v4675_v53 }
0x1418   :  { %3450 = vpow2.f32 %v2386_v17 }
0x1419   :  { %3452 = vpow2.f32 %v2382_v25 }
0x141a   :  { %3454 = vpow2.f32 %v2388_v27 }
0x141b   :  { %3456 = vpow2.f32 %v2384_v57 }
0x141e   :  { %v3443_v36 = vpop.eup %3442 }
0x141f   :  { %v3445_v13 = vpop.eup %3444  ;;  %v2340_v44 = vmul.f32 1.0614054, %v3443_v36 }
0x1420   :  { %v2338_v18 = vmul.f32 1.0614054, %v3445_v13  ;;  %v3447_v10 = vpop.eup %3446 }
0x1421   :  { %v2344_v52 = vadd.f32 -1.4531521, %v2340_v44  ;;  %v2341_v55 = vmul.f32 1.0614054, %v3447_v10  ;;  %v3449_v51 = vpop.eup %3448 }
0x1422   :  { %v2342_v61 = vadd.f32 -1.4531521, %v2338_v18  ;;  %v2339_v63 = vmul.f32 1.0614054, %v3449_v51  ;;  %v3451_v8 = vpop.eup %3450  ;;  %v2316_v18 = vsel %vm2312_vm10, 1.0, %v3686_v62 }
0x1423   :  { %v2348_v20 = vmul.f32 %v3443_v36, %v2344_v52  ;;  %v2345_v29 = vadd.f32 -1.4531521, %v2341_v55  ;;  %v3453_v14 = vpop.eup %3452  ;;  %v2811_v62 = vld [vmem:[%s4755_s16 + $0x1] ss:$0 sm:$0xff] }
0x1424   :  { %v2346_v54 = vmul.f32 %v3445_v13, %v2342_v61  ;;  %v2343_v38 = vadd.f32 -1.4531521, %v2339_v63  ;;  %v3455_v7 = vpop.eup %3454  ;;  %v2302_v63 = vmul.f32 0.5, %v4661_v48 }
0x1425   :  { %v2352_v23 = vadd.f32 1.4214138, %v2348_v20  ;;  %v2349_v12 = vmul.f32 %v3447_v10, %v2345_v29  ;;  %v3457_v17 = vpop.eup %3456 }
0x1426   :  { %v2350_v0 = vadd.f32 1.4214138, %v2346_v54  ;;  %v2347_v41 = vmul.f32 %v3449_v51, %v2343_v38  ;;  %v2304_v54 = vmul.f32 0.5, %v4659_v3 }
0x1427   :  { %v2356_v30 = vmul.f32 %v3443_v36, %v2352_v23  ;;  %v2353_v42 = vadd.f32 1.4214138, %v2349_v12 }
0x1428   :  { %v2354_v60 = vmul.f32 %v3445_v13, %v2350_v0  ;;  %v2351_v4 = vadd.f32 1.4214138, %v2347_v41 }
0x1429   :  { %v2360_v21 = vadd.f32 -0.28449672, %v2356_v30  ;;  %v2357_v40 = vmul.f32 %v3447_v10, %v2353_v42 }
0x142a   :  { %v2358_v32 = vadd.f32 -0.28449672, %v2354_v60  ;;  %v2355_v5 = vmul.f32 %v3449_v51, %v2351_v4 }
0x142b   :  { %v2364_v2 = vmul.f32 %v3443_v36, %v2360_v21  ;;  %v2361_v58 = vadd.f32 -0.28449672, %v2357_v40 }
0x142c   :  { %v2362_v47 = vmul.f32 %v3445_v13, %v2358_v32  ;;  %v2359_v11 = vadd.f32 -0.28449672, %v2355_v5 }
0x142d   :  { %v2368_v45 = vadd.f32 0.2548296, %v2364_v2  ;;  %v2365_v49 = vmul.f32 %v3447_v10, %v2361_v58 }
0x142e   :  { %v2366_v22 = vadd.f32 0.2548296, %v2362_v47  ;;  %v2363_v59 = vmul.f32 %v3449_v51, %v2359_v11 }
0x142f   :  { %v2372_v31 = vmul.f32 %v3443_v36, %v2368_v45  ;;  %v2369_v43 = vadd.f32 0.2548296, %v2365_v49 }
0x1430   :  { %v2370_v39 = vmul.f32 %v3445_v13, %v2366_v22  ;;  %v2367_v44 = vadd.f32 0.2548296, %v2363_v59 }
0x1431   :  { %v2392_v50 = vmul.f32 %v3451_v8, %v2372_v31  ;;  %v2373_v6 = vmul.f32 %v3447_v10, %v2369_v43 }
0x1432   :  { %v2390_v15 = vmul.f32 %v3453_v14, %v2370_v39  ;;  %v2371_v52 = vmul.f32 %v3449_v51, %v2367_v44  ;;  %v2305_v51 = vmul.f32 0.5, %v4666_v16 }
0x1433   :  { %v2396_v33 = vsub.f32 1.0, %v2392_v50  ;;  %v2393_v13 = vmul.f32 %v3455_v7, %v2373_v6 }
0x1434   :  { %v2394_v36 = vsub.f32 1.0, %v2390_v15  ;;  %v2391_v20 = vmul.f32 %v3457_v17, %v2371_v52 }
0x1435   :  { %v2400_v19 = vmul.f32 %v2396_v33, %v2316_v18  ;;  %v2397_v1 = vsub.f32 1.0, %v2393_v13  ;;  %v3265_v13 = vld [vmem:[%s4758_s19 + $0x8] sm:$0xff]  }
0x1436   :  { %v2398_v61 = vmul.f32 %v2394_v36, %v2314_v37  ;;  %v2395_v55 = vsub.f32 1.0, %v2391_v20 }
0x1437   :  { %v2404_v10 = vadd.f32 1.0, %v2400_v19  ;;  %v2401_v25 = vmul.f32 %v2397_v1, %v2317_v46  ;;  %v3264_v19 = vld [vmem:[%s4758_s19] sm:$0xff]  }
0x1438   :  { %v2402_v26 = vadd.f32 1.0, %v2398_v61  ;;  %v2399_v29 = vmul.f32 %v2395_v55, %v2315_v24  ;;  %3163 = vmatprep.subr.bf16.mxu0 %v3264_v19 }
0x1439   :  { %v2405_v23 = vadd.f32 1.0, %v2401_v25  ;;  %v2408_v0 = vmul.f32 %v2404_v10, %v2304_v54  ;;  %3164 = vmatpush3.bf16.msra.mxu0 %v3264_v19 }
0x143a   :  { %v2403_v30 = vadd.f32 1.0, %v2399_v29  ;;  %v2406_v12 = vmul.f32 %v2402_v26, %v2302_v63  ;;  %3165 = vmatprep.subr.bf16.mxu0 %v3265_v13 }
0x143b   :  { %v2409_v27 = vmul.f32 %v2405_v23, %v2305_v51  ;;  %v2812_v23 = vld [vmem:[%s4756_s17] ss:$0 sm:$0xff] }
0x143c   :  { %v2407_v60 = vmul.f32 %v2403_v30, %v2303_v9  ;;  %v2813_v30 = vld [vmem:[%s4757_s18] ss:$0 sm:$0xff] }
0x143d   :  { %v2411_v38 = vpack.c.bf16 %v2409_v27, %v2408_v0  ;;  %3166 = vmatpush3.bf16.msra.mxu0 %v3265_v13 }
0x143e   :  { %v2410_v57 = vpack.c.bf16 %v2407_v60, %v2406_v12 }
0x1440   :  { %3159 = vmatprep.mubr.bf16.mxu1 %v2410_v57 }
0x1441   :  { %3160 = vmatmul.mubr.bf16.vlgmr.msra.gmra.mrb[36].mxu1 %v2411_v38 }
0x1514   :  { %v3161_v3 = vpop.f32.mrb[36].mxu1 }
0x1515   :  { %v2528_v16 = vadd.f32 %v3161_v3, %v4600_v56  ;;  %v2511_v21 = vpop.f32.mrb[37].mxu1 }
0x1516   :  { %v2526_v48 = vadd.f32 %v2511_v21, %v4603_v35  ;;  %v3162_v42 = vpop.f32.mrb[38].mxu1 }
0x1517   :  { %v2540_v41 = vadd.f32 %v2811_v62, %v2528_v16  ;;  %v2514_v53 = vpop.f32.mrb[39].mxu1  ;;  %v2529_v4 = vadd.f32 %v3162_v42, %v4615_v28 }
0x1518   :  { %v2538_v32 = vadd.f32 %v2811_v62, %v2526_v48  ;;  %v2527_v2 = vadd.f32 %v2514_v53, %v4608_v34  ;;  %v2814_v53 = vld [vmem:[%s4782_s28] ss:$0 sm:$0xff] }
0x1519   :  { %v2550_v40 = vsel %vm334_vm5, %v2540_v41, 0.0  ;;  %v2541_v58 = vadd.f32 %v2811_v62, %v2529_v4 }
0x151a   :  { %v2539_v47 = vadd.f32 %v2811_v62, %v2527_v2  ;;  %2551 = vadd.xlane.f32.xlu1 %v2550_v40  ;;  %v2544_v45 = vsel %vm334_vm5, %v2538_v32, 0.0 }
0x151b   :  { %2545 = vadd.xlane.f32.xlu0 %v2544_v45  ;;  %v2553_v35 = vsel %vm334_vm5, %v2541_v58, 0.0 }
0x151c   :  { %v2547_v56 = vsel %vm334_vm5, %v2539_v47, 0.0 }
0x151f   :  { %2548 = vadd.xlane.f32.xlu0 %v2547_v56 }
0x1523   :  { %2554 = vadd.xlane.f32.xlu0 %v2553_v35 }
0x15a7   :  { %v2552_v5 = vpop.xlane.xlu1 %2551 }
0x15a8   :  { %v2558_v22 = vmul.f32 0.03125, %v2552_v5  ;;  %v2546_v31 = vpop.xlane.xlu0 %2545 }
0x15a9   :  { %v2556_v34 = vmul.f32 0.03125, %v2546_v31 }
0x15aa   :  { %v2562_v49 = vsub.f32 %v2540_v41, %v2558_v22 }
0x15ab   :  { %v2560_v11 = vsub.f32 %v2538_v32, %v2556_v34 }
0x15ac   :  { %v2549_v8 = vpop.xlane.xlu0 %2548  ;;  %v2566_v43 = vmul.f32 %v2562_v49, %v2562_v49 }
0x15ad   :  { %v2557_v28 = vmul.f32 0.03125, %v2549_v8  ;;  %v2564_v39 = vmul.f32 %v2560_v11, %v2560_v11 }
0x15ae   :  { %v2574_v44 = vsel %vm334_vm5, %v2566_v43, 0.0 }
0x15af   :  { %v2561_v14 = vsub.f32 %v2539_v47, %v2557_v28  ;;  %v2568_v50 = vsel %vm334_vm5, %v2564_v39, 0.0 }
0x15b0   :  { %2569 = vadd.xlane.f32.xlu1 %v2568_v50  ;;  %v2555_v59 = vpop.xlane.xlu0 %2554 }
0x15b1   :  { %v2559_v15 = vmul.f32 0.03125, %v2555_v59  ;;  %v2565_v33 = vmul.f32 %v2561_v14, %v2561_v14 }
0x15b3   :  { %v2563_v6 = vsub.f32 %v2541_v58, %v2559_v15  ;;  %v2571_v7 = vsel %vm334_vm5, %v2565_v33, 0.0 }
0x15b4   :  { %2575 = vadd.xlane.f32.xlu1 %v2574_v44  ;;  %2572 = vadd.xlane.f32.xlu0 %v2571_v7 }
0x15b5   :  { %v2567_v18 = vmul.f32 %v2563_v6, %v2563_v6 }
0x15b7   :  { %v2577_v36 = vsel %vm334_vm5, %v2567_v18, 0.0 }
0x15b8   :  { %2578 = vadd.xlane.f32.xlu0 %v2577_v36 }
0x163d   :  { %v2570_v52 = vpop.xlane.xlu1 %2569 }
0x163e   :  { %v2580_v17 = vmul.f32 0.03125, %v2570_v52 }
0x1640   :  { %v2584_v37 = vadd.f32 1e-05, %v2580_v17 }
0x1641   :  { %v2576_v61 = vpop.xlane.xlu1 %2575  ;;  %v2573_v1 = vpop.xlane.xlu0 %2572 }
0x1642   :  { %3458 = vrsqrt.f32 %v2584_v37  ;;  %v2582_v20 = vmul.f32 0.03125, %v2576_v61  ;;  %v2581_v46 = vmul.f32 0.03125, %v2573_v1 }
0x1644   :  { %v2586_v10 = vadd.f32 1e-05, %v2582_v20  ;;  %v2585_v25 = vadd.f32 1e-05, %v2581_v46 }
0x1645   :  { %v2579_v55 = vpop.xlane.xlu0 %2578 }
0x1646   :  { %3460 = vrsqrt.f32 %v2586_v10  ;;  %v2583_v54 = vmul.f32 0.03125, %v2579_v55 }
0x1647   :  { %3462 = vrsqrt.f32 %v2585_v25 }
0x1648   :  { %v2587_v24 = vadd.f32 1e-05, %v2583_v54 }
0x164a   :  { %3464 = vrsqrt.f32 %v2587_v24 }
0x164c   :  { %v3459_v26 = vpop.eup %3458 }
0x164d   :  { %v2592_v51 = vmul.f32 %v3459_v26, %v2560_v11 }
0x164f   :  { %v2602_v9 = vmul.f32 %v2812_v23, %v2592_v51 }
0x1650   :  { %v3461_v29 = vpop.eup %3460 }
0x1651   :  { %v3463_v63 = vpop.eup %3462  ;;  %v2594_v0 = vmul.f32 %v3461_v29, %v2562_v49  ;;  %v2612_v3 = vadd.f32 %v2813_v30, %v2602_v9 }
0x1652   :  { %v2593_v27 = vmul.f32 %v3463_v63, %v2561_v14 }
0x1653   :  { %v2604_v60 = vmul.f32 %v2812_v23, %v2594_v0 }
0x1654   :  { %v3465_v12 = vpop.eup %3464  ;;  %v2603_v38 = vmul.f32 %v2812_v23, %v2593_v27 }
0x1655   :  { %v2595_v57 = vmul.f32 %v3465_v12, %v2563_v6  ;;  %v2614_v48 = vadd.f32 %v2813_v30, %v2604_v60 }
0x1656   :  { %v2613_v62 = vadd.f32 %v2813_v30, %v2603_v38 }
0x1657   :  { %v2605_v16 = vmul.f32 %v2812_v23, %v2595_v57 }
0x1658   :  { %v2616_v21 = vpack.c.bf16 %v2613_v62, %v2612_v3 }
0x1659   :  { %v2615_v42 = vadd.f32 %v2813_v30, %v2605_v16 }
0x165a   :  { %3167 = vmatprep.mubr.msk.bf16.mxu0 %vm334_vm5, %v2616_v21 }
0x165b   :  { %v2617_v41 = vpack.c.bf16 %v2615_v42, %v2614_v48 }
0x165d   :  { %3168 = vmatmul.mubr.msk.bf16.vlgmr.msra.gmra.mrb[36].mxu0 %vm334_vm5, %v2617_v41 }
0x1730   :  { %v3169_v32 = vpop.f32.mrb[36].mxu0 }
0x1731   :  { %v2690_v2 = vadd.f32 %v3169_v32, %v2814_v53  ;;  %v2681_v40 = vpop.f32.mrb[37].mxu0 }
0x1732   :  { %v2682_v4 = vadd.f32 %v2814_v53, %v2681_v40  ;;  %v3170_v47 = vpop.f32.mrb[38].mxu0 }
0x1733   :  { %2698 = vst [vmem:[%s4783_s12 + $0x10] sm:$0xff] %v2690_v2  ;;  %v2693_v45 = vadd.f32 %v3170_v47, %v2814_v53  ;;  %v2684_v58 = vpop.f32.mrb[39].mxu0 }
0x1734   :  { %2696 = vst [vmem:[%s4783_s12] sm:$0xff] %v2682_v4  ;;  %v2685_v56 = vadd.f32 %v2814_v53, %v2684_v58 }
0x1735   :  { %2699 = vst [vmem:[%s4783_s12 + $0x18] sm:$0xff] %v2693_v45 }
0x1736   :  { %2697 = vst [vmem:[%s4783_s12 + $0x8] sm:$0xff] %v2685_v56 }
0x1737   :  { %2704 = vsyncpa [#allocation3], 1 }
0x1738   :  { %2705 = vsyncpa [#allocation5], 1 }
0x1739   :  { %2706 = vsyncpa [#allocation8], 1 }
0x173a   :  { %2707 = vsyncpa [#allocation11], 1 }
0x173b   :  { %2708 = vsyncpa [#allocation14], 1 }

</bundles_post_ra>
